<compile_context>
chip_gen: v6e
topology: v6e:2x2x1
jax: 0.10.0
libtpu: 0.0.40
codegen_flags: <defaults>
</compile_context>

<pallas_src>
import math
from functools import partial

import jax
import jax.numpy as jnp
from jax.experimental import pallas as pl
from jax.experimental.pallas import tpu as pltpu

# ---------------- config (small synthetic BERT) ----------------
BATCH = 2
SEQ = 8
HIDDEN = 32
NUM_HEADS = 4
HEAD_DIM = HIDDEN // NUM_HEADS
INTERMEDIATE = 64
NUM_LAYERS = 2
VOCAB = 100
TYPE_VOCAB = 2
MAX_POS = 16
NUM_LABELS = 3
LN_EPS = 1e-12

VMEM_SPEC = pl.BlockSpec(memory_space=pltpu.MemorySpace.VMEM)


# ---------------- the fused whole-model kernel ----------------
def _bert_kernel(emb_ref, maskb_ref,
                 emb_g_ref, emb_b_ref,
                 wqkv_ref, bqkv_ref, wo_ref, bo_ref, ln1_g_ref, ln1_b_ref,
                 wi_ref, bi_ref, wo2_ref, bo2_ref, ln2_g_ref, ln2_b_ref,
                 pool_w_ref, pool_b_ref, cls_w_ref, cls_b_ref,
                 logits_ref, ctx_ref):
    """Whole BERT forward for tiny shapes; everything stays in VMEM.

    emb:   (B*S, H) summed word+pos+type embeddings (pre-LayerNorm)
    maskb: (B, S)   additive attention-mask bias ((1-mask)*-1e9), broadcast over queries
    stacked per-layer weights have a leading NUM_LAYERS axis
    output: logits (B, NUM_LABELS)
    scratch ctx_ref: (B*S, H) merged attention context (also fuses the head-merge layout)
    """
    scale = 1.0 / math.sqrt(HEAD_DIM)

    def layer_norm(x, g, b):
        mean = jnp.mean(x, axis=-1, keepdims=True)
        cent = x - mean
        var = jnp.mean(cent * cent, axis=-1, keepdims=True)
        return cent * jax.lax.rsqrt(var + LN_EPS) * g + b

    maskb = maskb_ref[...]                                            # (B, S)

    # embeddings LayerNorm
    h = layer_norm(emb_ref[...], emb_g_ref[...], emb_b_ref[...])      # (B*S, H)

    for l in range(NUM_LAYERS):
        # ---- fused QKV projection: one matmul, lane-dense 3*HIDDEN output ----
        qkv = jnp.dot(h, wqkv_ref[l], preferred_element_type=jnp.float32) + bqkv_ref[l]

        # ---- attention: all (batch, head) pairs unrolled in-kernel ----
        for b in range(BATCH):
            r0 = b * SEQ
            bias = maskb[b:b + 1, :]                                  # (1, S)
            for hd in range(NUM_HEADS):
                c0 = hd * HEAD_DIM
                qh = qkv[r0:r0 + SEQ, c0:c0 + HEAD_DIM]               # (S, D)
                kh = qkv[r0:r0 + SEQ, HIDDEN + c0:HIDDEN + c0 + HEAD_DIM]
                vh = qkv[r0:r0 + SEQ, 2 * HIDDEN + c0:2 * HIDDEN + c0 + HEAD_DIM]
                s = jnp.dot(qh, kh.T, preferred_element_type=jnp.float32) * scale + bias
                m = jnp.max(s, axis=-1, keepdims=True)
                p = jnp.exp(s - m)
                attn = p * pl.reciprocal(jnp.sum(p, axis=-1, keepdims=True), approx=True)
                # merged-heads layout written directly into the scratch buffer
                ctx_ref[r0:r0 + SEQ, c0:c0 + HEAD_DIM] = jnp.dot(
                    attn, vh, preferred_element_type=jnp.float32)

        # ---- attention output projection + residual + LayerNorm (fused epilogue) ----
        attn_out = jnp.dot(ctx_ref[...], wo_ref[l],
                           preferred_element_type=jnp.float32) + bo_ref[l]
        h = layer_norm(h + attn_out, ln1_g_ref[l], ln1_b_ref[l])

        # ---- FFN (exact erf-GELU) + residual + LayerNorm ----
        ff = jnp.dot(h, wi_ref[l], preferred_element_type=jnp.float32) + bi_ref[l]
        ff = 0.5 * ff * (1.0 + jax.lax.erf(ff / math.sqrt(2.0)))
        ff = jnp.dot(ff, wo2_ref[l], preferred_element_type=jnp.float32) + bo2_ref[l]
        h = layer_norm(h + ff, ln2_g_ref[l], ln2_b_ref[l])

    # ---- pooler (tanh on [CLS] rows) + dropout(identity at eval) + classifier ----
    for b in range(BATCH):
        cls_row = h[b * SEQ:b * SEQ + 1, :]                           # (1, H)
        pooled = jnp.tanh(jnp.dot(cls_row, pool_w_ref[...],
                                  preferred_element_type=jnp.float32) + pool_b_ref[...])
        logits_ref[b:b + 1, :] = jnp.dot(pooled, cls_w_ref[...],
                                         preferred_element_type=jnp.float32) + cls_b_ref[...]


def bert_fused_call(emb, mask_bias, p):
    """Single pallas_call for the full forward. `p` is the packed/stacked parameter dict."""
    args = (emb, mask_bias,
            p["emb_ln_g"], p["emb_ln_b"],
            p["wqkv"], p["bqkv"], p["wo"], p["bo"], p["ln1_g"], p["ln1_b"],
            p["wi"], p["bi"], p["wo2"], p["bo2"], p["ln2_g"], p["ln2_b"],
            p["pool_w"], p["pool_b"], p["cls_w"], p["cls_b"])
    return pl.pallas_call(
        _bert_kernel,
        out_shape=jax.ShapeDtypeStruct((BATCH, NUM_LABELS), jnp.float32),
        in_specs=[VMEM_SPEC] * len(args),
        out_specs=VMEM_SPEC,
        scratch_shapes=[pltpu.VMEM((BATCH * SEQ, HIDDEN), jnp.float32)],
    )(*args)


# ---------------- model (thin JAX glue around the fused kernel) ----------------
def bert_lr_forward(packed, input_ids, attention_mask, token_type_ids, labels=None):
    # embedding gathers are glue (no clean Pallas equivalent at this size)
    we = jnp.take(packed["word_emb"], input_ids, axis=0)              # (B, S, H)
    pe = packed["pos_emb"][:SEQ][None, :, :]                          # (1, S, H)
    te = jnp.take(packed["type_emb"], token_type_ids, axis=0)         # (B, S, H)
    emb = (we + pe + te).reshape(BATCH * SEQ, HIDDEN)

    # additive mask bias precomputed once (broadcast over heads & queries inside the kernel)
    mask_bias = (1.0 - attention_mask.astype(jnp.float32)) * -1e9     # (B, S)

    logits = bert_fused_call(emb, mask_bias, packed)                  # (B, NUM_LABELS)

    loss = None
    if labels is not None:
        # num_labels > 1 -> CrossEntropyLoss (tiny (B, num_labels) reduction kept in glue)
        logp = jax.nn.log_softmax(logits, axis=-1)
        loss = -jnp.mean(jnp.take_along_axis(logp, labels[:, None], axis=1))
    return loss, logits


# ---------------- deterministic parameter init + packing ----------------
def init_params(key):
    keys = iter(jax.random.split(key, 16 + 8 * NUM_LAYERS))

    def nrm(shape, scale=0.02):
        return scale * jax.random.normal(next(keys), shape, dtype=jnp.float32)

    params = {
        "word_emb": nrm((VOCAB, HIDDEN)),
        "pos_emb": nrm((MAX_POS, HIDDEN)),
        "type_emb": nrm((TYPE_VOCAB, HIDDEN)),
        "emb_ln_g": jnp.ones((HIDDEN,), jnp.float32),
        "emb_ln_b": jnp.zeros((HIDDEN,), jnp.float32),
        "pool_w": nrm((HIDDEN, HIDDEN)),
        "pool_b": jnp.zeros((HIDDEN,), jnp.float32),
        "cls_w": nrm((HIDDEN, NUM_LABELS)),
        "cls_b": jnp.zeros((NUM_LABELS,), jnp.float32),
        "layers": [],
    }
    for _ in range(NUM_LAYERS):
        params["layers"].append({
            "wq": nrm((HIDDEN, HIDDEN)), "bq": jnp.zeros((HIDDEN,), jnp.float32),
            "wk": nrm((HIDDEN, HIDDEN)), "bk": jnp.zeros((HIDDEN,), jnp.float32),
            "wv": nrm((HIDDEN, HIDDEN)), "bv": jnp.zeros((HIDDEN,), jnp.float32),
            "wo": nrm((HIDDEN, HIDDEN)), "bo": jnp.zeros((HIDDEN,), jnp.float32),
            "ln1_g": jnp.ones((HIDDEN,), jnp.float32),
            "ln1_b": jnp.zeros((HIDDEN,), jnp.float32),
            "wi": nrm((HIDDEN, INTERMEDIATE)), "bi": jnp.zeros((INTERMEDIATE,), jnp.float32),
            "wo2": nrm((INTERMEDIATE, HIDDEN)), "bo2": jnp.zeros((HIDDEN,), jnp.float32),
            "ln2_g": jnp.ones((HIDDEN,), jnp.float32),
            "ln2_b": jnp.zeros((HIDDEN,), jnp.float32),
        })
    return params


def pack_params(params):
    """Fuse per-layer Q/K/V weights, reshape biases to (1,N), and stack layers along a leading axis."""
    L = params["layers"]

    def qkv_w(lp):
        return jnp.concatenate([lp["wq"], lp["wk"], lp["wv"]], axis=1)      # (H, 3H)

    def qkv_b(lp):
        return jnp.concatenate([lp["bq"], lp["bk"], lp["bv"]])[None, :]     # (1, 3H)

    return {
        "word_emb": params["word_emb"],
        "pos_emb": params["pos_emb"],
        "type_emb": params["type_emb"],
        "emb_ln_g": params["emb_ln_g"][None, :],
        "emb_ln_b": params["emb_ln_b"][None, :],
        "wqkv": jnp.stack([qkv_w(lp) for lp in L]),                         # (L, H, 3H)
        "bqkv": jnp.stack([qkv_b(lp) for lp in L]),                         # (L, 1, 3H)
        "wo":   jnp.stack([lp["wo"] for lp in L]),                          # (L, H, H)
        "bo":   jnp.stack([lp["bo"][None, :] for lp in L]),                 # (L, 1, H)
        "ln1_g": jnp.stack([lp["ln1_g"][None, :] for lp in L]),
        "ln1_b": jnp.stack([lp["ln1_b"][None, :] for lp in L]),
        "wi":   jnp.stack([lp["wi"] for lp in L]),                          # (L, H, I)
        "bi":   jnp.stack([lp["bi"][None, :] for lp in L]),                 # (L, 1, I)
        "wo2":  jnp.stack([lp["wo2"] for lp in L]),                         # (L, I, H)
        "bo2":  jnp.stack([lp["bo2"][None, :] for lp in L]),
        "ln2_g": jnp.stack([lp["ln2_g"][None, :] for lp in L]),
        "ln2_b": jnp.stack([lp["ln2_b"][None, :] for lp in L]),
        "pool_w": params["pool_w"], "pool_b": params["pool_b"][None, :],
        "cls_w": params["cls_w"], "cls_b": params["cls_b"][None, :],
    }


if __name__ == "__main__":
    key = jax.random.PRNGKey(0)
    pkey, k_ids, k_lbl = jax.random.split(key, 3)
    packed = pack_params(init_params(pkey))

    input_ids = jax.random.randint(k_ids, (BATCH, SEQ), 0, VOCAB, dtype=jnp.int32)
    token_type_ids = jnp.zeros((BATCH, SEQ), dtype=jnp.int32)
    attention_mask = jnp.ones((BATCH, SEQ), dtype=jnp.int32)
    labels = jax.random.randint(k_lbl, (BATCH,), 0, NUM_LABELS, dtype=jnp.int32)

    forward = jax.jit(bert_lr_forward)
    loss, logits = forward(packed, input_ids, attention_mask, token_type_ids, labels)
    jax.block_until_ready((loss, logits))
    assert logits.shape == (BATCH, NUM_LABELS)
    assert loss.shape == ()
    assert bool(jnp.isfinite(loss)) and bool(jnp.all(jnp.isfinite(logits)))
    print("KERNEL_OK")
</pallas_src>

<mosaic_0001>
module attributes {stable_mosaic.version = 11 : i64} {
  func.func @_bert_kernel(%arg0: memref<16x32xf32, #tpu.memory_space<vmem>>, %arg1: memref<2x8xf32, #tpu.memory_space<vmem>>, %arg2: memref<1x32xf32, #tpu.memory_space<vmem>>, %arg3: memref<1x32xf32, #tpu.memory_space<vmem>>, %arg4: memref<2x32x96xf32, #tpu.memory_space<vmem>>, %arg5: memref<2x1x96xf32, #tpu.memory_space<vmem>>, %arg6: memref<2x32x32xf32, #tpu.memory_space<vmem>>, %arg7: memref<2x1x32xf32, #tpu.memory_space<vmem>>, %arg8: memref<2x1x32xf32, #tpu.memory_space<vmem>>, %arg9: memref<2x1x32xf32, #tpu.memory_space<vmem>>, %arg10: memref<2x32x64xf32, #tpu.memory_space<vmem>>, %arg11: memref<2x1x64xf32, #tpu.memory_space<vmem>>, %arg12: memref<2x64x32xf32, #tpu.memory_space<vmem>>, %arg13: memref<2x1x32xf32, #tpu.memory_space<vmem>>, %arg14: memref<2x1x32xf32, #tpu.memory_space<vmem>>, %arg15: memref<2x1x32xf32, #tpu.memory_space<vmem>>, %arg16: memref<32x32xf32, #tpu.memory_space<vmem>>, %arg17: memref<1x32xf32, #tpu.memory_space<vmem>>, %arg18: memref<32x3xf32, #tpu.memory_space<vmem>>, %arg19: memref<1x3xf32, #tpu.memory_space<vmem>>, %arg20: memref<2x3xf32, #tpu.memory_space<vmem>>, %arg21: memref<16x32xf32, #tpu.memory_space<vmem>>) attributes {dimension_semantics = [], scalar_prefetch = 0 : i64, scratch_operands = 1 : i64, tpu.core_type = #tpu.core_type<tc>} {
    %c0 = arith.constant 0 : index
    %c0_0 = arith.constant 0 : index
    %0 = vector.load %arg1[%c0, %c0_0] : memref<2x8xf32, #tpu.memory_space<vmem>>, vector<2x8xf32>
    %c0_1 = arith.constant 0 : index
    %c0_2 = arith.constant 0 : index
    %1 = vector.load %arg0[%c0_1, %c0_2] : memref<16x32xf32, #tpu.memory_space<vmem>>, vector<16x32xf32>
    %c0_3 = arith.constant 0 : index
    %c0_4 = arith.constant 0 : index
    %2 = vector.load %arg2[%c0_3, %c0_4] : memref<1x32xf32, #tpu.memory_space<vmem>>, vector<1x32xf32>
    %c0_5 = arith.constant 0 : index
    %c0_6 = arith.constant 0 : index
    %3 = vector.load %arg3[%c0_5, %c0_6] : memref<1x32xf32, #tpu.memory_space<vmem>>, vector<1x32xf32>
    %cst = arith.constant dense<0.000000e+00> : vector<16xf32>
    %4 = vector.multi_reduction <add>, %1, %cst [1] : vector<16x32xf32> to vector<16xf32>
    %5 = vector.shape_cast %4 : vector<16xf32> to vector<16x1xf32>
    %cst_7 = arith.constant 3.200000e+01 : f32
    %6 = vector.broadcast %cst_7 : f32 to vector<16x1xf32>
    %7 = arith.divf %5, %6 : vector<16x1xf32>
    %8 = vector.broadcast %7 : vector<16x1xf32> to vector<16x32xf32>
    %9 = arith.subf %1, %8 : vector<16x32xf32>
    %10 = arith.mulf %9, %9 : vector<16x32xf32>
    %cst_8 = arith.constant dense<0.000000e+00> : vector<16xf32>
    %11 = vector.multi_reduction <add>, %10, %cst_8 [1] : vector<16x32xf32> to vector<16xf32>
    %12 = vector.shape_cast %11 : vector<16xf32> to vector<16x1xf32>
    %cst_9 = arith.constant 3.200000e+01 : f32
    %13 = vector.broadcast %cst_9 : f32 to vector<16x1xf32>
    %14 = arith.divf %12, %13 : vector<16x1xf32>
    %cst_10 = arith.constant 9.99999996E-13 : f32
    %15 = vector.broadcast %cst_10 : f32 to vector<16x1xf32>
    %16 = arith.addf %14, %15 : vector<16x1xf32>
    %17 = math.rsqrt %16 : vector<16x1xf32>
    %18 = vector.broadcast %17 : vector<16x1xf32> to vector<16x32xf32>
    %19 = arith.mulf %9, %18 : vector<16x32xf32>
    %20 = vector.broadcast %2 : vector<1x32xf32> to vector<16x32xf32>
    %21 = arith.mulf %19, %20 : vector<16x32xf32>
    %22 = vector.broadcast %3 : vector<1x32xf32> to vector<16x32xf32>
    %23 = arith.addf %21, %22 : vector<16x32xf32>
    %c0_11 = arith.constant 0 : index
    %c0_12 = arith.constant 0 : index
    %c0_13 = arith.constant 0 : index
    %24 = vector.load %arg4[%c0_11, %c0_12, %c0_13] : memref<2x32x96xf32, #tpu.memory_space<vmem>>, vector<1x32x96xf32>
    %25 = vector.shape_cast %24 : vector<1x32x96xf32> to vector<32x96xf32>
    %cst_14 = arith.constant dense<0.000000e+00> : vector<16x96xf32>
    %26 = tpu.matmul %23, %25, %cst_14 {dimension_numbers = #tpu.dot_dimension_numbers<[1], [0], [0], [1], [0, 0, 1, 1], [], []>} : vector<16x32xf32>, vector<32x96xf32>, vector<16x96xf32> -> vector<16x96xf32>
    %c0_15 = arith.constant 0 : index
    %c0_16 = arith.constant 0 : index
    %c0_17 = arith.constant 0 : index
    %27 = vector.load %arg5[%c0_15, %c0_16, %c0_17] : memref<2x1x96xf32, #tpu.memory_space<vmem>>, vector<1x1x96xf32>
    %28 = vector.shape_cast %27 : vector<1x1x96xf32> to vector<1x96xf32>
    %29 = vector.broadcast %28 : vector<1x96xf32> to vector<16x96xf32>
    %30 = arith.addf %26, %29 : vector<16x96xf32>
    %31 = vector.extract_strided_slice %0 {offsets = [0, 0], sizes = [1, 8], strides = [1, 1]} : vector<2x8xf32> to vector<1x8xf32>
    %32 = vector.extract_strided_slice %30 {offsets = [0, 0], sizes = [8, 8], strides = [1, 1]} : vector<16x96xf32> to vector<8x8xf32>
    %33 = vector.extract_strided_slice %30 {offsets = [0, 32], sizes = [8, 8], strides = [1, 1]} : vector<16x96xf32> to vector<8x8xf32>
    %34 = vector.extract_strided_slice %30 {offsets = [0, 64], sizes = [8, 8], strides = [1, 1]} : vector<16x96xf32> to vector<8x8xf32>
    %35 = tpu.transpose %33, [1, 0] : vector<8x8xf32> -> vector<8x8xf32>
    %cst_18 = arith.constant dense<0.000000e+00> : vector<8x8xf32>
    %36 = tpu.matmul %32, %35, %cst_18 {dimension_numbers = #tpu.dot_dimension_numbers<[1], [0], [0], [1], [0, 0, 1, 1], [], []>} : vector<8x8xf32>, vector<8x8xf32>, vector<8x8xf32> -> vector<8x8xf32>
    %cst_19 = arith.constant 0.353553385 : f32
    %37 = vector.broadcast %cst_19 : f32 to vector<8x8xf32>
    %38 = arith.mulf %36, %37 : vector<8x8xf32>
    %39 = vector.broadcast %31 : vector<1x8xf32> to vector<8x8xf32>
    %40 = arith.addf %38, %39 : vector<8x8xf32>
    %cst_20 = arith.constant dense<0xFF800000> : vector<8xf32>
    %41 = vector.multi_reduction <maximumf>, %40, %cst_20 [1] : vector<8x8xf32> to vector<8xf32>
    %42 = vector.shape_cast %41 : vector<8xf32> to vector<8x1xf32>
    %43 = vector.broadcast %42 : vector<8x1xf32> to vector<8x8xf32>
    %44 = arith.subf %40, %43 : vector<8x8xf32>
    %45 = math.exp %44 : vector<8x8xf32>
    %cst_21 = arith.constant dense<0.000000e+00> : vector<8xf32>
    %46 = vector.multi_reduction <add>, %45, %cst_21 [1] : vector<8x8xf32> to vector<8xf32>
    %47 = vector.shape_cast %46 : vector<8xf32> to vector<8x1xf32>
    %48 = tpu.reciprocal %47 {approx = true} : vector<8x1xf32> -> vector<8x1xf32>
    %49 = vector.broadcast %48 : vector<8x1xf32> to vector<8x8xf32>
    %50 = arith.mulf %45, %49 : vector<8x8xf32>
    %cst_22 = arith.constant dense<0.000000e+00> : vector<8x8xf32>
    %51 = tpu.matmul %50, %34, %cst_22 {dimension_numbers = #tpu.dot_dimension_numbers<[1], [0], [0], [1], [0, 0, 1, 1], [], []>} : vector<8x8xf32>, vector<8x8xf32>, vector<8x8xf32> -> vector<8x8xf32>
    %c0_23 = arith.constant 0 : index
    %c0_24 = arith.constant 0 : index
    %52 = vector.load %arg21[%c0_23, %c0_24] : memref<16x32xf32, #tpu.memory_space<vmem>>, vector<8x8xf32>
    tpu.vector_store %arg21[%c0_23, %c0_24], %51 {strides = array<i32>} : memref<16x32xf32, #tpu.memory_space<vmem>>, vector<8x8xf32>,
    %53 = vector.extract_strided_slice %30 {offsets = [0, 8], sizes = [8, 8], strides = [1, 1]} : vector<16x96xf32> to vector<8x8xf32>
    %54 = vector.extract_strided_slice %30 {offsets = [0, 40], sizes = [8, 8], strides = [1, 1]} : vector<16x96xf32> to vector<8x8xf32>
    %55 = vector.extract_strided_slice %30 {offsets = [0, 72], sizes = [8, 8], strides = [1, 1]} : vector<16x96xf32> to vector<8x8xf32>
    %56 = tpu.transpose %54, [1, 0] : vector<8x8xf32> -> vector<8x8xf32>
    %cst_25 = arith.constant dense<0.000000e+00> : vector<8x8xf32>
    %57 = tpu.matmul %53, %56, %cst_25 {dimension_numbers = #tpu.dot_dimension_numbers<[1], [0], [0], [1], [0, 0, 1, 1], [], []>} : vector<8x8xf32>, vector<8x8xf32>, vector<8x8xf32> -> vector<8x8xf32>
    %cst_26 = arith.constant 0.353553385 : f32
    %58 = vector.broadcast %cst_26 : f32 to vector<8x8xf32>
    %59 = arith.mulf %57, %58 : vector<8x8xf32>
    %60 = vector.broadcast %31 : vector<1x8xf32> to vector<8x8xf32>
    %61 = arith.addf %59, %60 : vector<8x8xf32>
    %cst_27 = arith.constant dense<0xFF800000> : vector<8xf32>
    %62 = vector.multi_reduction <maximumf>, %61, %cst_27 [1] : vector<8x8xf32> to vector<8xf32>
    %63 = vector.shape_cast %62 : vector<8xf32> to vector<8x1xf32>
    %64 = vector.broadcast %63 : vector<8x1xf32> to vector<8x8xf32>
    %65 = arith.subf %61, %64 : vector<8x8xf32>
    %66 = math.exp %65 : vector<8x8xf32>
    %cst_28 = arith.constant dense<0.000000e+00> : vector<8xf32>
    %67 = vector.multi_reduction <add>, %66, %cst_28 [1] : vector<8x8xf32> to vector<8xf32>
    %68 = vector.shape_cast %67 : vector<8xf32> to vector<8x1xf32>
    %69 = tpu.reciprocal %68 {approx = true} : vector<8x1xf32> -> vector<8x1xf32>
    %70 = vector.broadcast %69 : vector<8x1xf32> to vector<8x8xf32>
    %71 = arith.mulf %66, %70 : vector<8x8xf32>
    %cst_29 = arith.constant dense<0.000000e+00> : vector<8x8xf32>
    %72 = tpu.matmul %71, %55, %cst_29 {dimension_numbers = #tpu.dot_dimension_numbers<[1], [0], [0], [1], [0, 0, 1, 1], [], []>} : vector<8x8xf32>, vector<8x8xf32>, vector<8x8xf32> -> vector<8x8xf32>
    %c0_30 = arith.constant 0 : index
    %c8 = arith.constant 8 : index
    %73 = vector.load %arg21[%c0_30, %c8] : memref<16x32xf32, #tpu.memory_space<vmem>>, vector<8x8xf32>
    tpu.vector_store %arg21[%c0_30, %c8], %72 {strides = array<i32>} : memref<16x32xf32, #tpu.memory_space<vmem>>, vector<8x8xf32>,
    %74 = vector.extract_strided_slice %30 {offsets = [0, 16], sizes = [8, 8], strides = [1, 1]} : vector<16x96xf32> to vector<8x8xf32>
    %75 = vector.extract_strided_slice %30 {offsets = [0, 48], sizes = [8, 8], strides = [1, 1]} : vector<16x96xf32> to vector<8x8xf32>
    %76 = vector.extract_strided_slice %30 {offsets = [0, 80], sizes = [8, 8], strides = [1, 1]} : vector<16x96xf32> to vector<8x8xf32>
    %77 = tpu.transpose %75, [1, 0] : vector<8x8xf32> -> vector<8x8xf32>
    %cst_31 = arith.constant dense<0.000000e+00> : vector<8x8xf32>
    %78 = tpu.matmul %74, %77, %cst_31 {dimension_numbers = #tpu.dot_dimension_numbers<[1], [0], [0], [1], [0, 0, 1, 1], [], []>} : vector<8x8xf32>, vector<8x8xf32>, vector<8x8xf32> -> vector<8x8xf32>
    %cst_32 = arith.constant 0.353553385 : f32
    %79 = vector.broadcast %cst_32 : f32 to vector<8x8xf32>
    %80 = arith.mulf %78, %79 : vector<8x8xf32>
    %81 = vector.broadcast %31 : vector<1x8xf32> to vector<8x8xf32>
    %82 = arith.addf %80, %81 : vector<8x8xf32>
    %cst_33 = arith.constant dense<0xFF800000> : vector<8xf32>
    %83 = vector.multi_reduction <maximumf>, %82, %cst_33 [1] : vector<8x8xf32> to vector<8xf32>
    %84 = vector.shape_cast %83 : vector<8xf32> to vector<8x1xf32>
    %85 = vector.broadcast %84 : vector<8x1xf32> to vector<8x8xf32>
    %86 = arith.subf %82, %85 : vector<8x8xf32>
    %87 = math.exp %86 : vector<8x8xf32>
    %cst_34 = arith.constant dense<0.000000e+00> : vector<8xf32>
    %88 = vector.multi_reduction <add>, %87, %cst_34 [1] : vector<8x8xf32> to vector<8xf32>
    %89 = vector.shape_cast %88 : vector<8xf32> to vector<8x1xf32>
    %90 = tpu.reciprocal %89 {approx = true} : vector<8x1xf32> -> vector<8x1xf32>
    %91 = vector.broadcast %90 : vector<8x1xf32> to vector<8x8xf32>
    %92 = arith.mulf %87, %91 : vector<8x8xf32>
    %cst_35 = arith.constant dense<0.000000e+00> : vector<8x8xf32>
    %93 = tpu.matmul %92, %76, %cst_35 {dimension_numbers = #tpu.dot_dimension_numbers<[1], [0], [0], [1], [0, 0, 1, 1], [], []>} : vector<8x8xf32>, vector<8x8xf32>, vector<8x8xf32> -> vector<8x8xf32>
    %c0_36 = arith.constant 0 : index
    %c16 = arith.constant 16 : index
    %94 = vector.load %arg21[%c0_36, %c16] : memref<16x32xf32, #tpu.memory_space<vmem>>, vector<8x8xf32>
    tpu.vector_store %arg21[%c0_36, %c16], %93 {strides = array<i32>} : memref<16x32xf32, #tpu.memory_space<vmem>>, vector<8x8xf32>,
    %95 = vector.extract_strided_slice %30 {offsets = [0, 24], sizes = [8, 8], strides = [1, 1]} : vector<16x96xf32> to vector<8x8xf32>
    %96 = vector.extract_strided_slice %30 {offsets = [0, 56], sizes = [8, 8], strides = [1, 1]} : vector<16x96xf32> to vector<8x8xf32>
    %97 = vector.extract_strided_slice %30 {offsets = [0, 88], sizes = [8, 8], strides = [1, 1]} : vector<16x96xf32> to vector<8x8xf32>
    %98 = tpu.transpose %96, [1, 0] : vector<8x8xf32> -> vector<8x8xf32>
    %cst_37 = arith.constant dense<0.000000e+00> : vector<8x8xf32>
    %99 = tpu.matmul %95, %98, %cst_37 {dimension_numbers = #tpu.dot_dimension_numbers<[1], [0], [0], [1], [0, 0, 1, 1], [], []>} : vector<8x8xf32>, vector<8x8xf32>, vector<8x8xf32> -> vector<8x8xf32>
    %cst_38 = arith.constant 0.353553385 : f32
    %100 = vector.broadcast %cst_38 : f32 to vector<8x8xf32>
    %101 = arith.mulf %99, %100 : vector<8x8xf32>
    %102 = vector.broadcast %31 : vector<1x8xf32> to vector<8x8xf32>
    %103 = arith.addf %101, %102 : vector<8x8xf32>
    %cst_39 = arith.constant dense<0xFF800000> : vector<8xf32>
    %104 = vector.multi_reduction <maximumf>, %103, %cst_39 [1] : vector<8x8xf32> to vector<8xf32>
    %105 = vector.shape_cast %104 : vector<8xf32> to vector<8x1xf32>
    %106 = vector.broadcast %105 : vector<8x1xf32> to vector<8x8xf32>
    %107 = arith.subf %103, %106 : vector<8x8xf32>
    %108 = math.exp %107 : vector<8x8xf32>
    %cst_40 = arith.constant dense<0.000000e+00> : vector<8xf32>
    %109 = vector.multi_reduction <add>, %108, %cst_40 [1] : vector<8x8xf32> to vector<8xf32>
    %110 = vector.shape_cast %109 : vector<8xf32> to vector<8x1xf32>
    %111 = tpu.reciprocal %110 {approx = true} : vector<8x1xf32> -> vector<8x1xf32>
    %112 = vector.broadcast %111 : vector<8x1xf32> to vector<8x8xf32>
    %113 = arith.mulf %108, %112 : vector<8x8xf32>
    %cst_41 = arith.constant dense<0.000000e+00> : vector<8x8xf32>
    %114 = tpu.matmul %113, %97, %cst_41 {dimension_numbers = #tpu.dot_dimension_numbers<[1], [0], [0], [1], [0, 0, 1, 1], [], []>} : vector<8x8xf32>, vector<8x8xf32>, vector<8x8xf32> -> vector<8x8xf32>
    %c0_42 = arith.constant 0 : index
    %c24 = arith.constant 24 : index
    %115 = vector.load %arg21[%c0_42, %c24] : memref<16x32xf32, #tpu.memory_space<vmem>>, vector<8x8xf32>
    tpu.vector_store %arg21[%c0_42, %c24], %114 {strides = array<i32>} : memref<16x32xf32, #tpu.memory_space<vmem>>, vector<8x8xf32>,
    %116 = vector.extract_strided_slice %0 {offsets = [1, 0], sizes = [1, 8], strides = [1, 1]} : vector<2x8xf32> to vector<1x8xf32>
    %117 = vector.extract_strided_slice %30 {offsets = [8, 0], sizes = [8, 8], strides = [1, 1]} : vector<16x96xf32> to vector<8x8xf32>
    %118 = vector.extract_strided_slice %30 {offsets = [8, 32], sizes = [8, 8], strides = [1, 1]} : vector<16x96xf32> to vector<8x8xf32>
    %119 = vector.extract_strided_slice %30 {offsets = [8, 64], sizes = [8, 8], strides = [1, 1]} : vector<16x96xf32> to vector<8x8xf32>
    %120 = tpu.transpose %118, [1, 0] : vector<8x8xf32> -> vector<8x8xf32>
    %cst_43 = arith.constant dense<0.000000e+00> : vector<8x8xf32>
    %121 = tpu.matmul %117, %120, %cst_43 {dimension_numbers = #tpu.dot_dimension_numbers<[1], [0], [0], [1], [0, 0, 1, 1], [], []>} : vector<8x8xf32>, vector<8x8xf32>, vector<8x8xf32> -> vector<8x8xf32>
    %cst_44 = arith.constant 0.353553385 : f32
    %122 = vector.broadcast %cst_44 : f32 to vector<8x8xf32>
    %123 = arith.mulf %121, %122 : vector<8x8xf32>
    %124 = vector.broadcast %116 : vector<1x8xf32> to vector<8x8xf32>
    %125 = arith.addf %123, %124 : vector<8x8xf32>
    %cst_45 = arith.constant dense<0xFF800000> : vector<8xf32>
    %126 = vector.multi_reduction <maximumf>, %125, %cst_45 [1] : vector<8x8xf32> to vector<8xf32>
    %127 = vector.shape_cast %126 : vector<8xf32> to vector<8x1xf32>
    %128 = vector.broadcast %127 : vector<8x1xf32> to vector<8x8xf32>
    %129 = arith.subf %125, %128 : vector<8x8xf32>
    %130 = math.exp %129 : vector<8x8xf32>
    %cst_46 = arith.constant dense<0.000000e+00> : vector<8xf32>
    %131 = vector.multi_reduction <add>, %130, %cst_46 [1] : vector<8x8xf32> to vector<8xf32>
    %132 = vector.shape_cast %131 : vector<8xf32> to vector<8x1xf32>
    %133 = tpu.reciprocal %132 {approx = true} : vector<8x1xf32> -> vector<8x1xf32>
    %134 = vector.broadcast %133 : vector<8x1xf32> to vector<8x8xf32>
    %135 = arith.mulf %130, %134 : vector<8x8xf32>
    %cst_47 = arith.constant dense<0.000000e+00> : vector<8x8xf32>
    %136 = tpu.matmul %135, %119, %cst_47 {dimension_numbers = #tpu.dot_dimension_numbers<[1], [0], [0], [1], [0, 0, 1, 1], [], []>} : vector<8x8xf32>, vector<8x8xf32>, vector<8x8xf32> -> vector<8x8xf32>
    %c8_48 = arith.constant 8 : index
    %c0_49 = arith.constant 0 : index
    %137 = vector.load %arg21[%c8_48, %c0_49] : memref<16x32xf32, #tpu.memory_space<vmem>>, vector<8x8xf32>
    tpu.vector_store %arg21[%c8_48, %c0_49], %136 {strides = array<i32>} : memref<16x32xf32, #tpu.memory_space<vmem>>, vector<8x8xf32>,
    %138 = vector.extract_strided_slice %30 {offsets = [8, 8], sizes = [8, 8], strides = [1, 1]} : vector<16x96xf32> to vector<8x8xf32>
    %139 = vector.extract_strided_slice %30 {offsets = [8, 40], sizes = [8, 8], strides = [1, 1]} : vector<16x96xf32> to vector<8x8xf32>
    %140 = vector.extract_strided_slice %30 {offsets = [8, 72], sizes = [8, 8], strides = [1, 1]} : vector<16x96xf32> to vector<8x8xf32>
    %141 = tpu.transpose %139, [1, 0] : vector<8x8xf32> -> vector<8x8xf32>
    %cst_50 = arith.constant dense<0.000000e+00> : vector<8x8xf32>
    %142 = tpu.matmul %138, %141, %cst_50 {dimension_numbers = #tpu.dot_dimension_numbers<[1], [0], [0], [1], [0, 0, 1, 1], [], []>} : vector<8x8xf32>, vector<8x8xf32>, vector<8x8xf32> -> vector<8x8xf32>
    %cst_51 = arith.constant 0.353553385 : f32
    %143 = vector.broadcast %cst_51 : f32 to vector<8x8xf32>
    %144 = arith.mulf %142, %143 : vector<8x8xf32>
    %145 = vector.broadcast %116 : vector<1x8xf32> to vector<8x8xf32>
    %146 = arith.addf %144, %145 : vector<8x8xf32>
    %cst_52 = arith.constant dense<0xFF800000> : vector<8xf32>
    %147 = vector.multi_reduction <maximumf>, %146, %cst_52 [1] : vector<8x8xf32> to vector<8xf32>
    %148 = vector.shape_cast %147 : vector<8xf32> to vector<8x1xf32>
    %149 = vector.broadcast %148 : vector<8x1xf32> to vector<8x8xf32>
    %150 = arith.subf %146, %149 : vector<8x8xf32>
    %151 = math.exp %150 : vector<8x8xf32>
    %cst_53 = arith.constant dense<0.000000e+00> : vector<8xf32>
    %152 = vector.multi_reduction <add>, %151, %cst_53 [1] : vector<8x8xf32> to vector<8xf32>
    %153 = vector.shape_cast %152 : vector<8xf32> to vector<8x1xf32>
    %154 = tpu.reciprocal %153 {approx = true} : vector<8x1xf32> -> vector<8x1xf32>
    %155 = vector.broadcast %154 : vector<8x1xf32> to vector<8x8xf32>
    %156 = arith.mulf %151, %155 : vector<8x8xf32>
    %cst_54 = arith.constant dense<0.000000e+00> : vector<8x8xf32>
    %157 = tpu.matmul %156, %140, %cst_54 {dimension_numbers = #tpu.dot_dimension_numbers<[1], [0], [0], [1], [0, 0, 1, 1], [], []>} : vector<8x8xf32>, vector<8x8xf32>, vector<8x8xf32> -> vector<8x8xf32>
    %c8_55 = arith.constant 8 : index
    %c8_56 = arith.constant 8 : index
    %158 = vector.load %arg21[%c8_55, %c8_56] : memref<16x32xf32, #tpu.memory_space<vmem>>, vector<8x8xf32>
    tpu.vector_store %arg21[%c8_55, %c8_56], %157 {strides = array<i32>} : memref<16x32xf32, #tpu.memory_space<vmem>>, vector<8x8xf32>,
    %159 = vector.extract_strided_slice %30 {offsets = [8, 16], sizes = [8, 8], strides = [1, 1]} : vector<16x96xf32> to vector<8x8xf32>
    %160 = vector.extract_strided_slice %30 {offsets = [8, 48], sizes = [8, 8], strides = [1, 1]} : vector<16x96xf32> to vector<8x8xf32>
    %161 = vector.extract_strided_slice %30 {offsets = [8, 80], sizes = [8, 8], strides = [1, 1]} : vector<16x96xf32> to vector<8x8xf32>
    %162 = tpu.transpose %160, [1, 0] : vector<8x8xf32> -> vector<8x8xf32>
    %cst_57 = arith.constant dense<0.000000e+00> : vector<8x8xf32>
    %163 = tpu.matmul %159, %162, %cst_57 {dimension_numbers = #tpu.dot_dimension_numbers<[1], [0], [0], [1], [0, 0, 1, 1], [], []>} : vector<8x8xf32>, vector<8x8xf32>, vector<8x8xf32> -> vector<8x8xf32>
    %cst_58 = arith.constant 0.353553385 : f32
    %164 = vector.broadcast %cst_58 : f32 to vector<8x8xf32>
    %165 = arith.mulf %163, %164 : vector<8x8xf32>
    %166 = vector.broadcast %116 : vector<1x8xf32> to vector<8x8xf32>
    %167 = arith.addf %165, %166 : vector<8x8xf32>
    %cst_59 = arith.constant dense<0xFF800000> : vector<8xf32>
    %168 = vector.multi_reduction <maximumf>, %167, %cst_59 [1] : vector<8x8xf32> to vector<8xf32>
    %169 = vector.shape_cast %168 : vector<8xf32> to vector<8x1xf32>
    %170 = vector.broadcast %169 : vector<8x1xf32> to vector<8x8xf32>
    %171 = arith.subf %167, %170 : vector<8x8xf32>
    %172 = math.exp %171 : vector<8x8xf32>
    %cst_60 = arith.constant dense<0.000000e+00> : vector<8xf32>
    %173 = vector.multi_reduction <add>, %172, %cst_60 [1] : vector<8x8xf32> to vector<8xf32>
    %174 = vector.shape_cast %173 : vector<8xf32> to vector<8x1xf32>
    %175 = tpu.reciprocal %174 {approx = true} : vector<8x1xf32> -> vector<8x1xf32>
    %176 = vector.broadcast %175 : vector<8x1xf32> to vector<8x8xf32>
    %177 = arith.mulf %172, %176 : vector<8x8xf32>
    %cst_61 = arith.constant dense<0.000000e+00> : vector<8x8xf32>
    %178 = tpu.matmul %177, %161, %cst_61 {dimension_numbers = #tpu.dot_dimension_numbers<[1], [0], [0], [1], [0, 0, 1, 1], [], []>} : vector<8x8xf32>, vector<8x8xf32>, vector<8x8xf32> -> vector<8x8xf32>
    %c8_62 = arith.constant 8 : index
    %c16_63 = arith.constant 16 : index
    %179 = vector.load %arg21[%c8_62, %c16_63] : memref<16x32xf32, #tpu.memory_space<vmem>>, vector<8x8xf32>
    tpu.vector_store %arg21[%c8_62, %c16_63], %178 {strides = array<i32>} : memref<16x32xf32, #tpu.memory_space<vmem>>, vector<8x8xf32>,
    %180 = vector.extract_strided_slice %30 {offsets = [8, 24], sizes = [8, 8], strides = [1, 1]} : vector<16x96xf32> to vector<8x8xf32>
    %181 = vector.extract_strided_slice %30 {offsets = [8, 56], sizes = [8, 8], strides = [1, 1]} : vector<16x96xf32> to vector<8x8xf32>
    %182 = vector.extract_strided_slice %30 {offsets = [8, 88], sizes = [8, 8], strides = [1, 1]} : vector<16x96xf32> to vector<8x8xf32>
    %183 = tpu.transpose %181, [1, 0] : vector<8x8xf32> -> vector<8x8xf32>
    %cst_64 = arith.constant dense<0.000000e+00> : vector<8x8xf32>
    %184 = tpu.matmul %180, %183, %cst_64 {dimension_numbers = #tpu.dot_dimension_numbers<[1], [0], [0], [1], [0, 0, 1, 1], [], []>} : vector<8x8xf32>, vector<8x8xf32>, vector<8x8xf32> -> vector<8x8xf32>
    %cst_65 = arith.constant 0.353553385 : f32
    %185 = vector.broadcast %cst_65 : f32 to vector<8x8xf32>
    %186 = arith.mulf %184, %185 : vector<8x8xf32>
    %187 = vector.broadcast %116 : vector<1x8xf32> to vector<8x8xf32>
    %188 = arith.addf %186, %187 : vector<8x8xf32>
    %cst_66 = arith.constant dense<0xFF800000> : vector<8xf32>
    %189 = vector.multi_reduction <maximumf>, %188, %cst_66 [1] : vector<8x8xf32> to vector<8xf32>
    %190 = vector.shape_cast %189 : vector<8xf32> to vector<8x1xf32>
    %191 = vector.broadcast %190 : vector<8x1xf32> to vector<8x8xf32>
    %192 = arith.subf %188, %191 : vector<8x8xf32>
    %193 = math.exp %192 : vector<8x8xf32>
    %cst_67 = arith.constant dense<0.000000e+00> : vector<8xf32>
    %194 = vector.multi_reduction <add>, %193, %cst_67 [1] : vector<8x8xf32> to vector<8xf32>
    %195 = vector.shape_cast %194 : vector<8xf32> to vector<8x1xf32>
    %196 = tpu.reciprocal %195 {approx = true} : vector<8x1xf32> -> vector<8x1xf32>
    %197 = vector.broadcast %196 : vector<8x1xf32> to vector<8x8xf32>
    %198 = arith.mulf %193, %197 : vector<8x8xf32>
    %cst_68 = arith.constant dense<0.000000e+00> : vector<8x8xf32>
    %199 = tpu.matmul %198, %182, %cst_68 {dimension_numbers = #tpu.dot_dimension_numbers<[1], [0], [0], [1], [0, 0, 1, 1], [], []>} : vector<8x8xf32>, vector<8x8xf32>, vector<8x8xf32> -> vector<8x8xf32>
    %c8_69 = arith.constant 8 : index
    %c24_70 = arith.constant 24 : index
    %200 = vector.load %arg21[%c8_69, %c24_70] : memref<16x32xf32, #tpu.memory_space<vmem>>, vector<8x8xf32>
    tpu.vector_store %arg21[%c8_69, %c24_70], %199 {strides = array<i32>} : memref<16x32xf32, #tpu.memory_space<vmem>>, vector<8x8xf32>,
    %c0_71 = arith.constant 0 : index
    %c0_72 = arith.constant 0 : index
    %201 = vector.load %arg21[%c0_71, %c0_72] : memref<16x32xf32, #tpu.memory_space<vmem>>, vector<16x32xf32>
    %c0_73 = arith.constant 0 : index
    %c0_74 = arith.constant 0 : index
    %c0_75 = arith.constant 0 : index
    %202 = vector.load %arg6[%c0_73, %c0_74, %c0_75] : memref<2x32x32xf32, #tpu.memory_space<vmem>>, vector<1x32x32xf32>
    %203 = vector.shape_cast %202 : vector<1x32x32xf32> to vector<32x32xf32>
    %cst_76 = arith.constant dense<0.000000e+00> : vector<16x32xf32>
    %204 = tpu.matmul %201, %203, %cst_76 {dimension_numbers = #tpu.dot_dimension_numbers<[1], [0], [0], [1], [0, 0, 1, 1], [], []>} : vector<16x32xf32>, vector<32x32xf32>, vector<16x32xf32> -> vector<16x32xf32>
    %c0_77 = arith.constant 0 : index
    %c0_78 = arith.constant 0 : index
    %c0_79 = arith.constant 0 : index
    %205 = vector.load %arg7[%c0_77, %c0_78, %c0_79] : memref<2x1x32xf32, #tpu.memory_space<vmem>>, vector<1x1x32xf32>
    %206 = vector.shape_cast %205 : vector<1x1x32xf32> to vector<1x32xf32>
    %207 = vector.broadcast %206 : vector<1x32xf32> to vector<16x32xf32>
    %208 = arith.addf %204, %207 : vector<16x32xf32>
    %209 = arith.addf %23, %208 : vector<16x32xf32>
    %c0_80 = arith.constant 0 : index
    %c0_81 = arith.constant 0 : index
    %c0_82 = arith.constant 0 : index
    %210 = vector.load %arg8[%c0_80, %c0_81, %c0_82] : memref<2x1x32xf32, #tpu.memory_space<vmem>>, vector<1x1x32xf32>
    %211 = vector.shape_cast %210 : vector<1x1x32xf32> to vector<1x32xf32>
    %c0_83 = arith.constant 0 : index
    %c0_84 = arith.constant 0 : index
    %c0_85 = arith.constant 0 : index
    %212 = vector.load %arg9[%c0_83, %c0_84, %c0_85] : memref<2x1x32xf32, #tpu.memory_space<vmem>>, vector<1x1x32xf32>
    %213 = vector.shape_cast %212 : vector<1x1x32xf32> to vector<1x32xf32>
    %cst_86 = arith.constant dense<0.000000e+00> : vector<16xf32>
    %214 = vector.multi_reduction <add>, %209, %cst_86 [1] : vector<16x32xf32> to vector<16xf32>
    %215 = vector.shape_cast %214 : vector<16xf32> to vector<16x1xf32>
    %cst_87 = arith.constant 3.200000e+01 : f32
    %216 = vector.broadcast %cst_87 : f32 to vector<16x1xf32>
    %217 = arith.divf %215, %216 : vector<16x1xf32>
    %218 = vector.broadcast %217 : vector<16x1xf32> to vector<16x32xf32>
    %219 = arith.subf %209, %218 : vector<16x32xf32>
    %220 = arith.mulf %219, %219 : vector<16x32xf32>
    %cst_88 = arith.constant dense<0.000000e+00> : vector<16xf32>
    %221 = vector.multi_reduction <add>, %220, %cst_88 [1] : vector<16x32xf32> to vector<16xf32>
    %222 = vector.shape_cast %221 : vector<16xf32> to vector<16x1xf32>
    %cst_89 = arith.constant 3.200000e+01 : f32
    %223 = vector.broadcast %cst_89 : f32 to vector<16x1xf32>
    %224 = arith.divf %222, %223 : vector<16x1xf32>
    %cst_90 = arith.constant 9.99999996E-13 : f32
    %225 = vector.broadcast %cst_90 : f32 to vector<16x1xf32>
    %226 = arith.addf %224, %225 : vector<16x1xf32>
    %227 = math.rsqrt %226 : vector<16x1xf32>
    %228 = vector.broadcast %227 : vector<16x1xf32> to vector<16x32xf32>
    %229 = arith.mulf %219, %228 : vector<16x32xf32>
    %230 = vector.broadcast %211 : vector<1x32xf32> to vector<16x32xf32>
    %231 = arith.mulf %229, %230 : vector<16x32xf32>
    %232 = vector.broadcast %213 : vector<1x32xf32> to vector<16x32xf32>
    %233 = arith.addf %231, %232 : vector<16x32xf32>
    %c0_91 = arith.constant 0 : index
    %c0_92 = arith.constant 0 : index
    %c0_93 = arith.constant 0 : index
    %234 = vector.load %arg10[%c0_91, %c0_92, %c0_93] : memref<2x32x64xf32, #tpu.memory_space<vmem>>, vector<1x32x64xf32>
    %235 = vector.shape_cast %234 : vector<1x32x64xf32> to vector<32x64xf32>
    %cst_94 = arith.constant dense<0.000000e+00> : vector<16x64xf32>
    %236 = tpu.matmul %233, %235, %cst_94 {dimension_numbers = #tpu.dot_dimension_numbers<[1], [0], [0], [1], [0, 0, 1, 1], [], []>} : vector<16x32xf32>, vector<32x64xf32>, vector<16x64xf32> -> vector<16x64xf32>
    %c0_95 = arith.constant 0 : index
    %c0_96 = arith.constant 0 : index
    %c0_97 = arith.constant 0 : index
    %237 = vector.load %arg11[%c0_95, %c0_96, %c0_97] : memref<2x1x64xf32, #tpu.memory_space<vmem>>, vector<1x1x64xf32>
    %238 = vector.shape_cast %237 : vector<1x1x64xf32> to vector<1x64xf32>
    %239 = vector.broadcast %238 : vector<1x64xf32> to vector<16x64xf32>
    %240 = arith.addf %236, %239 : vector<16x64xf32>
    %cst_98 = arith.constant 5.000000e-01 : f32
    %241 = vector.broadcast %cst_98 : f32 to vector<16x64xf32>
    %242 = arith.mulf %241, %240 : vector<16x64xf32>
    %cst_99 = arith.constant 1.41421354 : f32
    %243 = vector.broadcast %cst_99 : f32 to vector<16x64xf32>
    %244 = arith.divf %240, %243 : vector<16x64xf32>
    %245 = math.erf %244 : vector<16x64xf32>
    %cst_100 = arith.constant 1.000000e+00 : f32
    %246 = vector.broadcast %cst_100 : f32 to vector<16x64xf32>
    %247 = arith.addf %246, %245 : vector<16x64xf32>
    %248 = arith.mulf %242, %247 : vector<16x64xf32>
    %c0_101 = arith.constant 0 : index
    %c0_102 = arith.constant 0 : index
    %c0_103 = arith.constant 0 : index
    %249 = vector.load %arg12[%c0_101, %c0_102, %c0_103] : memref<2x64x32xf32, #tpu.memory_space<vmem>>, vector<1x64x32xf32>
    %250 = vector.shape_cast %249 : vector<1x64x32xf32> to vector<64x32xf32>
    %cst_104 = arith.constant dense<0.000000e+00> : vector<16x32xf32>
    %251 = tpu.matmul %248, %250, %cst_104 {dimension_numbers = #tpu.dot_dimension_numbers<[1], [0], [0], [1], [0, 0, 1, 1], [], []>} : vector<16x64xf32>, vector<64x32xf32>, vector<16x32xf32> -> vector<16x32xf32>
    %c0_105 = arith.constant 0 : index
    %c0_106 = arith.constant 0 : index
    %c0_107 = arith.constant 0 : index
    %252 = vector.load %arg13[%c0_105, %c0_106, %c0_107] : memref<2x1x32xf32, #tpu.memory_space<vmem>>, vector<1x1x32xf32>
    %253 = vector.shape_cast %252 : vector<1x1x32xf32> to vector<1x32xf32>
    %254 = vector.broadcast %253 : vector<1x32xf32> to vector<16x32xf32>
    %255 = arith.addf %251, %254 : vector<16x32xf32>
    %256 = arith.addf %233, %255 : vector<16x32xf32>
    %c0_108 = arith.constant 0 : index
    %c0_109 = arith.constant 0 : index
    %c0_110 = arith.constant 0 : index
    %257 = vector.load %arg14[%c0_108, %c0_109, %c0_110] : memref<2x1x32xf32, #tpu.memory_space<vmem>>, vector<1x1x32xf32>
    %258 = vector.shape_cast %257 : vector<1x1x32xf32> to vector<1x32xf32>
    %c0_111 = arith.constant 0 : index
    %c0_112 = arith.constant 0 : index
    %c0_113 = arith.constant 0 : index
    %259 = vector.load %arg15[%c0_111, %c0_112, %c0_113] : memref<2x1x32xf32, #tpu.memory_space<vmem>>, vector<1x1x32xf32>
    %260 = vector.shape_cast %259 : vector<1x1x32xf32> to vector<1x32xf32>
    %cst_114 = arith.constant dense<0.000000e+00> : vector<16xf32>
    %261 = vector.multi_reduction <add>, %256, %cst_114 [1] : vector<16x32xf32> to vector<16xf32>
    %262 = vector.shape_cast %261 : vector<16xf32> to vector<16x1xf32>
    %cst_115 = arith.constant 3.200000e+01 : f32
    %263 = vector.broadcast %cst_115 : f32 to vector<16x1xf32>
    %264 = arith.divf %262, %263 : vector<16x1xf32>
    %265 = vector.broadcast %264 : vector<16x1xf32> to vector<16x32xf32>
    %266 = arith.subf %256, %265 : vector<16x32xf32>
    %267 = arith.mulf %266, %266 : vector<16x32xf32>
    %cst_116 = arith.constant dense<0.000000e+00> : vector<16xf32>
    %268 = vector.multi_reduction <add>, %267, %cst_116 [1] : vector<16x32xf32> to vector<16xf32>
    %269 = vector.shape_cast %268 : vector<16xf32> to vector<16x1xf32>
    %cst_117 = arith.constant 3.200000e+01 : f32
    %270 = vector.broadcast %cst_117 : f32 to vector<16x1xf32>
    %271 = arith.divf %269, %270 : vector<16x1xf32>
    %cst_118 = arith.constant 9.99999996E-13 : f32
    %272 = vector.broadcast %cst_118 : f32 to vector<16x1xf32>
    %273 = arith.addf %271, %272 : vector<16x1xf32>
    %274 = math.rsqrt %273 : vector<16x1xf32>
    %275 = vector.broadcast %274 : vector<16x1xf32> to vector<16x32xf32>
    %276 = arith.mulf %266, %275 : vector<16x32xf32>
    %277 = vector.broadcast %258 : vector<1x32xf32> to vector<16x32xf32>
    %278 = arith.mulf %276, %277 : vector<16x32xf32>
    %279 = vector.broadcast %260 : vector<1x32xf32> to vector<16x32xf32>
    %280 = arith.addf %278, %279 : vector<16x32xf32>
    %c1 = arith.constant 1 : index
    %c0_119 = arith.constant 0 : index
    %c0_120 = arith.constant 0 : index
    %281 = vector.load %arg4[%c1, %c0_119, %c0_120] : memref<2x32x96xf32, #tpu.memory_space<vmem>>, vector<1x32x96xf32>
    %282 = vector.shape_cast %281 : vector<1x32x96xf32> to vector<32x96xf32>
    %cst_121 = arith.constant dense<0.000000e+00> : vector<16x96xf32>
    %283 = tpu.matmul %280, %282, %cst_121 {dimension_numbers = #tpu.dot_dimension_numbers<[1], [0], [0], [1], [0, 0, 1, 1], [], []>} : vector<16x32xf32>, vector<32x96xf32>, vector<16x96xf32> -> vector<16x96xf32>
    %c1_122 = arith.constant 1 : index
    %c0_123 = arith.constant 0 : index
    %c0_124 = arith.constant 0 : index
    %284 = vector.load %arg5[%c1_122, %c0_123, %c0_124] : memref<2x1x96xf32, #tpu.memory_space<vmem>>, vector<1x1x96xf32>
    %285 = vector.shape_cast %284 : vector<1x1x96xf32> to vector<1x96xf32>
    %286 = vector.broadcast %285 : vector<1x96xf32> to vector<16x96xf32>
    %287 = arith.addf %283, %286 : vector<16x96xf32>
    %288 = vector.extract_strided_slice %0 {offsets = [0, 0], sizes = [1, 8], strides = [1, 1]} : vector<2x8xf32> to vector<1x8xf32>
    %289 = vector.extract_strided_slice %287 {offsets = [0, 0], sizes = [8, 8], strides = [1, 1]} : vector<16x96xf32> to vector<8x8xf32>
    %290 = vector.extract_strided_slice %287 {offsets = [0, 32], sizes = [8, 8], strides = [1, 1]} : vector<16x96xf32> to vector<8x8xf32>
    %291 = vector.extract_strided_slice %287 {offsets = [0, 64], sizes = [8, 8], strides = [1, 1]} : vector<16x96xf32> to vector<8x8xf32>
    %292 = tpu.transpose %290, [1, 0] : vector<8x8xf32> -> vector<8x8xf32>
    %cst_125 = arith.constant dense<0.000000e+00> : vector<8x8xf32>
    %293 = tpu.matmul %289, %292, %cst_125 {dimension_numbers = #tpu.dot_dimension_numbers<[1], [0], [0], [1], [0, 0, 1, 1], [], []>} : vector<8x8xf32>, vector<8x8xf32>, vector<8x8xf32> -> vector<8x8xf32>
    %cst_126 = arith.constant 0.353553385 : f32
    %294 = vector.broadcast %cst_126 : f32 to vector<8x8xf32>
    %295 = arith.mulf %293, %294 : vector<8x8xf32>
    %296 = vector.broadcast %288 : vector<1x8xf32> to vector<8x8xf32>
    %297 = arith.addf %295, %296 : vector<8x8xf32>
    %cst_127 = arith.constant dense<0xFF800000> : vector<8xf32>
    %298 = vector.multi_reduction <maximumf>, %297, %cst_127 [1] : vector<8x8xf32> to vector<8xf32>
    %299 = vector.shape_cast %298 : vector<8xf32> to vector<8x1xf32>
    %300 = vector.broadcast %299 : vector<8x1xf32> to vector<8x8xf32>
    %301 = arith.subf %297, %300 : vector<8x8xf32>
    %302 = math.exp %301 : vector<8x8xf32>
    %cst_128 = arith.constant dense<0.000000e+00> : vector<8xf32>
    %303 = vector.multi_reduction <add>, %302, %cst_128 [1] : vector<8x8xf32> to vector<8xf32>
    %304 = vector.shape_cast %303 : vector<8xf32> to vector<8x1xf32>
    %305 = tpu.reciprocal %304 {approx = true} : vector<8x1xf32> -> vector<8x1xf32>
    %306 = vector.broadcast %305 : vector<8x1xf32> to vector<8x8xf32>
    %307 = arith.mulf %302, %306 : vector<8x8xf32>
    %cst_129 = arith.constant dense<0.000000e+00> : vector<8x8xf32>
    %308 = tpu.matmul %307, %291, %cst_129 {dimension_numbers = #tpu.dot_dimension_numbers<[1], [0], [0], [1], [0, 0, 1, 1], [], []>} : vector<8x8xf32>, vector<8x8xf32>, vector<8x8xf32> -> vector<8x8xf32>
    %c0_130 = arith.constant 0 : index
    %c0_131 = arith.constant 0 : index
    %309 = vector.load %arg21[%c0_130, %c0_131] : memref<16x32xf32, #tpu.memory_space<vmem>>, vector<8x8xf32>
    tpu.vector_store %arg21[%c0_130, %c0_131], %308 {strides = array<i32>} : memref<16x32xf32, #tpu.memory_space<vmem>>, vector<8x8xf32>,
    %310 = vector.extract_strided_slice %287 {offsets = [0, 8], sizes = [8, 8], strides = [1, 1]} : vector<16x96xf32> to vector<8x8xf32>
    %311 = vector.extract_strided_slice %287 {offsets = [0, 40], sizes = [8, 8], strides = [1, 1]} : vector<16x96xf32> to vector<8x8xf32>
    %312 = vector.extract_strided_slice %287 {offsets = [0, 72], sizes = [8, 8], strides = [1, 1]} : vector<16x96xf32> to vector<8x8xf32>
    %313 = tpu.transpose %311, [1, 0] : vector<8x8xf32> -> vector<8x8xf32>
    %cst_132 = arith.constant dense<0.000000e+00> : vector<8x8xf32>
    %314 = tpu.matmul %310, %313, %cst_132 {dimension_numbers = #tpu.dot_dimension_numbers<[1], [0], [0], [1], [0, 0, 1, 1], [], []>} : vector<8x8xf32>, vector<8x8xf32>, vector<8x8xf32> -> vector<8x8xf32>
    %cst_133 = arith.constant 0.353553385 : f32
    %315 = vector.broadcast %cst_133 : f32 to vector<8x8xf32>
    %316 = arith.mulf %314, %315 : vector<8x8xf32>
    %317 = vector.broadcast %288 : vector<1x8xf32> to vector<8x8xf32>
    %318 = arith.addf %316, %317 : vector<8x8xf32>
    %cst_134 = arith.constant dense<0xFF800000> : vector<8xf32>
    %319 = vector.multi_reduction <maximumf>, %318, %cst_134 [1] : vector<8x8xf32> to vector<8xf32>
    %320 = vector.shape_cast %319 : vector<8xf32> to vector<8x1xf32>
    %321 = vector.broadcast %320 : vector<8x1xf32> to vector<8x8xf32>
    %322 = arith.subf %318, %321 : vector<8x8xf32>
    %323 = math.exp %322 : vector<8x8xf32>
    %cst_135 = arith.constant dense<0.000000e+00> : vector<8xf32>
    %324 = vector.multi_reduction <add>, %323, %cst_135 [1] : vector<8x8xf32> to vector<8xf32>
    %325 = vector.shape_cast %324 : vector<8xf32> to vector<8x1xf32>
    %326 = tpu.reciprocal %325 {approx = true} : vector<8x1xf32> -> vector<8x1xf32>
    %327 = vector.broadcast %326 : vector<8x1xf32> to vector<8x8xf32>
    %328 = arith.mulf %323, %327 : vector<8x8xf32>
    %cst_136 = arith.constant dense<0.000000e+00> : vector<8x8xf32>
    %329 = tpu.matmul %328, %312, %cst_136 {dimension_numbers = #tpu.dot_dimension_numbers<[1], [0], [0], [1], [0, 0, 1, 1], [], []>} : vector<8x8xf32>, vector<8x8xf32>, vector<8x8xf32> -> vector<8x8xf32>
    %c0_137 = arith.constant 0 : index
    %c8_138 = arith.constant 8 : index
    %330 = vector.load %arg21[%c0_137, %c8_138] : memref<16x32xf32, #tpu.memory_space<vmem>>, vector<8x8xf32>
    tpu.vector_store %arg21[%c0_137, %c8_138], %329 {strides = array<i32>} : memref<16x32xf32, #tpu.memory_space<vmem>>, vector<8x8xf32>,
    %331 = vector.extract_strided_slice %287 {offsets = [0, 16], sizes = [8, 8], strides = [1, 1]} : vector<16x96xf32> to vector<8x8xf32>
    %332 = vector.extract_strided_slice %287 {offsets = [0, 48], sizes = [8, 8], strides = [1, 1]} : vector<16x96xf32> to vector<8x8xf32>
    %333 = vector.extract_strided_slice %287 {offsets = [0, 80], sizes = [8, 8], strides = [1, 1]} : vector<16x96xf32> to vector<8x8xf32>
    %334 = tpu.transpose %332, [1, 0] : vector<8x8xf32> -> vector<8x8xf32>
    %cst_139 = arith.constant dense<0.000000e+00> : vector<8x8xf32>
    %335 = tpu.matmul %331, %334, %cst_139 {dimension_numbers = #tpu.dot_dimension_numbers<[1], [0], [0], [1], [0, 0, 1, 1], [], []>} : vector<8x8xf32>, vector<8x8xf32>, vector<8x8xf32> -> vector<8x8xf32>
    %cst_140 = arith.constant 0.353553385 : f32
    %336 = vector.broadcast %cst_140 : f32 to vector<8x8xf32>
    %337 = arith.mulf %335, %336 : vector<8x8xf32>
    %338 = vector.broadcast %288 : vector<1x8xf32> to vector<8x8xf32>
    %339 = arith.addf %337, %338 : vector<8x8xf32>
    %cst_141 = arith.constant dense<0xFF800000> : vector<8xf32>
    %340 = vector.multi_reduction <maximumf>, %339, %cst_141 [1] : vector<8x8xf32> to vector<8xf32>
    %341 = vector.shape_cast %340 : vector<8xf32> to vector<8x1xf32>
    %342 = vector.broadcast %341 : vector<8x1xf32> to vector<8x8xf32>
    %343 = arith.subf %339, %342 : vector<8x8xf32>
    %344 = math.exp %343 : vector<8x8xf32>
    %cst_142 = arith.constant dense<0.000000e+00> : vector<8xf32>
    %345 = vector.multi_reduction <add>, %344, %cst_142 [1] : vector<8x8xf32> to vector<8xf32>
    %346 = vector.shape_cast %345 : vector<8xf32> to vector<8x1xf32>
    %347 = tpu.reciprocal %346 {approx = true} : vector<8x1xf32> -> vector<8x1xf32>
    %348 = vector.broadcast %347 : vector<8x1xf32> to vector<8x8xf32>
    %349 = arith.mulf %344, %348 : vector<8x8xf32>
    %cst_143 = arith.constant dense<0.000000e+00> : vector<8x8xf32>
    %350 = tpu.matmul %349, %333, %cst_143 {dimension_numbers = #tpu.dot_dimension_numbers<[1], [0], [0], [1], [0, 0, 1, 1], [], []>} : vector<8x8xf32>, vector<8x8xf32>, vector<8x8xf32> -> vector<8x8xf32>
    %c0_144 = arith.constant 0 : index
    %c16_145 = arith.constant 16 : index
    %351 = vector.load %arg21[%c0_144, %c16_145] : memref<16x32xf32, #tpu.memory_space<vmem>>, vector<8x8xf32>
    tpu.vector_store %arg21[%c0_144, %c16_145], %350 {strides = array<i32>} : memref<16x32xf32, #tpu.memory_space<vmem>>, vector<8x8xf32>,
    %352 = vector.extract_strided_slice %287 {offsets = [0, 24], sizes = [8, 8], strides = [1, 1]} : vector<16x96xf32> to vector<8x8xf32>
    %353 = vector.extract_strided_slice %287 {offsets = [0, 56], sizes = [8, 8], strides = [1, 1]} : vector<16x96xf32> to vector<8x8xf32>
    %354 = vector.extract_strided_slice %287 {offsets = [0, 88], sizes = [8, 8], strides = [1, 1]} : vector<16x96xf32> to vector<8x8xf32>
    %355 = tpu.transpose %353, [1, 0] : vector<8x8xf32> -> vector<8x8xf32>
    %cst_146 = arith.constant dense<0.000000e+00> : vector<8x8xf32>
    %356 = tpu.matmul %352, %355, %cst_146 {dimension_numbers = #tpu.dot_dimension_numbers<[1], [0], [0], [1], [0, 0, 1, 1], [], []>} : vector<8x8xf32>, vector<8x8xf32>, vector<8x8xf32> -> vector<8x8xf32>
    %cst_147 = arith.constant 0.353553385 : f32
    %357 = vector.broadcast %cst_147 : f32 to vector<8x8xf32>
    %358 = arith.mulf %356, %357 : vector<8x8xf32>
    %359 = vector.broadcast %288 : vector<1x8xf32> to vector<8x8xf32>
    %360 = arith.addf %358, %359 : vector<8x8xf32>
    %cst_148 = arith.constant dense<0xFF800000> : vector<8xf32>
    %361 = vector.multi_reduction <maximumf>, %360, %cst_148 [1] : vector<8x8xf32> to vector<8xf32>
    %362 = vector.shape_cast %361 : vector<8xf32> to vector<8x1xf32>
    %363 = vector.broadcast %362 : vector<8x1xf32> to vector<8x8xf32>
    %364 = arith.subf %360, %363 : vector<8x8xf32>
    %365 = math.exp %364 : vector<8x8xf32>
    %cst_149 = arith.constant dense<0.000000e+00> : vector<8xf32>
    %366 = vector.multi_reduction <add>, %365, %cst_149 [1] : vector<8x8xf32> to vector<8xf32>
    %367 = vector.shape_cast %366 : vector<8xf32> to vector<8x1xf32>
    %368 = tpu.reciprocal %367 {approx = true} : vector<8x1xf32> -> vector<8x1xf32>
    %369 = vector.broadcast %368 : vector<8x1xf32> to vector<8x8xf32>
    %370 = arith.mulf %365, %369 : vector<8x8xf32>
    %cst_150 = arith.constant dense<0.000000e+00> : vector<8x8xf32>
    %371 = tpu.matmul %370, %354, %cst_150 {dimension_numbers = #tpu.dot_dimension_numbers<[1], [0], [0], [1], [0, 0, 1, 1], [], []>} : vector<8x8xf32>, vector<8x8xf32>, vector<8x8xf32> -> vector<8x8xf32>
    %c0_151 = arith.constant 0 : index
    %c24_152 = arith.constant 24 : index
    %372 = vector.load %arg21[%c0_151, %c24_152] : memref<16x32xf32, #tpu.memory_space<vmem>>, vector<8x8xf32>
    tpu.vector_store %arg21[%c0_151, %c24_152], %371 {strides = array<i32>} : memref<16x32xf32, #tpu.memory_space<vmem>>, vector<8x8xf32>,
    %373 = vector.extract_strided_slice %0 {offsets = [1, 0], sizes = [1, 8], strides = [1, 1]} : vector<2x8xf32> to vector<1x8xf32>
    %374 = vector.extract_strided_slice %287 {offsets = [8, 0], sizes = [8, 8], strides = [1, 1]} : vector<16x96xf32> to vector<8x8xf32>
    %375 = vector.extract_strided_slice %287 {offsets = [8, 32], sizes = [8, 8], strides = [1, 1]} : vector<16x96xf32> to vector<8x8xf32>
    %376 = vector.extract_strided_slice %287 {offsets = [8, 64], sizes = [8, 8], strides = [1, 1]} : vector<16x96xf32> to vector<8x8xf32>
    %377 = tpu.transpose %375, [1, 0] : vector<8x8xf32> -> vector<8x8xf32>
    %cst_153 = arith.constant dense<0.000000e+00> : vector<8x8xf32>
    %378 = tpu.matmul %374, %377, %cst_153 {dimension_numbers = #tpu.dot_dimension_numbers<[1], [0], [0], [1], [0, 0, 1, 1], [], []>} : vector<8x8xf32>, vector<8x8xf32>, vector<8x8xf32> -> vector<8x8xf32>
    %cst_154 = arith.constant 0.353553385 : f32
    %379 = vector.broadcast %cst_154 : f32 to vector<8x8xf32>
    %380 = arith.mulf %378, %379 : vector<8x8xf32>
    %381 = vector.broadcast %373 : vector<1x8xf32> to vector<8x8xf32>
    %382 = arith.addf %380, %381 : vector<8x8xf32>
    %cst_155 = arith.constant dense<0xFF800000> : vector<8xf32>
    %383 = vector.multi_reduction <maximumf>, %382, %cst_155 [1] : vector<8x8xf32> to vector<8xf32>
    %384 = vector.shape_cast %383 : vector<8xf32> to vector<8x1xf32>
    %385 = vector.broadcast %384 : vector<8x1xf32> to vector<8x8xf32>
    %386 = arith.subf %382, %385 : vector<8x8xf32>
    %387 = math.exp %386 : vector<8x8xf32>
    %cst_156 = arith.constant dense<0.000000e+00> : vector<8xf32>
    %388 = vector.multi_reduction <add>, %387, %cst_156 [1] : vector<8x8xf32> to vector<8xf32>
    %389 = vector.shape_cast %388 : vector<8xf32> to vector<8x1xf32>
    %390 = tpu.reciprocal %389 {approx = true} : vector<8x1xf32> -> vector<8x1xf32>
    %391 = vector.broadcast %390 : vector<8x1xf32> to vector<8x8xf32>
    %392 = arith.mulf %387, %391 : vector<8x8xf32>
    %cst_157 = arith.constant dense<0.000000e+00> : vector<8x8xf32>
    %393 = tpu.matmul %392, %376, %cst_157 {dimension_numbers = #tpu.dot_dimension_numbers<[1], [0], [0], [1], [0, 0, 1, 1], [], []>} : vector<8x8xf32>, vector<8x8xf32>, vector<8x8xf32> -> vector<8x8xf32>
    %c8_158 = arith.constant 8 : index
    %c0_159 = arith.constant 0 : index
    %394 = vector.load %arg21[%c8_158, %c0_159] : memref<16x32xf32, #tpu.memory_space<vmem>>, vector<8x8xf32>
    tpu.vector_store %arg21[%c8_158, %c0_159], %393 {strides = array<i32>} : memref<16x32xf32, #tpu.memory_space<vmem>>, vector<8x8xf32>,
    %395 = vector.extract_strided_slice %287 {offsets = [8, 8], sizes = [8, 8], strides = [1, 1]} : vector<16x96xf32> to vector<8x8xf32>
    %396 = vector.extract_strided_slice %287 {offsets = [8, 40], sizes = [8, 8], strides = [1, 1]} : vector<16x96xf32> to vector<8x8xf32>
    %397 = vector.extract_strided_slice %287 {offsets = [8, 72], sizes = [8, 8], strides = [1, 1]} : vector<16x96xf32> to vector<8x8xf32>
    %398 = tpu.transpose %396, [1, 0] : vector<8x8xf32> -> vector<8x8xf32>
    %cst_160 = arith.constant dense<0.000000e+00> : vector<8x8xf32>
    %399 = tpu.matmul %395, %398, %cst_160 {dimension_numbers = #tpu.dot_dimension_numbers<[1], [0], [0], [1], [0, 0, 1, 1], [], []>} : vector<8x8xf32>, vector<8x8xf32>, vector<8x8xf32> -> vector<8x8xf32>
    %cst_161 = arith.constant 0.353553385 : f32
    %400 = vector.broadcast %cst_161 : f32 to vector<8x8xf32>
    %401 = arith.mulf %399, %400 : vector<8x8xf32>
    %402 = vector.broadcast %373 : vector<1x8xf32> to vector<8x8xf32>
    %403 = arith.addf %401, %402 : vector<8x8xf32>
    %cst_162 = arith.constant dense<0xFF800000> : vector<8xf32>
    %404 = vector.multi_reduction <maximumf>, %403, %cst_162 [1] : vector<8x8xf32> to vector<8xf32>
    %405 = vector.shape_cast %404 : vector<8xf32> to vector<8x1xf32>
    %406 = vector.broadcast %405 : vector<8x1xf32> to vector<8x8xf32>
    %407 = arith.subf %403, %406 : vector<8x8xf32>
    %408 = math.exp %407 : vector<8x8xf32>
    %cst_163 = arith.constant dense<0.000000e+00> : vector<8xf32>
    %409 = vector.multi_reduction <add>, %408, %cst_163 [1] : vector<8x8xf32> to vector<8xf32>
    %410 = vector.shape_cast %409 : vector<8xf32> to vector<8x1xf32>
    %411 = tpu.reciprocal %410 {approx = true} : vector<8x1xf32> -> vector<8x1xf32>
    %412 = vector.broadcast %411 : vector<8x1xf32> to vector<8x8xf32>
    %413 = arith.mulf %408, %412 : vector<8x8xf32>
    %cst_164 = arith.constant dense<0.000000e+00> : vector<8x8xf32>
    %414 = tpu.matmul %413, %397, %cst_164 {dimension_numbers = #tpu.dot_dimension_numbers<[1], [0], [0], [1], [0, 0, 1, 1], [], []>} : vector<8x8xf32>, vector<8x8xf32>, vector<8x8xf32> -> vector<8x8xf32>
    %c8_165 = arith.constant 8 : index
    %c8_166 = arith.constant 8 : index
    %415 = vector.load %arg21[%c8_165, %c8_166] : memref<16x32xf32, #tpu.memory_space<vmem>>, vector<8x8xf32>
    tpu.vector_store %arg21[%c8_165, %c8_166], %414 {strides = array<i32>} : memref<16x32xf32, #tpu.memory_space<vmem>>, vector<8x8xf32>,
    %416 = vector.extract_strided_slice %287 {offsets = [8, 16], sizes = [8, 8], strides = [1, 1]} : vector<16x96xf32> to vector<8x8xf32>
    %417 = vector.extract_strided_slice %287 {offsets = [8, 48], sizes = [8, 8], strides = [1, 1]} : vector<16x96xf32> to vector<8x8xf32>
    %418 = vector.extract_strided_slice %287 {offsets = [8, 80], sizes = [8, 8], strides = [1, 1]} : vector<16x96xf32> to vector<8x8xf32>
    %419 = tpu.transpose %417, [1, 0] : vector<8x8xf32> -> vector<8x8xf32>
    %cst_167 = arith.constant dense<0.000000e+00> : vector<8x8xf32>
    %420 = tpu.matmul %416, %419, %cst_167 {dimension_numbers = #tpu.dot_dimension_numbers<[1], [0], [0], [1], [0, 0, 1, 1], [], []>} : vector<8x8xf32>, vector<8x8xf32>, vector<8x8xf32> -> vector<8x8xf32>
    %cst_168 = arith.constant 0.353553385 : f32
    %421 = vector.broadcast %cst_168 : f32 to vector<8x8xf32>
    %422 = arith.mulf %420, %421 : vector<8x8xf32>
    %423 = vector.broadcast %373 : vector<1x8xf32> to vector<8x8xf32>
    %424 = arith.addf %422, %423 : vector<8x8xf32>
    %cst_169 = arith.constant dense<0xFF800000> : vector<8xf32>
    %425 = vector.multi_reduction <maximumf>, %424, %cst_169 [1] : vector<8x8xf32> to vector<8xf32>
    %426 = vector.shape_cast %425 : vector<8xf32> to vector<8x1xf32>
    %427 = vector.broadcast %426 : vector<8x1xf32> to vector<8x8xf32>
    %428 = arith.subf %424, %427 : vector<8x8xf32>
    %429 = math.exp %428 : vector<8x8xf32>
    %cst_170 = arith.constant dense<0.000000e+00> : vector<8xf32>
    %430 = vector.multi_reduction <add>, %429, %cst_170 [1] : vector<8x8xf32> to vector<8xf32>
    %431 = vector.shape_cast %430 : vector<8xf32> to vector<8x1xf32>
    %432 = tpu.reciprocal %431 {approx = true} : vector<8x1xf32> -> vector<8x1xf32>
    %433 = vector.broadcast %432 : vector<8x1xf32> to vector<8x8xf32>
    %434 = arith.mulf %429, %433 : vector<8x8xf32>
    %cst_171 = arith.constant dense<0.000000e+00> : vector<8x8xf32>
    %435 = tpu.matmul %434, %418, %cst_171 {dimension_numbers = #tpu.dot_dimension_numbers<[1], [0], [0], [1], [0, 0, 1, 1], [], []>} : vector<8x8xf32>, vector<8x8xf32>, vector<8x8xf32> -> vector<8x8xf32>
    %c8_172 = arith.constant 8 : index
    %c16_173 = arith.constant 16 : index
    %436 = vector.load %arg21[%c8_172, %c16_173] : memref<16x32xf32, #tpu.memory_space<vmem>>, vector<8x8xf32>
    tpu.vector_store %arg21[%c8_172, %c16_173], %435 {strides = array<i32>} : memref<16x32xf32, #tpu.memory_space<vmem>>, vector<8x8xf32>,
    %437 = vector.extract_strided_slice %287 {offsets = [8, 24], sizes = [8, 8], strides = [1, 1]} : vector<16x96xf32> to vector<8x8xf32>
    %438 = vector.extract_strided_slice %287 {offsets = [8, 56], sizes = [8, 8], strides = [1, 1]} : vector<16x96xf32> to vector<8x8xf32>
    %439 = vector.extract_strided_slice %287 {offsets = [8, 88], sizes = [8, 8], strides = [1, 1]} : vector<16x96xf32> to vector<8x8xf32>
    %440 = tpu.transpose %438, [1, 0] : vector<8x8xf32> -> vector<8x8xf32>
    %cst_174 = arith.constant dense<0.000000e+00> : vector<8x8xf32>
    %441 = tpu.matmul %437, %440, %cst_174 {dimension_numbers = #tpu.dot_dimension_numbers<[1], [0], [0], [1], [0, 0, 1, 1], [], []>} : vector<8x8xf32>, vector<8x8xf32>, vector<8x8xf32> -> vector<8x8xf32>
    %cst_175 = arith.constant 0.353553385 : f32
    %442 = vector.broadcast %cst_175 : f32 to vector<8x8xf32>
    %443 = arith.mulf %441, %442 : vector<8x8xf32>
    %444 = vector.broadcast %373 : vector<1x8xf32> to vector<8x8xf32>
    %445 = arith.addf %443, %444 : vector<8x8xf32>
    %cst_176 = arith.constant dense<0xFF800000> : vector<8xf32>
    %446 = vector.multi_reduction <maximumf>, %445, %cst_176 [1] : vector<8x8xf32> to vector<8xf32>
    %447 = vector.shape_cast %446 : vector<8xf32> to vector<8x1xf32>
    %448 = vector.broadcast %447 : vector<8x1xf32> to vector<8x8xf32>
    %449 = arith.subf %445, %448 : vector<8x8xf32>
    %450 = math.exp %449 : vector<8x8xf32>
    %cst_177 = arith.constant dense<0.000000e+00> : vector<8xf32>
    %451 = vector.multi_reduction <add>, %450, %cst_177 [1] : vector<8x8xf32> to vector<8xf32>
    %452 = vector.shape_cast %451 : vector<8xf32> to vector<8x1xf32>
    %453 = tpu.reciprocal %452 {approx = true} : vector<8x1xf32> -> vector<8x1xf32>
    %454 = vector.broadcast %453 : vector<8x1xf32> to vector<8x8xf32>
    %455 = arith.mulf %450, %454 : vector<8x8xf32>
    %cst_178 = arith.constant dense<0.000000e+00> : vector<8x8xf32>
    %456 = tpu.matmul %455, %439, %cst_178 {dimension_numbers = #tpu.dot_dimension_numbers<[1], [0], [0], [1], [0, 0, 1, 1], [], []>} : vector<8x8xf32>, vector<8x8xf32>, vector<8x8xf32> -> vector<8x8xf32>
    %c8_179 = arith.constant 8 : index
    %c24_180 = arith.constant 24 : index
    %457 = vector.load %arg21[%c8_179, %c24_180] : memref<16x32xf32, #tpu.memory_space<vmem>>, vector<8x8xf32>
    tpu.vector_store %arg21[%c8_179, %c24_180], %456 {strides = array<i32>} : memref<16x32xf32, #tpu.memory_space<vmem>>, vector<8x8xf32>,
    %c0_181 = arith.constant 0 : index
    %c0_182 = arith.constant 0 : index
    %458 = vector.load %arg21[%c0_181, %c0_182] : memref<16x32xf32, #tpu.memory_space<vmem>>, vector<16x32xf32>
    %c1_183 = arith.constant 1 : index
    %c0_184 = arith.constant 0 : index
    %c0_185 = arith.constant 0 : index
    %459 = vector.load %arg6[%c1_183, %c0_184, %c0_185] : memref<2x32x32xf32, #tpu.memory_space<vmem>>, vector<1x32x32xf32>
    %460 = vector.shape_cast %459 : vector<1x32x32xf32> to vector<32x32xf32>
    %cst_186 = arith.constant dense<0.000000e+00> : vector<16x32xf32>
    %461 = tpu.matmul %458, %460, %cst_186 {dimension_numbers = #tpu.dot_dimension_numbers<[1], [0], [0], [1], [0, 0, 1, 1], [], []>} : vector<16x32xf32>, vector<32x32xf32>, vector<16x32xf32> -> vector<16x32xf32>
    %c1_187 = arith.constant 1 : index
    %c0_188 = arith.constant 0 : index
    %c0_189 = arith.constant 0 : index
    %462 = vector.load %arg7[%c1_187, %c0_188, %c0_189] : memref<2x1x32xf32, #tpu.memory_space<vmem>>, vector<1x1x32xf32>
    %463 = vector.shape_cast %462 : vector<1x1x32xf32> to vector<1x32xf32>
    %464 = vector.broadcast %463 : vector<1x32xf32> to vector<16x32xf32>
    %465 = arith.addf %461, %464 : vector<16x32xf32>
    %466 = arith.addf %280, %465 : vector<16x32xf32>
    %c1_190 = arith.constant 1 : index
    %c0_191 = arith.constant 0 : index
    %c0_192 = arith.constant 0 : index
    %467 = vector.load %arg8[%c1_190, %c0_191, %c0_192] : memref<2x1x32xf32, #tpu.memory_space<vmem>>, vector<1x1x32xf32>
    %468 = vector.shape_cast %467 : vector<1x1x32xf32> to vector<1x32xf32>
    %c1_193 = arith.constant 1 : index
    %c0_194 = arith.constant 0 : index
    %c0_195 = arith.constant 0 : index
    %469 = vector.load %arg9[%c1_193, %c0_194, %c0_195] : memref<2x1x32xf32, #tpu.memory_space<vmem>>, vector<1x1x32xf32>
    %470 = vector.shape_cast %469 : vector<1x1x32xf32> to vector<1x32xf32>
    %cst_196 = arith.constant dense<0.000000e+00> : vector<16xf32>
    %471 = vector.multi_reduction <add>, %466, %cst_196 [1] : vector<16x32xf32> to vector<16xf32>
    %472 = vector.shape_cast %471 : vector<16xf32> to vector<16x1xf32>
    %cst_197 = arith.constant 3.200000e+01 : f32
    %473 = vector.broadcast %cst_197 : f32 to vector<16x1xf32>
    %474 = arith.divf %472, %473 : vector<16x1xf32>
    %475 = vector.broadcast %474 : vector<16x1xf32> to vector<16x32xf32>
    %476 = arith.subf %466, %475 : vector<16x32xf32>
    %477 = arith.mulf %476, %476 : vector<16x32xf32>
    %cst_198 = arith.constant dense<0.000000e+00> : vector<16xf32>
    %478 = vector.multi_reduction <add>, %477, %cst_198 [1] : vector<16x32xf32> to vector<16xf32>
    %479 = vector.shape_cast %478 : vector<16xf32> to vector<16x1xf32>
    %cst_199 = arith.constant 3.200000e+01 : f32
    %480 = vector.broadcast %cst_199 : f32 to vector<16x1xf32>
    %481 = arith.divf %479, %480 : vector<16x1xf32>
    %cst_200 = arith.constant 9.99999996E-13 : f32
    %482 = vector.broadcast %cst_200 : f32 to vector<16x1xf32>
    %483 = arith.addf %481, %482 : vector<16x1xf32>
    %484 = math.rsqrt %483 : vector<16x1xf32>
    %485 = vector.broadcast %484 : vector<16x1xf32> to vector<16x32xf32>
    %486 = arith.mulf %476, %485 : vector<16x32xf32>
    %487 = vector.broadcast %468 : vector<1x32xf32> to vector<16x32xf32>
    %488 = arith.mulf %486, %487 : vector<16x32xf32>
    %489 = vector.broadcast %470 : vector<1x32xf32> to vector<16x32xf32>
    %490 = arith.addf %488, %489 : vector<16x32xf32>
    %c1_201 = arith.constant 1 : index
    %c0_202 = arith.constant 0 : index
    %c0_203 = arith.constant 0 : index
    %491 = vector.load %arg10[%c1_201, %c0_202, %c0_203] : memref<2x32x64xf32, #tpu.memory_space<vmem>>, vector<1x32x64xf32>
    %492 = vector.shape_cast %491 : vector<1x32x64xf32> to vector<32x64xf32>
    %cst_204 = arith.constant dense<0.000000e+00> : vector<16x64xf32>
    %493 = tpu.matmul %490, %492, %cst_204 {dimension_numbers = #tpu.dot_dimension_numbers<[1], [0], [0], [1], [0, 0, 1, 1], [], []>} : vector<16x32xf32>, vector<32x64xf32>, vector<16x64xf32> -> vector<16x64xf32>
    %c1_205 = arith.constant 1 : index
    %c0_206 = arith.constant 0 : index
    %c0_207 = arith.constant 0 : index
    %494 = vector.load %arg11[%c1_205, %c0_206, %c0_207] : memref<2x1x64xf32, #tpu.memory_space<vmem>>, vector<1x1x64xf32>
    %495 = vector.shape_cast %494 : vector<1x1x64xf32> to vector<1x64xf32>
    %496 = vector.broadcast %495 : vector<1x64xf32> to vector<16x64xf32>
    %497 = arith.addf %493, %496 : vector<16x64xf32>
    %cst_208 = arith.constant 5.000000e-01 : f32
    %498 = vector.broadcast %cst_208 : f32 to vector<16x64xf32>
    %499 = arith.mulf %498, %497 : vector<16x64xf32>
    %cst_209 = arith.constant 1.41421354 : f32
    %500 = vector.broadcast %cst_209 : f32 to vector<16x64xf32>
    %501 = arith.divf %497, %500 : vector<16x64xf32>
    %502 = math.erf %501 : vector<16x64xf32>
    %cst_210 = arith.constant 1.000000e+00 : f32
    %503 = vector.broadcast %cst_210 : f32 to vector<16x64xf32>
    %504 = arith.addf %503, %502 : vector<16x64xf32>
    %505 = arith.mulf %499, %504 : vector<16x64xf32>
    %c1_211 = arith.constant 1 : index
    %c0_212 = arith.constant 0 : index
    %c0_213 = arith.constant 0 : index
    %506 = vector.load %arg12[%c1_211, %c0_212, %c0_213] : memref<2x64x32xf32, #tpu.memory_space<vmem>>, vector<1x64x32xf32>
    %507 = vector.shape_cast %506 : vector<1x64x32xf32> to vector<64x32xf32>
    %cst_214 = arith.constant dense<0.000000e+00> : vector<16x32xf32>
    %508 = tpu.matmul %505, %507, %cst_214 {dimension_numbers = #tpu.dot_dimension_numbers<[1], [0], [0], [1], [0, 0, 1, 1], [], []>} : vector<16x64xf32>, vector<64x32xf32>, vector<16x32xf32> -> vector<16x32xf32>
    %c1_215 = arith.constant 1 : index
    %c0_216 = arith.constant 0 : index
    %c0_217 = arith.constant 0 : index
    %509 = vector.load %arg13[%c1_215, %c0_216, %c0_217] : memref<2x1x32xf32, #tpu.memory_space<vmem>>, vector<1x1x32xf32>
    %510 = vector.shape_cast %509 : vector<1x1x32xf32> to vector<1x32xf32>
    %511 = vector.broadcast %510 : vector<1x32xf32> to vector<16x32xf32>
    %512 = arith.addf %508, %511 : vector<16x32xf32>
    %513 = arith.addf %490, %512 : vector<16x32xf32>
    %c1_218 = arith.constant 1 : index
    %c0_219 = arith.constant 0 : index
    %c0_220 = arith.constant 0 : index
    %514 = vector.load %arg14[%c1_218, %c0_219, %c0_220] : memref<2x1x32xf32, #tpu.memory_space<vmem>>, vector<1x1x32xf32>
    %515 = vector.shape_cast %514 : vector<1x1x32xf32> to vector<1x32xf32>
    %c1_221 = arith.constant 1 : index
    %c0_222 = arith.constant 0 : index
    %c0_223 = arith.constant 0 : index
    %516 = vector.load %arg15[%c1_221, %c0_222, %c0_223] : memref<2x1x32xf32, #tpu.memory_space<vmem>>, vector<1x1x32xf32>
    %517 = vector.shape_cast %516 : vector<1x1x32xf32> to vector<1x32xf32>
    %cst_224 = arith.constant dense<0.000000e+00> : vector<16xf32>
    %518 = vector.multi_reduction <add>, %513, %cst_224 [1] : vector<16x32xf32> to vector<16xf32>
    %519 = vector.shape_cast %518 : vector<16xf32> to vector<16x1xf32>
    %cst_225 = arith.constant 3.200000e+01 : f32
    %520 = vector.broadcast %cst_225 : f32 to vector<16x1xf32>
    %521 = arith.divf %519, %520 : vector<16x1xf32>
    %522 = vector.broadcast %521 : vector<16x1xf32> to vector<16x32xf32>
    %523 = arith.subf %513, %522 : vector<16x32xf32>
    %524 = arith.mulf %523, %523 : vector<16x32xf32>
    %cst_226 = arith.constant dense<0.000000e+00> : vector<16xf32>
    %525 = vector.multi_reduction <add>, %524, %cst_226 [1] : vector<16x32xf32> to vector<16xf32>
    %526 = vector.shape_cast %525 : vector<16xf32> to vector<16x1xf32>
    %cst_227 = arith.constant 3.200000e+01 : f32
    %527 = vector.broadcast %cst_227 : f32 to vector<16x1xf32>
    %528 = arith.divf %526, %527 : vector<16x1xf32>
    %cst_228 = arith.constant 9.99999996E-13 : f32
    %529 = vector.broadcast %cst_228 : f32 to vector<16x1xf32>
    %530 = arith.addf %528, %529 : vector<16x1xf32>
    %531 = math.rsqrt %530 : vector<16x1xf32>
    %532 = vector.broadcast %531 : vector<16x1xf32> to vector<16x32xf32>
    %533 = arith.mulf %523, %532 : vector<16x32xf32>
    %534 = vector.broadcast %515 : vector<1x32xf32> to vector<16x32xf32>
    %535 = arith.mulf %533, %534 : vector<16x32xf32>
    %536 = vector.broadcast %517 : vector<1x32xf32> to vector<16x32xf32>
    %537 = arith.addf %535, %536 : vector<16x32xf32>
    %538 = vector.extract_strided_slice %537 {offsets = [0, 0], sizes = [1, 32], strides = [1, 1]} : vector<16x32xf32> to vector<1x32xf32>
    %c0_229 = arith.constant 0 : index
    %c0_230 = arith.constant 0 : index
    %539 = vector.load %arg16[%c0_229, %c0_230] : memref<32x32xf32, #tpu.memory_space<vmem>>, vector<32x32xf32>
    %cst_231 = arith.constant dense<0.000000e+00> : vector<1x32xf32>
    %540 = tpu.matmul %538, %539, %cst_231 {dimension_numbers = #tpu.dot_dimension_numbers<[1], [0], [0], [1], [0, 0, 1, 1], [], []>} : vector<1x32xf32>, vector<32x32xf32>, vector<1x32xf32> -> vector<1x32xf32>
    %c0_232 = arith.constant 0 : index
    %c0_233 = arith.constant 0 : index
    %541 = vector.load %arg17[%c0_232, %c0_233] : memref<1x32xf32, #tpu.memory_space<vmem>>, vector<1x32xf32>
    %542 = arith.addf %540, %541 : vector<1x32xf32>
    %543 = math.tanh %542 : vector<1x32xf32>
    %c0_234 = arith.constant 0 : index
    %c0_235 = arith.constant 0 : index
    %544 = vector.load %arg18[%c0_234, %c0_235] : memref<32x3xf32, #tpu.memory_space<vmem>>, vector<32x3xf32>
    %cst_236 = arith.constant dense<0.000000e+00> : vector<1x3xf32>
    %545 = tpu.matmul %543, %544, %cst_236 {dimension_numbers = #tpu.dot_dimension_numbers<[1], [0], [0], [1], [0, 0, 1, 1], [], []>} : vector<1x32xf32>, vector<32x3xf32>, vector<1x3xf32> -> vector<1x3xf32>
    %c0_237 = arith.constant 0 : index
    %c0_238 = arith.constant 0 : index
    %546 = vector.load %arg19[%c0_237, %c0_238] : memref<1x3xf32, #tpu.memory_space<vmem>>, vector<1x3xf32>
    %547 = arith.addf %545, %546 : vector<1x3xf32>
    %c0_239 = arith.constant 0 : index
    %c0_240 = arith.constant 0 : index
    %548 = vector.load %arg20[%c0_239, %c0_240] : memref<2x3xf32, #tpu.memory_space<vmem>>, vector<1x3xf32>
    tpu.vector_store %arg20[%c0_239, %c0_240], %547 {strides = array<i32>} : memref<2x3xf32, #tpu.memory_space<vmem>>, vector<1x3xf32>,
    %549 = vector.extract_strided_slice %537 {offsets = [8, 0], sizes = [1, 32], strides = [1, 1]} : vector<16x32xf32> to vector<1x32xf32>
    %c0_241 = arith.constant 0 : index
    %c0_242 = arith.constant 0 : index
    %550 = vector.load %arg16[%c0_241, %c0_242] : memref<32x32xf32, #tpu.memory_space<vmem>>, vector<32x32xf32>
    %cst_243 = arith.constant dense<0.000000e+00> : vector<1x32xf32>
    %551 = tpu.matmul %549, %550, %cst_243 {dimension_numbers = #tpu.dot_dimension_numbers<[1], [0], [0], [1], [0, 0, 1, 1], [], []>} : vector<1x32xf32>, vector<32x32xf32>, vector<1x32xf32> -> vector<1x32xf32>
    %c0_244 = arith.constant 0 : index
    %c0_245 = arith.constant 0 : index
    %552 = vector.load %arg17[%c0_244, %c0_245] : memref<1x32xf32, #tpu.memory_space<vmem>>, vector<1x32xf32>
    %553 = arith.addf %551, %552 : vector<1x32xf32>
    %554 = math.tanh %553 : vector<1x32xf32>
    %c0_246 = arith.constant 0 : index
    %c0_247 = arith.constant 0 : index
    %555 = vector.load %arg18[%c0_246, %c0_247] : memref<32x3xf32, #tpu.memory_space<vmem>>, vector<32x3xf32>
    %cst_248 = arith.constant dense<0.000000e+00> : vector<1x3xf32>
    %556 = tpu.matmul %554, %555, %cst_248 {dimension_numbers = #tpu.dot_dimension_numbers<[1], [0], [0], [1], [0, 0, 1, 1], [], []>} : vector<1x32xf32>, vector<32x3xf32>, vector<1x3xf32> -> vector<1x3xf32>
    %c0_249 = arith.constant 0 : index
    %c0_250 = arith.constant 0 : index
    %557 = vector.load %arg19[%c0_249, %c0_250] : memref<1x3xf32, #tpu.memory_space<vmem>>, vector<1x3xf32>
    %558 = arith.addf %556, %557 : vector<1x3xf32>
    %c1_251 = arith.constant 1 : index
    %c0_252 = arith.constant 0 : index
    %559 = vector.load %arg20[%c1_251, %c0_252] : memref<2x3xf32, #tpu.memory_space<vmem>>, vector<1x3xf32>
    tpu.vector_store %arg20[%c1_251, %c0_252], %558 {strides = array<i32>} : memref<2x3xf32, #tpu.memory_space<vmem>>, vector<1x3xf32>,
    return
  }
}

</mosaic_0001>

<bundles_post_ra>
// kernel: bert_lr_forward.1
= control target key start
LH: loop header
LB: loop body
LE: loop exit
PB: predicated region body
PF: predicated region fallthrough
CT: control target
= control target key end

     0   :  { %vm70_vm0 = vcmask 261120   ;;  %v4819_v34 = vmov 0.0   ;;  %vm4820_vm1 = vmmov 0   ;;  %s4821_s28 = smov 88   ;;  %s4823_s29 = smov 120   ;;  %vm209_vm2 = vcmask 64512   ;;  %s5621_s0 = inlined_call_operand.vmem [shape: f32[16,32], index: 0, kind: input, shape index: {}]   ;;  %s5622_s4 = inlined_call_operand.vmem [shape: f32[2,32,96], index: 4, kind: input, shape index: {}]   ;;  %s5623_s2 = inlined_call_operand.vmem [shape: f32[1,32], index: 2, kind: input, shape index: {}]   ;;  %s5624_s3 = inlined_call_operand.vmem [shape: f32[1,32], index: 3, kind: input, shape index: {}]   ;;  %s5625_s5 = inlined_call_operand.vmem [shape: f32[2,1,96], index: 5, kind: input, shape index: {}]   ;;  %s5626_s1 = inlined_call_operand.vmem [shape: f32[2,8], index: 1, kind: input, shape index: {}]   ;;  %s5627_s6 = inlined_call_operand.vmem [shape: f32[2,32,32], index: 6, kind: input, shape index: {}]   ;;  %s5628_s7 = inlined_call_operand.vmem [shape: f32[2,1,32], index: 7, kind: input, shape index: {}]   ;;  %s5629_s10 = inlined_call_operand.vmem [shape: f32[2,32,64], index: 10, kind: input, shape index: {}]   ;;  %s5630_s8 = inlined_call_operand.vmem [shape: f32[2,1,32], index: 8, kind: input, shape index: {}]   ;;  %s5631_s9 = inlined_call_operand.vmem [shape: f32[2,1,32], index: 9, kind: input, shape index: {}]   ;;  %s5632_s12 = inlined_call_operand.vmem [shape: f32[2,64,32], index: 12, kind: input, shape index: {}]   ;;  %s5633_s11 = inlined_call_operand.vmem [shape: f32[2,1,64], index: 11, kind: input, shape index: {}]   ;;  %s5634_s13 = inlined_call_operand.vmem [shape: f32[2,1,32], index: 13, kind: input, shape index: {}]   ;;  %s5635_s14 = inlined_call_operand.vmem [shape: f32[2,1,32], index: 14, kind: input, shape index: {}]   ;;  %s5636_s15 = inlined_call_operand.vmem [shape: f32[2,1,32], index: 15, kind: input, shape index: {}]   ;;  %s5637_s16 = inlined_call_operand.vmem [shape: f32[32,32], index: 16, kind: input, shape index: {}]   ;;  %s5638_s18 = inlined_call_operand.vmem [shape: f32[32,3], index: 18, kind: input, shape index: {}]   ;;  %s5639_s17 = inlined_call_operand.vmem [shape: f32[1,32], index: 17, kind: input, shape index: {}]   ;;  %s5640_s19 = inlined_call_operand.vmem [shape: f32[1,3], index: 19, kind: input, shape index: {}]   ;;  %s5641_s20 = inlined_call_operand.vmem [shape: f32[2,3], index: 20, kind: output, shape index: {}]  }
   0x1   :  { %5661 = sst [smem:[#allocation3_spill]] %s5621_s0  ;;  %4410 = vmatprep.subr.mxu1 %v4819_v34  ;;  %4412 = vmatprep.mubr.msk.f32.mxu1 %vm4820_vm1, %v4819_v34  ;;  %s5659_s30 = smov 112   ;;  %v285_v54 = vlaneseq  ;;  %v65_v57 = vld [vmem:[%s5626_s1] sm:$0x3]  ;;  %vm549_vm3 = vcmask 130112   ;;  %vm722_vm4 = vcmask 195712  }
   0x2   :  { %5662 = sst [smem:[#allocation4_spill]] %s5622_s4  ;;  %s5657_s0 = smov 80   ;;  %vm895_vm5 = vcmask 261312   ;;  %vm1842_vm6 = vcmask 523264   ;;  %vm3981_vm7 = vcmask 16384  }
   0x3   :  { %5663 = sst [smem:[#allocation5_spill]] %s5623_s2  ;;  %s5655_s21 = smov 104   ;;  %v286_v55 = vshrl.u32 %v285_v54, 7 }
   0x4   :  { %5664 = sst [smem:[#allocation6_spill]] %s5624_s3  ;;  %s5653_s4 = smov 72  }
   0x5   :  { %5665 = sst [smem:[#allocation7_spill]] %s5625_s5  ;;  %s4822_s5 = smov 96   ;;  %v287_v56 = vsub.s32 0, %v286_v55 }
   0x6   :  { %s5666_s23 = sld [smem:[#allocation3_spill]]  ;;  %s5651_s1 = smov 64  }
   0x7   :  { %s5667_s26 = sld [smem:[#allocation4_spill]]  ;;  %v5059_v58 = vrot.slane %v65_v57, %v287_v56  ;;  %s5649_s24 = smov 48  }
   0x8   :  { %s5668_s22 = sld [smem:[#allocation5_spill]]  ;;  %s5645_s25 = smov 56  }
   0x9   :  { %s5669_s2 = sld [smem:[#allocation6_spill]]  ;;  %s4832_s3 = smov 8  }
   0xa   :  { %s5670_s27 = sld [smem:[#allocation7_spill]] }
   0xc   :  { %v66_v0 = vld [vmem:[%s5666_s23] sm:$0xff]  ;;  %v67_v1 = vld [vmem:[%s5666_s23 + $0x8] sm:$0xff]  ;;  %s4834_s23 = smov 24  }
   0xd   :  { %v71_v2 = vsel %vm70_vm0, %v66_v0, 0.0  ;;  %v74_v3 = vsel %vm70_vm0, %v67_v1, 0.0  ;;  %v117_v14 = vld [vmem:[%s5667_s26 + $0x18] sm:$0xff]  ;;  %v116_v15 = vld [vmem:[%s5667_s26 + $0x10] sm:$0xff]  ;;  %v115_v16 = vld [vmem:[%s5667_s26 + $0x8] sm:$0xff] }
   0xe   :  { %72 = vadd.xlane.f32.xlu0 %v71_v2  ;;  %4399 = vmatprep.subr.mxu0 %v117_v14  ;;  %v114_v17 = vld [vmem:[%s5667_s26] sm:$0xff] }
   0xf   :  { %4400 = vmatpush3.msra.mxu0 %v117_v14  ;;  %v4145_v25 = vld [vmem:[%s5668_s22] ss:$0 sm:$0xff]  ;;  %s4833_s22 = smov 16  }
  0x10   :  { %4401 = vmatprep.subr.mxu0 %v116_v15  ;;  %v4146_v27 = vld [vmem:[%s5669_s2] ss:$0 sm:$0xff]  ;;  %s5647_s2 = smov 40  }
  0x11   :  { %4402 = vmatpush3.msra.mxu0 %v116_v15  ;;  %v4147_v36 = vld [vmem:[%s5670_s27] ss:$0 sm:$0xff] }
  0x12   :  { %75 = vadd.xlane.f32.xlu0 %v74_v3  ;;  %4403 = vmatprep.subr.mxu0 %v115_v16 }
  0x13   :  { %4404 = vmatpush3.msra.mxu0 %v115_v16 }
  0x14   :  { %4405 = vmatprep.subr.mxu0 %v114_v17 }
  0x15   :  { %4406 = vmatpush3.msra.mxu0 %v114_v17 }
  0x16   :  { %4420 = vmatprep.subr.mxu0 %v4819_v34 }
  0x97   :  { %v73_v4 = vpop.xlane.xlu0 %72 }
  0x98   :  { %v78_v5 = vmul.f32 0.03125, %v73_v4 }
  0x9a   :  { %v80_v6 = vsub.f32 %v66_v0, %v78_v5 }
  0x9b   :  { %v76_v7 = vpop.xlane.xlu0 %75 }
  0x9c   :  { %v79_v8 = vmul.f32 0.03125, %v76_v7  ;;  %v82_v9 = vmul.f32 %v80_v6, %v80_v6 }
  0x9e   :  { %v81_v10 = vsub.f32 %v67_v1, %v79_v8  ;;  %v84_v11 = vsel %vm70_vm0, %v82_v9, 0.0  ;;  %v977_v9 = vsub.s32 1, %v286_v55 }
  0x9f   :  { %85 = vadd.xlane.f32.xlu1 %v84_v11 }
  0xa0   :  { %v83_v12 = vmul.f32 %v81_v10, %v81_v10  ;;  %v5071_v15 = vrot.slane %v65_v57, %v977_v9 }
  0xa2   :  { %v87_v13 = vsel %vm70_vm0, %v83_v12, 0.0 }
  0xa3   :  { %88 = vadd.xlane.f32.xlu1 %v87_v13 }
 0x128   :  { %v86_v18 = vpop.xlane.xlu1 %85 }
 0x129   :  { %v90_v19 = vmul.f32 0.03125, %v86_v18 }
 0x12b   :  { %v92_v20 = vadd.f32 1e-12, %v90_v19 }
 0x12c   :  { %v89_v21 = vpop.xlane.xlu1 %88 }
 0x12d   :  { %4723 = vrsqrt.f32 %v92_v20  ;;  %v91_v22 = vmul.f32 0.03125, %v89_v21 }
 0x12f   :  { %v93_v23 = vadd.f32 1e-12, %v91_v22 }
 0x131   :  { %4725 = vrsqrt.f32 %v93_v23 }
 0x13a   :  { %v4724_v24 = vpop.eup %4723 }
 0x13b   :  { %v96_v26 = vmul.f32 %v4724_v24, %v80_v6 }
 0x13d   :  { %v104_v28 = vmul.f32 %v4145_v25, %v96_v26 }
 0x13e   :  { %v4726_v29 = vpop.eup %4725 }
 0x13f   :  { %v97_v30 = vmul.f32 %v4726_v29, %v81_v10  ;;  %v4968_v31 = vadd.f32 %v4146_v27, %v104_v28 }
 0x141   :  { %v105_v32 = vmul.f32 %v4145_v25, %v97_v30  ;;  %4407 = vmatprep.mubr.msk.f32.mxu0 %vm70_vm0, %v4968_v31 }
 0x143   :  { %v4972_v33 = vadd.f32 %v4146_v27, %v105_v32 }
 0x145   :  { %4408 = vmatmul.mubr.msk.f32.vlgmr.msra.gmra.mxu0 %vm70_vm0, %v4972_v33 }
 0x146   :  { %4422 = vmatprep.mubr.msk.f32.mxu0 %vm4820_vm1, %v4819_v34 }
 0x205   :  { %v4409_v35 = vpop.f32.mrf.mxu0 }
 0x206   :  { %v4999_v39 = vadd.f32 %v4409_v35, %v4147_v36 }
 0x207   :  { %v197_v37 = vpop.f32.mrf.mxu0 }
 0x208   :  { %v4985_v38 = vadd.f32 %v4147_v36, %v197_v37 }
 0x20a   :  { %380 = vrot.lane.b32.xlu1 %v4985_v38, %s4821_s28  ;;  %207 = vrot.lane.b32.xlu0 %v4985_v38, %s4822_s5 }
 0x20e   :  { %378 = vrot.lane.b32.xlu1 %v4985_v38, %s4823_s29  ;;  %551 = vrot.lane.b32.xlu0 %v4985_v38, %s5659_s30 }
 0x212   :  { %553 = vrot.lane.b32.xlu1 %v4985_v38, %s5657_s0  ;;  %724 = vrot.lane.b32.xlu0 %v4985_v38, %s5655_s21 }
 0x216   :  { %726 = vrot.lane.b32.xlu1 %v4985_v38, %s5653_s4  ;;  %1070 = vrot.lane.b32.xlu0 %v4999_v39, %s4821_s28 }
 0x21a   :  { %898 = vrot.lane.b32.xlu1 %v4999_v39, %s4822_s5  ;;  %1242 = vrot.lane.b32.xlu0 %v4999_v39, %s5657_s0  ;;  %s5673_s0 = smov 104  }
 0x21e   :  { %1068 = vrot.lane.b32.xlu1 %v4999_v39, %s4823_s29  ;;  %1414 = vrot.lane.b32.xlu0 %v4999_v39, %s5653_s4 }
 0x222   :  { %1240 = vrot.lane.b32.xlu1 %v4999_v39, %s5659_s30  ;;  %s5672_s30 = smov 80  }
 0x226   :  { %1412 = vrot.lane.b32.xlu1 %v4999_v39, %s5655_s21  ;;  %s5678_s21 = smov 56  }
 0x27c   :  { %v381_v40 = vpop.permute.xlu1 %380  ;;  %v208_v41 = vpop.permute.xlu0 %207 }
 0x27d   :  { %4411 = vmatpush3.xpose.msk.msra.mxu1 %vm209_vm2, %v208_v41  ;;  %4421 = vmatpush3.xpose.msk.msra.mxu0 %vm209_vm2, %v381_v40 }
 0x27e   :  { %4430 = vmatprep.subr.mxu0 %v4819_v34  ;;  %4415 = vmatprep.subr.mxu1 %v4819_v34 }
 0x280   :  { %v379_v42 = vpop.permute.xlu1 %378  ;;  %4413 = vmatmul.mubr.msk.f32.vlgmr.msra.gmra.mxu1 %vm209_vm2, %v4985_v38  ;;  %v552_v43 = vpop.permute.xlu0 %551 }
 0x281   :  { %4423 = vmatmul.mubr.msk.f32.vlgmr.msra.gmra.mxu0 %vm209_vm2, %v379_v42  ;;  %4417 = vmatprep.mubr.msk.f32.mxu1 %vm4820_vm1, %v4819_v34 }
 0x282   :  { %4432 = vmatprep.mubr.msk.f32.mxu0 %vm4820_vm1, %v4819_v34 }
 0x284   :  { %v554_v44 = vpop.permute.xlu1 %553  ;;  %v725_v45 = vpop.permute.xlu0 %724 }
 0x285   :  { %4431 = vmatpush3.xpose.msk.msra.mxu0 %vm209_vm2, %v554_v44 }
 0x286   :  { %4440 = vmatprep.subr.mxu0 %v4819_v34 }
 0x288   :  { %v727_v46 = vpop.permute.xlu1 %726  ;;  %4433 = vmatmul.mubr.msk.f32.vlgmr.msra.gmra.mxu0 %vm209_vm2, %v552_v43  ;;  %v1071_v47 = vpop.permute.xlu0 %1070 }
 0x289   :  { %4441 = vmatpush3.xpose.msk.msra.mxu0 %vm209_vm2, %v727_v46  ;;  %4442 = vmatprep.mubr.msk.f32.mxu0 %vm4820_vm1, %v4819_v34 }
 0x28a   :  { %4450 = vmatprep.subr.mxu0 %v4819_v34 }
 0x28c   :  { %v899_v48 = vpop.permute.xlu1 %898  ;;  %4443 = vmatmul.mubr.msk.f32.vlgmr.msra.gmra.mxu0 %vm209_vm2, %v725_v45  ;;  %v1243_v50 = vpop.permute.xlu0 %1242 }
 0x28d   :  { %4451 = vmatpush3.xpose.msk.msra.mxu0 %vm209_vm2, %v899_v48  ;;  %4452 = vmatprep.mubr.msk.f32.mxu0 %vm4820_vm1, %v4819_v34 }
 0x28e   :  { %4460 = vmatprep.subr.mxu0 %v4819_v34 }
 0x290   :  { %v1069_v49 = vpop.permute.xlu1 %1068  ;;  %4453 = vmatmul.mubr.msk.f32.vlgmr.msra.gmra.mxu0 %vm209_vm2, %v4999_v39  ;;  %v1415_v52 = vpop.permute.xlu0 %1414 }
 0x291   :  { %4461 = vmatpush3.xpose.msk.msra.mxu0 %vm209_vm2, %v1071_v47  ;;  %4462 = vmatprep.mubr.msk.f32.mxu0 %vm4820_vm1, %v4819_v34 }
 0x292   :  { %4470 = vmatprep.subr.mxu0 %v4819_v34 }
 0x294   :  { %4463 = vmatmul.mubr.msk.f32.vlgmr.msra.gmra.mxu0 %vm209_vm2, %v1069_v49  ;;  %v1241_v51 = vpop.permute.xlu1 %1240 }
 0x295   :  { %4471 = vmatpush3.xpose.msk.msra.mxu0 %vm209_vm2, %v1243_v50  ;;  %4472 = vmatprep.mubr.msk.f32.mxu0 %vm4820_vm1, %v4819_v34 }
 0x296   :  { %4480 = vmatprep.subr.mxu0 %v4819_v34 }
 0x298   :  { %4473 = vmatmul.mubr.msk.f32.vlgmr.msra.gmra.mxu0 %vm209_vm2, %v1241_v51  ;;  %v1413_v53 = vpop.permute.xlu1 %1412 }
 0x299   :  { %4481 = vmatpush3.xpose.msk.msra.mxu0 %vm209_vm2, %v1415_v52  ;;  %4482 = vmatprep.mubr.msk.f32.mxu0 %vm4820_vm1, %v4819_v34 }
 0x29c   :  { %4483 = vmatmul.mubr.msk.f32.vlgmr.msra.gmra.mxu0 %vm209_vm2, %v1413_v53 }
 0x340   :  { %v280_v59 = vpop.f32.mrf.mxu1 }
 0x341   :  { %v284_v60 = vmul.f32 0.35355338, %v280_v59  ;;  %v452_v61 = vpop.f32.mrf.mxu0 }
 0x342   :  { %v456_v62 = vmul.f32 0.35355338, %v452_v61  ;;  %v4414_v63 = vpop.f32.mrf.mxu1 }
 0x343   :  { %v4424_v0 = vpop.f32.mrf.mxu0  ;;  %v289_v1 = vadd.f32 %v5059_v58, %v284_v60 }
 0x344   :  { %v457_v2 = vadd.f32 %v456_v62, %v5059_v58 }
 0x345   :  { %v290_v3 = vsel %vm209_vm2, %v289_v1, -inf }
 0x346   :  { %291 = vmax.xlane.f32.xlu0 %v290_v3  ;;  %v458_v4 = vsel %vm209_vm2, %v457_v2, -inf }
 0x347   :  { %459 = vmax.xlane.f32.xlu1 %v458_v4 }
 0x348   :  { %v625_v5 = vpop.f32.mrf.mxu0 }
 0x349   :  { %v629_v6 = vmul.f32 0.35355338, %v625_v5 }
 0x34a   :  { %v4434_v7 = vpop.f32.mrf.mxu0 }
 0x34b   :  { %v5066_v8 = vadd.f32 %v629_v6, %v5059_v58 }
 0x34c   :  { %v798_v10 = vpop.f32.mrf.mxu0 }
 0x34d   :  { %v802_v11 = vmul.f32 0.35355338, %v798_v10  ;;  %v631_v12 = vsel %vm209_vm2, %v5066_v8, -inf }
 0x34e   :  { %632 = vmax.xlane.f32.xlu0 %v631_v12  ;;  %v4444_v13 = vpop.f32.mrf.mxu0 }
 0x34f   :  { %v803_v14 = vadd.f32 %v802_v11, %v5059_v58 }
 0x350   :  { %v970_v16 = vpop.f32.mrf.mxu0 }
 0x351   :  { %v974_v17 = vmul.f32 0.35355338, %v970_v16  ;;  %v804_v18 = vsel %vm209_vm2, %v803_v14, -inf }
 0x352   :  { %805 = vmax.xlane.f32.xlu0 %v804_v18  ;;  %v4454_v19 = vpop.f32.mrf.mxu0 }
 0x353   :  { %v5075_v20 = vadd.f32 %v5071_v15, %v974_v17 }
 0x354   :  { %v1142_v21 = vpop.f32.mrf.mxu0 }
 0x355   :  { %v1146_v22 = vmul.f32 0.35355338, %v1142_v21  ;;  %v980_v23 = vsel %vm209_vm2, %v5075_v20, -inf }
 0x356   :  { %981 = vmax.xlane.f32.xlu0 %v980_v23  ;;  %v4464_v24 = vpop.f32.mrf.mxu0 }
 0x357   :  { %v1147_v25 = vadd.f32 %v1146_v22, %v5071_v15 }
 0x358   :  { %v1314_v26 = vpop.f32.mrf.mxu0 }
 0x359   :  { %v1318_v27 = vmul.f32 0.35355338, %v1314_v26  ;;  %v1148_v28 = vsel %vm209_vm2, %v1147_v25, -inf }
 0x35a   :  { %1149 = vmax.xlane.f32.xlu1 %v1148_v28  ;;  %v4474_v29 = vpop.f32.mrf.mxu0 }
 0x35b   :  { %v1319_v30 = vadd.f32 %v1318_v27, %v5071_v15 }
 0x35c   :  { %v1486_v32 = vpop.f32.mrf.mxu0 }
 0x35d   :  { %v1320_v35 = vsel %vm209_vm2, %v1319_v30, -inf  ;;  %v1490_v37 = vmul.f32 0.35355338, %v1486_v32 }
 0x35e   :  { %1321 = vmax.xlane.f32.xlu0 %v1320_v35  ;;  %v4484_v36 = vpop.f32.mrf.mxu0 }
 0x35f   :  { %v1491_v40 = vadd.f32 %v1490_v37, %v5071_v15 }
 0x361   :  { %v1492_v41 = vsel %vm209_vm2, %v1491_v40, -inf }
 0x36b   :  { %301 = vrot.lane.b32.xlu1 %v4985_v38, %s5651_s1 }
 0x38f   :  { %1493 = vmax.xlane.f32.xlu1 %v1492_v41 }
 0x3a0   :  { %642 = vrot.lane.b32.xlu1 %v4985_v38, %s5649_s24 }
 0x3a4   :  { %815 = vrot.lane.b32.xlu1 %v4985_v38, %s5647_s2 }
 0x3a8   :  { %991 = vrot.lane.b32.xlu1 %v4999_v39, %s5651_s1 }
 0x3cf   :  { %v292_v42 = vpop.xlane.xlu0 %291 }
 0x3d0   :  { %v293_v43 = vsub.f32 %v289_v1, %v292_v42  ;;  %v460_v44 = vpop.xlane.xlu1 %459 }
 0x3d1   :  { %v461_v45 = vsub.f32 %v457_v2, %v460_v44 }
 0x3d2   :  { %v294_v46 = vmul.f32 1.442695, %v293_v43 }
 0x3d3   :  { %v462_v47 = vmul.f32 1.442695, %v461_v45 }
 0x3d4   :  { %4727 = vpow2.f32 %v294_v46 }
 0x3d5   :  { %4729 = vpow2.f32 %v462_v47 }
 0x3d7   :  { %v633_v48 = vpop.xlane.xlu0 %632 }
 0x3d8   :  { %v634_v61 = vsub.f32 %v5066_v8, %v633_v48 }
 0x3da   :  { %v635_v63 = vmul.f32 1.442695, %v634_v61 }
 0x3db   :  { %v806_v49 = vpop.xlane.xlu0 %805 }
 0x3dc   :  { %v807_v50 = vsub.f32 %v803_v14, %v806_v49 }
 0x3de   :  { %v808_v51 = vmul.f32 1.442695, %v807_v50 }
 0x3df   :  { %v982_v62 = vpop.xlane.xlu0 %981 }
 0x3e0   :  { %4731 = vpow2.f32 %v808_v51  ;;  %v983_v0 = vsub.f32 %v5075_v20, %v982_v62 }
 0x3e1   :  { %v4728_v52 = vpop.eup %4727  ;;  %4733 = vpow2.f32 %v635_v63 }
 0x3e2   :  { %v5093_v53 = vpop.eup %4729  ;;  %v296_v54 = vsel %vm209_vm2, %v4728_v52, 0.0  ;;  %v984_v2 = vmul.f32 1.442695, %v983_v0 }
 0x3e3   :  { %v1150_v55 = vpop.xlane.xlu1 %1149  ;;  %297 = vadd.xlane.f32.xlu0 %v296_v54  ;;  %v464_v56 = vsel %vm209_vm2, %v5093_v53, 0.0 }
 0x3e4   :  { %465 = vadd.xlane.f32.xlu1 %v464_v56  ;;  %4735 = vpow2.f32 %v984_v2  ;;  %v1151_v4 = vsub.f32 %v1147_v25, %v1150_v55  ;;  %v1588_v2 = vld [vmem:[%s5627_s6 + $0x10] sm:$0xff] }
 0x3e6   :  { %v1152_v6 = vmul.f32 1.442695, %v1151_v4  ;;  %v1587_v4 = vld [vmem:[%s5627_s6 + $0x8] sm:$0xff] }
 0x3e7   :  { %v302_v57 = vpop.permute.xlu1 %301  ;;  %v1322_v1 = vpop.xlane.xlu0 %1321 }
 0x3e8   :  { %4416 = vmatpush3.msra.mxu1 %v302_v57  ;;  %v1323_v3 = vsub.f32 %v1319_v30, %v1322_v1  ;;  %v1589_v1 = vld [vmem:[%s5627_s6 + $0x18] sm:$0xff] }
 0x3e9   :  { %4425 = vmatprep.subr.mxu1 %v4819_v34  ;;  %4490 = vmatprep.subr.mxu0 %v1589_v1 }
 0x3ea   :  { %v1324_v5 = vmul.f32 1.442695, %v1323_v3  ;;  %4491 = vmatpush3.msra.mxu0 %v1589_v1  ;;  %v1831_v1 = vld [vmem:[%s5632_s12 + $0x20] sm:$0xff] }
 0x3eb   :  { %4492 = vmatprep.subr.mxu0 %v1588_v2 }
 0x3ec   :  { %4737 = vpow2.f32 %v1324_v5  ;;  %4493 = vmatpush3.msra.mxu0 %v1588_v2  ;;  %v1830_v2 = vld [vmem:[%s5632_s12 + $0x18] sm:$0xff] }
 0x3ed   :  { %v5099_v59 = vpop.eup %4731  ;;  %4739 = vpow2.f32 %v1152_v6  ;;  %v1586_v6 = vld [vmem:[%s5627_s6] sm:$0xff]  ;;  %4494 = vmatprep.subr.mxu0 %v1587_v4 }
 0x3ee   :  { %v810_v60 = vsel %vm209_vm2, %v5099_v59, 0.0  ;;  %4495 = vmatpush3.msra.mxu0 %v1587_v4  ;;  %v1828_v4 = vld [vmem:[%s5632_s12 + $0x8] sm:$0xff] }
 0x3ef   :  { %811 = vadd.xlane.f32.xlu1 %v810_v60  ;;  %4496 = vmatprep.subr.mxu0 %v1586_v6 }
 0x3f0   :  { %4497 = vmatpush3.msra.mxu0 %v1586_v6  ;;  %v4179_v6 = vld [vmem:[%s5633_s11] ss:$0 sm:$0xff] }
 0x3f9   :  { %469 = vrot.lane.b32.xlu0 %v4985_v38, %s5645_s25  ;;  %v4734_v38 = vpop.eup %4733 }
 0x3fa   :  { %v637_v7 = vsel %vm209_vm2, %v4734_v38, 0.0  ;;  %v5110_v8 = vpop.eup %4735 }
 0x3fb   :  { %v986_v12 = vsel %vm209_vm2, %v5110_v8, 0.0  ;;  %v5114_v13 = vpop.eup %4737 }
 0x3fc   :  { %v1326_v14 = vsel %vm209_vm2, %v5114_v13, 0.0  ;;  %v4740_v16 = vpop.eup %4739 }
 0x3fd   :  { %v1154_v17 = vsel %vm209_vm2, %v4740_v16, 0.0 }
 0x400   :  { %1159 = vrot.lane.b32.xlu1 %v4999_v39, %s5645_s25  ;;  %s5671_s25 = smov 112  }
 0x418   :  { %v1494_v9 = vpop.xlane.xlu1 %1493  ;;  %638 = vadd.xlane.f32.xlu0 %v637_v7 }
 0x419   :  { %v1495_v10 = vsub.f32 %v1491_v40, %v1494_v9 }
 0x41b   :  { %v1496_v11 = vmul.f32 1.442695, %v1495_v10 }
 0x41c   :  { %987 = vadd.xlane.f32.xlu0 %v986_v12  ;;  %v643_v20 = vpop.permute.xlu1 %642 }
 0x41d   :  { %4741 = vpow2.f32 %v1496_v11 }
 0x420   :  { %1327 = vadd.xlane.f32.xlu0 %v1326_v14  ;;  %v816_v21 = vpop.permute.xlu1 %815 }
 0x424   :  { %1155 = vadd.xlane.f32.xlu1 %v1154_v17  ;;  %v992_v22 = vpop.permute.xlu1 %991 }
 0x42a   :  { %v5119_v18 = vpop.eup %4741 }
 0x42b   :  { %v1498_v19 = vsel %vm209_vm2, %v5119_v18, 0.0 }
 0x42c   :  { %1499 = vadd.xlane.f32.xlu0 %v1498_v19 }
 0x435   :  { %1503 = vrot.lane.b32.xlu1 %v4999_v39, %s5647_s2 }
 0x442   :  { %1331 = vrot.lane.b32.xlu0 %v4999_v39, %s5649_s24 }
 0x46c   :  { %v298_v23 = vpop.xlane.xlu0 %297 }
 0x46d   :  { %4743 = vrcp.f32 %v298_v23  ;;  %v466_v24 = vpop.xlane.xlu1 %465 }
 0x46e   :  { %4745 = vrcp.f32 %v466_v24 }
 0x470   :  { %v470_v28 = vpop.permute.xlu0 %469 }
 0x478   :  { %v812_v29 = vpop.xlane.xlu1 %811 }
 0x47a   :  { %v4744_v25 = vpop.eup %4743 }
 0x47b   :  { %v300_v26 = vmul.f32 %v4744_v25, %v4728_v52  ;;  %v4746_v27 = vpop.eup %4745 }
 0x47c   :  { %v468_v39 = vmul.f32 %v4746_v27, %v5093_v53  ;;  %v1160_v35 = vpop.permute.xlu1 %1159 }
 0x47d   :  { %4418 = vmatmul.mubr.msk.f32.vlgmr.msra.gmra.mxu1 %vm209_vm2, %v300_v26 }
 0x47e   :  { %4426 = vmatpush3.msra.mxu1 %v470_v28  ;;  %4427 = vmatprep.mubr.msk.f32.mxu1 %vm4820_vm1, %v4819_v34 }
 0x47f   :  { %4435 = vmatprep.subr.mxu1 %v4819_v34 }
 0x481   :  { %4428 = vmatmul.mubr.msk.f32.vlgmr.msra.gmra.mxu1 %vm209_vm2, %v468_v39 }
 0x482   :  { %4436 = vmatpush3.msra.mxu1 %v643_v20  ;;  %4437 = vmatprep.mubr.msk.f32.mxu1 %vm4820_vm1, %v4819_v34  ;;  %v4174_v20 = vld [vmem:[%s5628_s7] ss:$0 sm:$0xff] }
 0x483   :  { %4445 = vmatprep.subr.mxu1 %v4819_v34 }
 0x4a1   :  { %v639_v30 = vpop.xlane.xlu0 %638 }
 0x4a2   :  { %4747 = vrcp.f32 %v639_v30 }
 0x4a3   :  { %4749 = vrcp.f32 %v812_v29 }
 0x4a5   :  { %v988_v32 = vpop.xlane.xlu0 %987 }
 0x4a6   :  { %4751 = vrcp.f32 %v988_v32 }
 0x4a9   :  { %v1328_v36 = vpop.xlane.xlu0 %1327 }
 0x4ad   :  { %v1156_v37 = vpop.xlane.xlu1 %1155 }
 0x4ae   :  { %4753 = vrcp.f32 %v1156_v37 }
 0x4af   :  { %v4748_v40 = vpop.eup %4747  ;;  %4755 = vrcp.f32 %v1328_v36 }
 0x4b0   :  { %v641_v41 = vmul.f32 %v4748_v40, %v4734_v38  ;;  %v4750_v42 = vpop.eup %4749 }
 0x4b1   :  { %v814_v43 = vmul.f32 %v4750_v42, %v5099_v59  ;;  %v1504_v52 = vpop.permute.xlu1 %1503  ;;  %v1726_v42 = vld [vmem:[%s5629_s10 + $0x10] sm:$0xff] }
 0x4b2   :  { %4438 = vmatmul.mubr.msk.f32.vlgmr.msra.gmra.mxu1 %vm209_vm2, %v641_v41 }
 0x4b3   :  { %4446 = vmatpush3.msra.mxu1 %v816_v21  ;;  %4447 = vmatprep.mubr.msk.f32.mxu1 %vm4820_vm1, %v4819_v34  ;;  %v4752_v44 = vpop.eup %4751 }
 0x4b4   :  { %4455 = vmatprep.subr.mxu1 %v4819_v34  ;;  %v990_v46 = vmul.f32 %v4752_v44, %v5110_v8  ;;  %v1724_v44 = vld [vmem:[%s5629_s10] sm:$0xff] }
 0x4b5   :  { %v1500_v45 = vpop.xlane.xlu0 %1499 }
 0x4b6   :  { %4757 = vrcp.f32 %v1500_v45  ;;  %4448 = vmatmul.mubr.msk.f32.vlgmr.msra.gmra.mxu1 %vm209_vm2, %v814_v43  ;;  %v1725_v43 = vld [vmem:[%s5629_s10 + $0x8] sm:$0xff] }
 0x4b7   :  { %4456 = vmatpush3.msra.mxu1 %v992_v22  ;;  %4457 = vmatprep.mubr.msk.f32.mxu1 %vm4820_vm1, %v4819_v34 }
 0x4b8   :  { %4465 = vmatprep.subr.mxu1 %v4819_v34 }
 0x4b9   :  { %v1332_v50 = vpop.permute.xlu0 %1331 }
 0x4ba   :  { %4458 = vmatmul.mubr.msk.f32.vlgmr.msra.gmra.mxu1 %vm209_vm2, %v990_v46 }
 0x4bb   :  { %v4754_v47 = vpop.eup %4753  ;;  %4466 = vmatpush3.msra.mxu1 %v1160_v35  ;;  %4467 = vmatprep.mubr.msk.f32.mxu1 %vm4820_vm1, %v4819_v34 }
 0x4bc   :  { %4475 = vmatprep.subr.mxu1 %v4819_v34  ;;  %v1158_v48 = vmul.f32 %v4754_v47, %v4740_v16  ;;  %v4756_v49 = vpop.eup %4755 }
 0x4bd   :  { %v1330_v51 = vmul.f32 %v4756_v49, %v5114_v13 }
 0x4be   :  { %4468 = vmatmul.mubr.msk.f32.vlgmr.msra.gmra.mxu1 %vm209_vm2, %v1158_v48 }
 0x4bf   :  { %4476 = vmatpush3.msra.mxu1 %v1332_v50  ;;  %4477 = vmatprep.mubr.msk.f32.mxu1 %vm4820_vm1, %v4819_v34 }
 0x4c0   :  { %4485 = vmatprep.subr.mxu1 %v4819_v34 }
 0x4c2   :  { %4478 = vmatmul.mubr.msk.f32.vlgmr.msra.gmra.mxu1 %vm209_vm2, %v1330_v51 }
 0x4c3   :  { %v4758_v53 = vpop.eup %4757  ;;  %4486 = vmatpush3.msra.mxu1 %v1504_v52  ;;  %4487 = vmatprep.mubr.msk.f32.mxu1 %vm4820_vm1, %v4819_v34  ;;  %v4177_v52 = vld [vmem:[%s5630_s8] ss:$0 sm:$0xff] }
 0x4c4   :  { %v1502_v54 = vmul.f32 %v4758_v53, %v5119_v18 }
 0x4c6   :  { %4488 = vmatmul.mubr.msk.f32.vlgmr.msra.gmra.mxu1 %vm209_vm2, %v1502_v54  ;;  %v4178_v54 = vld [vmem:[%s5631_s9] ss:$0 sm:$0xff] }
 0x53d   :  { %v373_v55 = vpop.f32.mrf.mxu1 }
 0x53e   :  { %377 = vst.msk [vmem:[#allocation2] sm:$0xff] %vm209_vm2, %v373_v55 }
 0x53f   :  { %v4419_v56 = vpop.f32.mrf.mxu1 }
 0x541   :  { %v541_v57 = vpop.f32.mrf.mxu1 }
 0x542   :  { %546 = vrot.lane.b32.xlu0 %v541_v57, %s4832_s3 }
 0x543   :  { %v4429_v59 = vpop.f32.mrf.mxu1 }
 0x572   :  { %v714_v60 = vpop.f32.mrf.mxu1 }
 0x573   :  { %719 = vrot.lane.b32.xlu1 %v714_v60, %s4833_s22 }
 0x574   :  { %v4439_v61 = vpop.f32.mrf.mxu1 }
 0x576   :  { %v887_v62 = vpop.f32.mrf.mxu1 }
 0x577   :  { %892 = vrot.lane.b32.xlu1 %v887_v62, %s4834_s23  ;;  %v1834_v62 = vld [vmem:[%s5632_s12 + $0x38] sm:$0xff] }
 0x578   :  { %v4449_v63 = vpop.f32.mrf.mxu1  ;;  %4512 = vmatprep.subr.mxu0 %v1834_v62 }
 0x579   :  { %v1833_v63 = vld [vmem:[%s5632_s12 + $0x30] sm:$0xff] }
 0x57a   :  { %v1063_v0 = vpop.f32.mrf.mxu1 }
 0x57b   :  { %1067 = vst.msk [vmem:[#allocation2 + $0x8] sm:$0xff] %vm209_vm2, %v1063_v0  ;;  %v1832_v0 = vld [vmem:[%s5632_s12 + $0x28] sm:$0xff] }
 0x57c   :  { %v4459_v3 = vpop.f32.mrf.mxu1 }
 0x57d   :  { %v1829_v3 = vld [vmem:[%s5632_s12 + $0x10] sm:$0xff] }
 0x57e   :  { %v1231_v5 = vpop.f32.mrf.mxu1 }
 0x57f   :  { %1236 = vrot.lane.b32.xlu0 %v1231_v5, %s4832_s3  ;;  %v1827_v5 = vld [vmem:[%s5632_s12] sm:$0xff] }
 0x580   :  { %v4469_v38 = vpop.f32.mrf.mxu1 }
 0x582   :  { %v1403_v7 = vpop.f32.mrf.mxu1 }
 0x583   :  { %1408 = vrot.lane.b32.xlu0 %v1403_v7, %s4833_s22 }
 0x584   :  { %v4479_v8 = vpop.f32.mrf.mxu1 }
 0x586   :  { %v1575_v9 = vpop.f32.mrf.mxu1 }
 0x587   :  { %1580 = vrot.lane.b32.xlu1 %v1575_v9, %s4834_s23 }
 0x588   :  { %v4489_v10 = vpop.f32.mrf.mxu1 }
 0x5b4   :  { %v547_v11 = vpop.permute.xlu0 %546 }
 0x5b5   :  { %550 = vst.msk [vmem:[#allocation2] sm:$0xff] %vm549_vm3, %v547_v11 }
 0x5e5   :  { %v720_v12 = vpop.permute.xlu1 %719 }
 0x5e6   :  { %723 = vst.msk [vmem:[#allocation2] sm:$0xff] %vm722_vm4, %v720_v12 }
 0x5e9   :  { %v893_v13 = vpop.permute.xlu1 %892 }
 0x5ea   :  { %896 = vst.msk [vmem:[#allocation2] sm:$0xff] %vm895_vm5, %v893_v13 }
 0x5f1   :  { %v1237_v14 = vpop.permute.xlu0 %1236  ;;  %v1584_v16 = vld [vmem:[#allocation2] sm:$0xff] }
 0x5f2   :  { %1239 = vst.msk [vmem:[#allocation2 + $0x8] sm:$0xff] %vm549_vm3, %v1237_v14  ;;  %4498 = vmatprep.mubr.msk.f32.mxu0 %vm70_vm0, %v1584_v16 }
 0x5f5   :  { %v1409_v17 = vpop.permute.xlu0 %1408 }
 0x5f6   :  { %1411 = vst.msk [vmem:[#allocation2 + $0x8] sm:$0xff] %vm722_vm4, %v1409_v17 }
 0x5f9   :  { %v1581_v18 = vpop.permute.xlu1 %1580 }
 0x5fa   :  { %1583 = vst.msk [vmem:[#allocation2 + $0x8] sm:$0xff] %vm895_vm5, %v1581_v18 }
 0x601   :  { %v1585_v19 = vld [vmem:[#allocation2 + $0x8] sm:$0xff] }
 0x602   :  { %4499 = vmatmul.mubr.msk.f32.vlgmr.msra.gmra.mxu0 %vm70_vm0, %v1585_v19 }
 0x603   :  { %4513 = vmatpush3.msra.mxu0 %v1834_v62 }
 0x604   :  { %4514 = vmatprep.subr.mxu0 %v1833_v63 }
 0x605   :  { %4515 = vmatpush3.msra.mxu0 %v1833_v63 }
 0x606   :  { %4516 = vmatprep.subr.mxu0 %v1832_v0 }
 0x607   :  { %4517 = vmatpush3.msra.mxu0 %v1832_v0  ;;  %v4192_v0 = vld [vmem:[%s5670_s27 + $0x1] ss:$0 sm:$0xff]  ;;  %s5674_s27 = smov 72  }
 0x608   :  { %4518 = vmatprep.subr.mxu0 %v1831_v1 }
 0x609   :  { %4519 = vmatpush3.msra.mxu0 %v1831_v1 }
 0x60a   :  { %4520 = vmatprep.subr.mxu0 %v1830_v2 }
 0x60b   :  { %4521 = vmatpush3.msra.mxu0 %v1830_v2 }
 0x60c   :  { %4522 = vmatprep.subr.mxu0 %v1829_v3 }
 0x60d   :  { %4523 = vmatpush3.msra.mxu0 %v1829_v3 }
 0x60e   :  { %4524 = vmatprep.subr.mxu0 %v1828_v4 }
 0x60f   :  { %4525 = vmatpush3.msra.mxu0 %v1828_v4 }
 0x610   :  { %4526 = vmatprep.subr.mxu0 %v1827_v5 }
 0x611   :  { %4527 = vmatpush3.msra.mxu0 %v1827_v5 }
 0x612   :  { %4552 = vmatprep.subr.mxu0 %v4819_v34 }
 0x6c2   :  { %v4500_v21 = vpop.f32.mrf.mxu0 }
 0x6c3   :  { %v1675_v22 = vadd.f32 %v4500_v21, %v4174_v20  ;;  %v4182_v21 = vld [vmem:[%s5634_s13] ss:$0 sm:$0xff] }
 0x6c4   :  { %v1669_v23 = vpop.f32.mrf.mxu0 }
 0x6c5   :  { %v1670_v24 = vadd.f32 %v4174_v20, %v1669_v23  ;;  %v1679_v25 = vadd.f32 %v1675_v22, %v4972_v33 }
 0x6c7   :  { %v1685_v26 = vsel %vm70_vm0, %v1679_v25, 0.0  ;;  %v1678_v27 = vadd.f32 %v1670_v24, %v4968_v31  ;;  %v1727_v31 = vld [vmem:[%s5629_s10 + $0x18] sm:$0xff] }
 0x6c8   :  { %1686 = vadd.xlane.f32.xlu1 %v1685_v26  ;;  %4501 = vmatprep.subr.mxu1 %v1727_v31 }
 0x6c9   :  { %v1682_v28 = vsel %vm70_vm0, %v1678_v27, 0.0  ;;  %4502 = vmatpush3.msra.mxu1 %v1727_v31 }
 0x6ca   :  { %1683 = vadd.xlane.f32.xlu0 %v1682_v28  ;;  %4503 = vmatprep.subr.mxu1 %v1726_v42 }
 0x6cb   :  { %4504 = vmatpush3.msra.mxu1 %v1726_v42  ;;  %v4190_v42 = vld [vmem:[%s5667_s26 + $0x38] sm:$0xff] }
 0x6cc   :  { %4505 = vmatprep.subr.mxu1 %v1725_v43 }
 0x6cd   :  { %4506 = vmatpush3.msra.mxu1 %v1725_v43  ;;  %v4189_v43 = vld [vmem:[%s5667_s26 + $0x30] sm:$0xff] }
 0x6ce   :  { %4507 = vmatprep.subr.mxu1 %v1724_v44 }
 0x6cf   :  { %4508 = vmatpush3.msra.mxu1 %v1724_v44  ;;  %v4188_v44 = vld [vmem:[%s5667_s26 + $0x28] sm:$0xff] }
 0x6d0   :  { %4531 = vmatprep.subr.mxu1 %v4190_v42 }
 0x751   :  { %v1687_v39 = vpop.xlane.xlu1 %1686 }
 0x752   :  { %v1689_v29 = vmul.f32 0.03125, %v1687_v39 }
 0x753   :  { %v1684_v30 = vpop.xlane.xlu0 %1683 }
 0x754   :  { %v1688_v32 = vmul.f32 0.03125, %v1684_v30  ;;  %v1691_v35 = vsub.f32 %v1679_v25, %v1689_v29 }
 0x756   :  { %v1690_v36 = vsub.f32 %v1678_v27, %v1688_v32  ;;  %v1693_v41 = vmul.f32 %v1691_v35, %v1691_v35 }
 0x758   :  { %v1692_v37 = vmul.f32 %v1690_v36, %v1690_v36  ;;  %v1697_v33 = vsel %vm70_vm0, %v1693_v41, 0.0 }
 0x75a   :  { %v1694_v40 = vsel %vm70_vm0, %v1692_v37, 0.0 }
 0x75b   :  { %1695 = vadd.xlane.f32.xlu0 %v1694_v40 }
 0x75f   :  { %1698 = vadd.xlane.f32.xlu0 %v1697_v33 }
 0x7e4   :  { %v1696_v45 = vpop.xlane.xlu0 %1695 }
 0x7e5   :  { %v1700_v46 = vmul.f32 0.03125, %v1696_v45  ;;  %v4187_v45 = vld [vmem:[%s5667_s26 + $0x20] sm:$0xff] }
 0x7e7   :  { %v1702_v47 = vadd.f32 1e-12, %v1700_v46 }
 0x7e8   :  { %v1699_v48 = vpop.xlane.xlu0 %1698 }
 0x7e9   :  { %4759 = vrsqrt.f32 %v1702_v47  ;;  %v1701_v49 = vmul.f32 0.03125, %v1699_v48 }
 0x7eb   :  { %v1703_v50 = vadd.f32 1e-12, %v1701_v49 }
 0x7ed   :  { %4761 = vrsqrt.f32 %v1703_v50 }
 0x7f6   :  { %v4760_v51 = vpop.eup %4759 }
 0x7f7   :  { %v1706_v53 = vmul.f32 %v4760_v51, %v1690_v36 }
 0x7f9   :  { %v1714_v55 = vmul.f32 %v4177_v52, %v1706_v53  ;;  %v4185_v53 = vld [vmem:[%s5635_s14] ss:$0 sm:$0xff] }
 0x7fa   :  { %v4762_v56 = vpop.eup %4761 }
 0x7fb   :  { %v1707_v57 = vmul.f32 %v4762_v56, %v1691_v35  ;;  %v1722_v59 = vadd.f32 %v4178_v54, %v1714_v55 }
 0x7fd   :  { %v1715_v60 = vmul.f32 %v4177_v52, %v1707_v57  ;;  %4509 = vmatprep.mubr.msk.f32.mxu1 %vm70_vm0, %v1722_v59 }
 0x7ff   :  { %v1723_v61 = vadd.f32 %v4178_v54, %v1715_v60 }
 0x801   :  { %4510 = vmatmul.mubr.msk.f32.vlgmr.msra.gmra.mxu1 %vm70_vm0, %v1723_v61 }
 0x802   :  { %4532 = vmatpush3.msra.mxu1 %v4190_v42 }
 0x803   :  { %4533 = vmatprep.subr.mxu1 %v4189_v43 }
 0x804   :  { %4534 = vmatpush3.msra.mxu1 %v4189_v43 }
 0x805   :  { %4535 = vmatprep.subr.mxu1 %v4188_v44 }
 0x806   :  { %4536 = vmatpush3.msra.mxu1 %v4188_v44 }
 0x807   :  { %4537 = vmatprep.subr.mxu1 %v4187_v45 }
 0x808   :  { %4538 = vmatpush3.msra.mxu1 %v4187_v45 }
 0x809   :  { %4542 = vmatprep.subr.mxu1 %v4819_v34 }
 0x8c1   :  { %v4511_v38 = vpop.f32.mrf.mxu1 }
 0x8c2   :  { %v1813_v7 = vadd.f32 %v4511_v38, %v4179_v6 }
 0x8c3   :  { %v1807_v8 = vpop.f32.mrf.mxu1 }
 0x8c4   :  { %v1820_v9 = vmul.f32 0.70710677, %v1813_v7  ;;  %v1808_v10 = vadd.f32 %v4179_v6, %v1807_v8  ;;  %v1817_v18 = vmul.f32 0.5, %v1813_v7 }
 0x8c6   :  { %4763 = verf.f32 %v1820_v9  ;;  %v1819_v11 = vmul.f32 0.70710677, %v1808_v10  ;;  %v1816_v16 = vmul.f32 0.5, %v1808_v10 }
 0x8c8   :  { %4765 = verf.f32 %v1819_v11 }
 0x8d3   :  { %v4764_v12 = vpop.eup %4763 }
 0x8d4   :  { %v1824_v14 = vadd.f32 1.0, %v4764_v12 }
 0x8d5   :  { %v4766_v13 = vpop.eup %4765 }
 0x8d6   :  { %v1823_v17 = vadd.f32 1.0, %v4766_v13  ;;  %v1826_v20 = vmul.f32 %v1824_v14, %v1817_v18 }
 0x8d8   :  { %v1825_v19 = vmul.f32 %v1823_v17, %v1816_v16 }
 0x8da   :  { %4528 = vmatprep.mubr.msk.f32.mxu0 %vm1842_vm6, %v1825_v19 }
 0x8db   :  { %4529 = vmatmul.mubr.msk.f32.vlgmr.msra.gmra.mxu0 %vm1842_vm6, %v1826_v20 }
 0x8dc   :  { %4554 = vmatprep.mubr.msk.f32.mxu0 %vm4820_vm1, %v4819_v34 }
 0x99b   :  { %v4530_v22 = vpop.f32.mrf.mxu0 }
 0x99c   :  { %v1921_v23 = vadd.f32 %v4530_v22, %v4182_v21 }
 0x99d   :  { %v1915_v24 = vpop.f32.mrf.mxu0 }
 0x99e   :  { %v1916_v25 = vadd.f32 %v4182_v21, %v1915_v24  ;;  %v1925_v26 = vadd.f32 %v1921_v23, %v1723_v61 }
 0x9a0   :  { %v1931_v27 = vsel %vm70_vm0, %v1925_v26, 0.0  ;;  %v1924_v28 = vadd.f32 %v1916_v25, %v1722_v59  ;;  %v4186_v59 = vld [vmem:[%s5636_s15] ss:$0 sm:$0xff] }
 0x9a1   :  { %1932 = vadd.xlane.f32.xlu1 %v1931_v27 }
 0x9a2   :  { %v1928_v39 = vsel %vm70_vm0, %v1924_v28, 0.0 }
 0x9a3   :  { %1929 = vadd.xlane.f32.xlu0 %v1928_v39 }
 0xa2a   :  { %v1933_v29 = vpop.xlane.xlu1 %1932 }
 0xa2b   :  { %v1935_v30 = vmul.f32 0.03125, %v1933_v29 }
 0xa2c   :  { %v1930_v32 = vpop.xlane.xlu0 %1929 }
 0xa2d   :  { %v1937_v35 = vsub.f32 %v1925_v26, %v1935_v30  ;;  %v1934_v36 = vmul.f32 0.03125, %v1930_v32 }
 0xa2f   :  { %v1936_v37 = vsub.f32 %v1924_v28, %v1934_v36  ;;  %v1939_v40 = vmul.f32 %v1937_v35, %v1937_v35 }
 0xa31   :  { %v1943_v41 = vsel %vm70_vm0, %v1939_v40, 0.0  ;;  %v1938_v33 = vmul.f32 %v1936_v37, %v1936_v37 }
 0xa32   :  { %1944 = vadd.xlane.f32.xlu1 %v1943_v41 }
 0xa33   :  { %v1940_v31 = vsel %vm70_vm0, %v1938_v33, 0.0 }
 0xa34   :  { %1941 = vadd.xlane.f32.xlu0 %v1940_v31 }
 0xabb   :  { %v1945_v46 = vpop.xlane.xlu1 %1944 }
 0xabc   :  { %v1947_v47 = vmul.f32 0.03125, %v1945_v46 }
 0xabd   :  { %v1942_v48 = vpop.xlane.xlu0 %1941 }
 0xabe   :  { %v1949_v49 = vadd.f32 1e-12, %v1947_v47  ;;  %v1946_v50 = vmul.f32 0.03125, %v1942_v48 }
 0xac0   :  { %4767 = vrsqrt.f32 %v1949_v49  ;;  %v1948_v51 = vadd.f32 1e-12, %v1946_v50 }
 0xac2   :  { %4769 = vrsqrt.f32 %v1948_v51 }
 0xacd   :  { %v4768_v52 = vpop.eup %4767 }
 0xace   :  { %v1953_v54 = vmul.f32 %v4768_v52, %v1937_v35 }
 0xacf   :  { %v4770_v55 = vpop.eup %4769 }
 0xad0   :  { %v1952_v56 = vmul.f32 %v4770_v55, %v1936_v37  ;;  %v1961_v57 = vmul.f32 %v4185_v53, %v1953_v54 }
 0xad2   :  { %v1960_v60 = vmul.f32 %v4185_v53, %v1952_v56  ;;  %v5277_v62 = vadd.f32 %v4186_v59, %v1961_v57 }
 0xad4   :  { %v5275_v61 = vadd.f32 %v4186_v59, %v1960_v60 }
 0xad6   :  { %4539 = vmatprep.mubr.msk.f32.mxu1 %vm70_vm0, %v5275_v61 }
 0xad7   :  { %4540 = vmatmul.mubr.msk.f32.vlgmr.msra.gmra.mxu1 %vm70_vm0, %v5277_v62 }
 0xad8   :  { %4544 = vmatprep.mubr.msk.f32.mxu1 %vm4820_vm1, %v4819_v34 }
 0xb97   :  { %v4541_v63 = vpop.f32.mrf.mxu1 }
 0xb98   :  { %v5302_v3 = vadd.f32 %v4541_v63, %v4192_v0 }
 0xb99   :  { %v2055_v1 = vpop.f32.mrf.mxu1 }
 0xb9a   :  { %v5288_v2 = vadd.f32 %v4192_v0, %v2055_v1 }
 0xb9c   :  { %2233 = vrot.lane.b32.xlu1 %v5288_v2, %s4821_s28  ;;  %2065 = vrot.lane.b32.xlu0 %v5288_v2, %s4822_s5 }
 0xba0   :  { %2231 = vrot.lane.b32.xlu1 %v5288_v2, %s4823_s29  ;;  %2403 = vrot.lane.b32.xlu0 %v5288_v2, %s5671_s25 }
 0xba4   :  { %2405 = vrot.lane.b32.xlu1 %v5288_v2, %s5672_s30  ;;  %2575 = vrot.lane.b32.xlu0 %v5288_v2, %s5673_s0 }
 0xba8   :  { %2577 = vrot.lane.b32.xlu1 %v5288_v2, %s5674_s27  ;;  %2916 = vrot.lane.b32.xlu0 %v5302_v3, %s4821_s28  ;;  %s5675_s28 = smov 64  }
 0xbac   :  { %2748 = vrot.lane.b32.xlu1 %v5302_v3, %s4822_s5  ;;  %3088 = vrot.lane.b32.xlu0 %v5302_v3, %s5672_s30  ;;  %s5676_s5 = smov 48  }
 0xbb0   :  { %2914 = vrot.lane.b32.xlu1 %v5302_v3, %s4823_s29  ;;  %3260 = vrot.lane.b32.xlu0 %v5302_v3, %s5674_s27  ;;  %s5677_s29 = smov 40  }
 0xbb4   :  { %3086 = vrot.lane.b32.xlu1 %v5302_v3, %s5671_s25 }
 0xbb8   :  { %3258 = vrot.lane.b32.xlu1 %v5302_v3, %s5673_s0 }
 0xc0e   :  { %v2234_v4 = vpop.permute.xlu1 %2233  ;;  %v2066_v5 = vpop.permute.xlu0 %2065 }
 0xc0f   :  { %4543 = vmatpush3.xpose.msk.msra.mxu1 %vm209_vm2, %v2066_v5  ;;  %4553 = vmatpush3.xpose.msk.msra.mxu0 %vm209_vm2, %v2234_v4 }
 0xc10   :  { %4562 = vmatprep.subr.mxu0 %v4819_v34  ;;  %4547 = vmatprep.subr.mxu1 %v4819_v34 }
 0xc12   :  { %v2232_v6 = vpop.permute.xlu1 %2231  ;;  %4545 = vmatmul.mubr.msk.f32.vlgmr.msra.gmra.mxu1 %vm209_vm2, %v5288_v2  ;;  %v2404_v38 = vpop.permute.xlu0 %2403 }
 0xc13   :  { %4555 = vmatmul.mubr.msk.f32.vlgmr.msra.gmra.mxu0 %vm209_vm2, %v2232_v6  ;;  %4549 = vmatprep.mubr.msk.f32.mxu1 %vm4820_vm1, %v4819_v34 }
 0xc14   :  { %4564 = vmatprep.mubr.msk.f32.mxu0 %vm4820_vm1, %v4819_v34 }
 0xc16   :  { %v2406_v7 = vpop.permute.xlu1 %2405  ;;  %v2576_v8 = vpop.permute.xlu0 %2575 }
 0xc17   :  { %4563 = vmatpush3.xpose.msk.msra.mxu0 %vm209_vm2, %v2406_v7 }
 0xc18   :  { %4572 = vmatprep.subr.mxu0 %v4819_v34 }
 0xc1a   :  { %v2578_v9 = vpop.permute.xlu1 %2577  ;;  %4565 = vmatmul.mubr.msk.f32.vlgmr.msra.gmra.mxu0 %vm209_vm2, %v2404_v38  ;;  %v2917_v10 = vpop.permute.xlu0 %2916 }
 0xc1b   :  { %4573 = vmatpush3.xpose.msk.msra.mxu0 %vm209_vm2, %v2578_v9  ;;  %4574 = vmatprep.mubr.msk.f32.mxu0 %vm4820_vm1, %v4819_v34 }
 0xc1c   :  { %4582 = vmatprep.subr.mxu0 %v4819_v34 }
 0xc1e   :  { %v2749_v11 = vpop.permute.xlu1 %2748  ;;  %4575 = vmatmul.mubr.msk.f32.vlgmr.msra.gmra.mxu0 %vm209_vm2, %v2576_v8  ;;  %v3089_v13 = vpop.permute.xlu0 %3088 }
 0xc1f   :  { %4583 = vmatpush3.xpose.msk.msra.mxu0 %vm209_vm2, %v2749_v11  ;;  %4584 = vmatprep.mubr.msk.f32.mxu0 %vm4820_vm1, %v4819_v34 }
 0xc20   :  { %4592 = vmatprep.subr.mxu0 %v4819_v34 }
 0xc22   :  { %v2915_v12 = vpop.permute.xlu1 %2914  ;;  %4585 = vmatmul.mubr.msk.f32.vlgmr.msra.gmra.mxu0 %vm209_vm2, %v5302_v3  ;;  %v3261_v16 = vpop.permute.xlu0 %3260 }
 0xc23   :  { %4593 = vmatpush3.xpose.msk.msra.mxu0 %vm209_vm2, %v2917_v10  ;;  %4594 = vmatprep.mubr.msk.f32.mxu0 %vm4820_vm1, %v4819_v34 }
 0xc24   :  { %4602 = vmatprep.subr.mxu0 %v4819_v34 }
 0xc26   :  { %4595 = vmatmul.mubr.msk.f32.vlgmr.msra.gmra.mxu0 %vm209_vm2, %v2915_v12  ;;  %v3087_v14 = vpop.permute.xlu1 %3086 }
 0xc27   :  { %4603 = vmatpush3.xpose.msk.msra.mxu0 %vm209_vm2, %v3089_v13  ;;  %4604 = vmatprep.mubr.msk.f32.mxu0 %vm4820_vm1, %v4819_v34 }
 0xc28   :  { %4612 = vmatprep.subr.mxu0 %v4819_v34 }
 0xc2a   :  { %4605 = vmatmul.mubr.msk.f32.vlgmr.msra.gmra.mxu0 %vm209_vm2, %v3087_v14  ;;  %v3259_v17 = vpop.permute.xlu1 %3258 }
 0xc2b   :  { %4613 = vmatpush3.xpose.msk.msra.mxu0 %vm209_vm2, %v3261_v16  ;;  %4614 = vmatprep.mubr.msk.f32.mxu0 %vm4820_vm1, %v4819_v34 }
 0xc2e   :  { %4615 = vmatmul.mubr.msk.f32.vlgmr.msra.gmra.mxu0 %vm209_vm2, %v3259_v17 }
 0xcd2   :  { %v2137_v18 = vpop.f32.mrf.mxu1 }
 0xcd3   :  { %v2141_v19 = vmul.f32 0.35355338, %v2137_v18  ;;  %v2305_v20 = vpop.f32.mrf.mxu0 }
 0xcd4   :  { %v2309_v21 = vmul.f32 0.35355338, %v2305_v20  ;;  %v4546_v22 = vpop.f32.mrf.mxu1 }
 0xcd5   :  { %v4556_v23 = vpop.f32.mrf.mxu0  ;;  %v2142_v24 = vadd.f32 %v2141_v19, %v5059_v58 }
 0xcd6   :  { %v2310_v25 = vadd.f32 %v2309_v21, %v5059_v58 }
 0xcd7   :  { %v2143_v26 = vsel %vm209_vm2, %v2142_v24, -inf }
 0xcd8   :  { %2144 = vmax.xlane.f32.xlu0 %v2143_v26  ;;  %v2311_v27 = vsel %vm209_vm2, %v2310_v25, -inf }
 0xcd9   :  { %2312 = vmax.xlane.f32.xlu1 %v2311_v27 }
 0xcda   :  { %v2477_v28 = vpop.f32.mrf.mxu0 }
 0xcdb   :  { %v2481_v39 = vmul.f32 0.35355338, %v2477_v28 }
 0xcdc   :  { %v4566_v29 = vpop.f32.mrf.mxu0 }
 0xcdd   :  { %v5364_v30 = vadd.f32 %v2481_v39, %v5059_v58 }
 0xcde   :  { %v2649_v32 = vpop.f32.mrf.mxu0 }
 0xcdf   :  { %v2653_v35 = vmul.f32 0.35355338, %v2649_v32  ;;  %v2483_v36 = vsel %vm209_vm2, %v5364_v30, -inf }
 0xce0   :  { %2484 = vmax.xlane.f32.xlu0 %v2483_v36  ;;  %v4576_v37 = vpop.f32.mrf.mxu0 }
 0xce1   :  { %v2654_v40 = vadd.f32 %v2653_v35, %v5059_v58 }
 0xce2   :  { %v2820_v41 = vpop.f32.mrf.mxu0 }
 0xce3   :  { %v2824_v33 = vmul.f32 0.35355338, %v2820_v41  ;;  %v2655_v31 = vsel %vm209_vm2, %v2654_v40, -inf }
 0xce4   :  { %2656 = vmax.xlane.f32.xlu0 %v2655_v31  ;;  %v4586_v42 = vpop.f32.mrf.mxu0 }
 0xce5   :  { %v2825_v43 = vadd.f32 %v2824_v33, %v5071_v15 }
 0xce6   :  { %v2988_v44 = vpop.f32.mrf.mxu0 }
 0xce7   :  { %v2992_v45 = vmul.f32 0.35355338, %v2988_v44  ;;  %v2826_v46 = vsel %vm209_vm2, %v2825_v43, -inf }
 0xce8   :  { %2827 = vmax.xlane.f32.xlu0 %v2826_v46  ;;  %v4596_v47 = vpop.f32.mrf.mxu0 }
 0xce9   :  { %v2993_v48 = vadd.f32 %v2992_v45, %v5071_v15 }
 0xcea   :  { %v3160_v49 = vpop.f32.mrf.mxu0 }
 0xceb   :  { %v3164_v50 = vmul.f32 0.35355338, %v3160_v49  ;;  %v2994_v58 = vsel %vm209_vm2, %v2993_v48, -inf }
 0xcec   :  { %2995 = vmax.xlane.f32.xlu1 %v2994_v58  ;;  %v4606_v51 = vpop.f32.mrf.mxu0 }
 0xced   :  { %v3165_v52 = vadd.f32 %v3164_v50, %v5071_v15 }
 0xcee   :  { %v3332_v53 = vpop.f32.mrf.mxu0 }
 0xcef   :  { %v3166_v54 = vsel %vm209_vm2, %v3165_v52, -inf  ;;  %v3336_v56 = vmul.f32 0.35355338, %v3332_v53 }
 0xcf0   :  { %3167 = vmax.xlane.f32.xlu0 %v3166_v54  ;;  %v4616_v55 = vpop.f32.mrf.mxu0 }
 0xcf1   :  { %v3337_v57 = vadd.f32 %v3336_v56, %v5071_v15 }
 0xcf3   :  { %v3338_v59 = vsel %vm209_vm2, %v3337_v57, -inf }
 0xcfd   :  { %2154 = vrot.lane.b32.xlu1 %v5288_v2, %s5675_s28 }
 0xd21   :  { %3339 = vmax.xlane.f32.xlu1 %v3338_v59 }
 0xd32   :  { %2494 = vrot.lane.b32.xlu1 %v5288_v2, %s5676_s5 }
 0xd36   :  { %2666 = vrot.lane.b32.xlu1 %v5288_v2, %s5677_s29 }
 0xd3a   :  { %2837 = vrot.lane.b32.xlu1 %v5302_v3, %s5675_s28 }
 0xd61   :  { %v2145_v60 = vpop.xlane.xlu0 %2144 }
 0xd62   :  { %v2146_v63 = vsub.f32 %v2142_v24, %v2145_v60  ;;  %v2313_v0 = vpop.xlane.xlu1 %2312 }
 0xd63   :  { %v2314_v1 = vsub.f32 %v2310_v25, %v2313_v0 }
 0xd64   :  { %v2147_v4 = vmul.f32 1.442695, %v2146_v63 }
 0xd65   :  { %v2315_v5 = vmul.f32 1.442695, %v2314_v1 }
 0xd66   :  { %4771 = vpow2.f32 %v2147_v4 }
 0xd67   :  { %4773 = vpow2.f32 %v2315_v5 }
 0xd69   :  { %v2485_v15 = vpop.xlane.xlu0 %2484 }
 0xd6a   :  { %v2486_v17 = vsub.f32 %v5364_v30, %v2485_v15 }
 0xd6c   :  { %v2487_v19 = vmul.f32 1.442695, %v2486_v17 }
 0xd6d   :  { %v2657_v6 = vpop.xlane.xlu0 %2656 }
 0xd6e   :  { %v2658_v38 = vsub.f32 %v2654_v40, %v2657_v6 }
 0xd70   :  { %v2659_v7 = vmul.f32 1.442695, %v2658_v38 }
 0xd71   :  { %v2828_v18 = vpop.xlane.xlu0 %2827 }
 0xd72   :  { %4775 = vpow2.f32 %v2659_v7  ;;  %v2829_v20 = vsub.f32 %v2825_v43, %v2828_v18 }
 0xd73   :  { %v4772_v8 = vpop.eup %4771  ;;  %4777 = vpow2.f32 %v2487_v19  ;;  %v4222_v19 = vld [vmem:[%s5627_s6 + $0x38] sm:$0xff] }
 0xd74   :  { %v5386_v9 = vpop.eup %4773  ;;  %v2149_v10 = vsel %vm209_vm2, %v4772_v8, 0.0  ;;  %v2830_v22 = vmul.f32 1.442695, %v2829_v20  ;;  %v4221_v20 = vld [vmem:[%s5627_s6 + $0x30] sm:$0xff]  ;;  %4622 = vmatprep.subr.mxu0 %v4222_v19 }
 0xd75   :  { %v2996_v11 = vpop.xlane.xlu1 %2995  ;;  %2150 = vadd.xlane.f32.xlu0 %v2149_v10  ;;  %v2317_v12 = vsel %vm209_vm2, %v5386_v9, 0.0  ;;  %4623 = vmatpush3.msra.mxu0 %v4222_v19  ;;  %v4241_v19 = vld [vmem:[%s5632_s12 + $0x50] sm:$0xff] }
 0xd76   :  { %2318 = vadd.xlane.f32.xlu1 %v2317_v12  ;;  %4779 = vpow2.f32 %v2830_v22  ;;  %v2997_v24 = vsub.f32 %v2993_v48, %v2996_v11  ;;  %v4220_v22 = vld [vmem:[%s5627_s6 + $0x28] sm:$0xff]  ;;  %4624 = vmatprep.subr.mxu0 %v4221_v20 }
 0xd77   :  { %4625 = vmatpush3.msra.mxu0 %v4221_v20  ;;  %v4240_v20 = vld [vmem:[%s5632_s12 + $0x48] sm:$0xff] }
 0xd78   :  { %v2998_v26 = vmul.f32 1.442695, %v2997_v24  ;;  %v4219_v24 = vld [vmem:[%s5627_s6 + $0x20] sm:$0xff]  ;;  %4626 = vmatprep.subr.mxu0 %v4220_v22 }
 0xd79   :  { %v2155_v13 = vpop.permute.xlu1 %2154  ;;  %v3168_v21 = vpop.xlane.xlu0 %3167  ;;  %4627 = vmatpush3.msra.mxu0 %v4220_v22  ;;  %v4236_v22 = vld [vmem:[%s5633_s11 + $0x1] ss:$0 sm:$0xff] }
 0xd7a   :  { %4548 = vmatpush3.msra.mxu1 %v2155_v13  ;;  %v3169_v23 = vsub.f32 %v3165_v52, %v3168_v21  ;;  %4628 = vmatprep.subr.mxu0 %v4219_v24 }
 0xd7b   :  { %4557 = vmatprep.subr.mxu1 %v4819_v34  ;;  %4629 = vmatpush3.msra.mxu0 %v4219_v24 }
 0xd7c   :  { %v3170_v25 = vmul.f32 1.442695, %v3169_v23 }
 0xd7e   :  { %4781 = vpow2.f32 %v3170_v25 }
 0xd7f   :  { %v5392_v14 = vpop.eup %4775  ;;  %4783 = vpow2.f32 %v2998_v26 }
 0xd80   :  { %v2661_v16 = vsel %vm209_vm2, %v5392_v14, 0.0  ;;  %v4778_v27 = vpop.eup %4777 }
 0xd81   :  { %2662 = vadd.xlane.f32.xlu1 %v2661_v16 }
 0xd83   :  { %v5402_v28 = vpop.eup %4779 }
 0xd84   :  { %v2832_v32 = vsel %vm209_vm2, %v5402_v28, 0.0 }
 0xd8b   :  { %2322 = vrot.lane.b32.xlu0 %v5288_v2, %s5678_s21  ;;  %v2489_v2 = vsel %vm209_vm2, %v4778_v27, 0.0  ;;  %v5406_v35 = vpop.eup %4781 }
 0xd8c   :  { %v3172_v36 = vsel %vm209_vm2, %v5406_v35, 0.0  ;;  %v4784_v37 = vpop.eup %4783 }
 0xd8d   :  { %v3000_v40 = vsel %vm209_vm2, %v4784_v37, 0.0 }
 0xd92   :  { %3005 = vrot.lane.b32.xlu1 %v5302_v3, %s5678_s21 }
 0xdaa   :  { %v3340_v39 = vpop.xlane.xlu1 %3339  ;;  %2490 = vadd.xlane.f32.xlu0 %v2489_v2 }
 0xdab   :  { %v3341_v29 = vsub.f32 %v3337_v57, %v3340_v39 }
 0xdad   :  { %v3342_v30 = vmul.f32 1.442695, %v3341_v29 }
 0xdae   :  { %2833 = vadd.xlane.f32.xlu0 %v2832_v32  ;;  %v2495_v31 = vpop.permute.xlu1 %2494 }
 0xdaf   :  { %4785 = vpow2.f32 %v3342_v30 }
 0xdb2   :  { %3173 = vadd.xlane.f32.xlu0 %v3172_v36  ;;  %v2667_v42 = vpop.permute.xlu1 %2666 }
 0xdb6   :  { %3001 = vadd.xlane.f32.xlu1 %v3000_v40  ;;  %v2838_v43 = vpop.permute.xlu1 %2837 }
 0xdbc   :  { %v5411_v41 = vpop.eup %4785 }
 0xdbd   :  { %v3344_v33 = vsel %vm209_vm2, %v5411_v41, 0.0 }
 0xdbe   :  { %3345 = vadd.xlane.f32.xlu0 %v3344_v33 }
 0xdc7   :  { %3349 = vrot.lane.b32.xlu1 %v5302_v3, %s5677_s29 }
 0xdd4   :  { %3177 = vrot.lane.b32.xlu0 %v5302_v3, %s5676_s5 }
 0xdfe   :  { %v2151_v44 = vpop.xlane.xlu0 %2150 }
 0xdff   :  { %4787 = vrcp.f32 %v2151_v44  ;;  %v2319_v45 = vpop.xlane.xlu1 %2318 }
 0xe00   :  { %4789 = vrcp.f32 %v2319_v45 }
 0xe02   :  { %v2323_v49 = vpop.permute.xlu0 %2322 }
 0xe0a   :  { %v2663_v50 = vpop.xlane.xlu1 %2662 }
 0xe0c   :  { %v4788_v46 = vpop.eup %4787 }
 0xe0d   :  { %v2153_v47 = vmul.f32 %v4788_v46, %v4772_v8  ;;  %v4790_v48 = vpop.eup %4789 }
 0xe0e   :  { %v2321_v3 = vmul.f32 %v4790_v48, %v5386_v9  ;;  %v3006_v52 = vpop.permute.xlu1 %3005 }
 0xe0f   :  { %4550 = vmatmul.mubr.msk.f32.vlgmr.msra.gmra.mxu1 %vm209_vm2, %v2153_v47 }
 0xe10   :  { %4558 = vmatpush3.msra.mxu1 %v2323_v49  ;;  %4559 = vmatprep.mubr.msk.f32.mxu1 %vm4820_vm1, %v4819_v34 }
 0xe11   :  { %4567 = vmatprep.subr.mxu1 %v4819_v34 }
 0xe13   :  { %4560 = vmatmul.mubr.msk.f32.vlgmr.msra.gmra.mxu1 %vm209_vm2, %v2321_v3 }
 0xe14   :  { %4568 = vmatpush3.msra.mxu1 %v2495_v31  ;;  %4569 = vmatprep.mubr.msk.f32.mxu1 %vm4820_vm1, %v4819_v34 }
 0xe15   :  { %4577 = vmatprep.subr.mxu1 %v4819_v34 }
 0xe33   :  { %v2491_v58 = vpop.xlane.xlu0 %2490 }
 0xe34   :  { %4791 = vrcp.f32 %v2491_v58 }
 0xe35   :  { %4793 = vrcp.f32 %v2663_v50 }
 0xe37   :  { %v2834_v51 = vpop.xlane.xlu0 %2833 }
 0xe38   :  { %4795 = vrcp.f32 %v2834_v51 }
 0xe3b   :  { %v3174_v53 = vpop.xlane.xlu0 %3173 }
 0xe3f   :  { %v3002_v54 = vpop.xlane.xlu1 %3001 }
 0xe40   :  { %4797 = vrcp.f32 %v3002_v54 }
 0xe41   :  { %v4792_v55 = vpop.eup %4791  ;;  %4799 = vrcp.f32 %v3174_v53 }
 0xe42   :  { %v2493_v56 = vmul.f32 %v4792_v55, %v4778_v27  ;;  %v4794_v57 = vpop.eup %4793  ;;  %v4233_v55 = vld [vmem:[%s5629_s10 + $0x30] sm:$0xff] }
 0xe43   :  { %v2665_v59 = vmul.f32 %v4794_v57, %v5392_v14  ;;  %v3350_v38 = vpop.permute.xlu1 %3349  ;;  %v4231_v57 = vld [vmem:[%s5629_s10 + $0x20] sm:$0xff] }
 0xe44   :  { %4570 = vmatmul.mubr.msk.f32.vlgmr.msra.gmra.mxu1 %vm209_vm2, %v2493_v56  ;;  %v4232_v56 = vld [vmem:[%s5629_s10 + $0x28] sm:$0xff] }
 0xe45   :  { %4578 = vmatpush3.msra.mxu1 %v2667_v42  ;;  %4579 = vmatprep.mubr.msk.f32.mxu1 %vm4820_vm1, %v4819_v34  ;;  %v4796_v60 = vpop.eup %4795 }
 0xe46   :  { %4587 = vmatprep.subr.mxu1 %v4819_v34  ;;  %v2836_v0 = vmul.f32 %v4796_v60, %v5402_v28 }
 0xe47   :  { %v3346_v63 = vpop.xlane.xlu0 %3345 }
 0xe48   :  { %4801 = vrcp.f32 %v3346_v63  ;;  %4580 = vmatmul.mubr.msk.f32.vlgmr.msra.gmra.mxu1 %vm209_vm2, %v2665_v59 }
 0xe49   :  { %4588 = vmatpush3.msra.mxu1 %v2838_v43  ;;  %4589 = vmatprep.mubr.msk.f32.mxu1 %vm4820_vm1, %v4819_v34 }
 0xe4a   :  { %4597 = vmatprep.subr.mxu1 %v4819_v34 }
 0xe4b   :  { %v3178_v15 = vpop.permute.xlu0 %3177 }
 0xe4c   :  { %4590 = vmatmul.mubr.msk.f32.vlgmr.msra.gmra.mxu1 %vm209_vm2, %v2836_v0 }
 0xe4d   :  { %v4798_v1 = vpop.eup %4797  ;;  %4598 = vmatpush3.msra.mxu1 %v3006_v52  ;;  %4599 = vmatprep.mubr.msk.f32.mxu1 %vm4820_vm1, %v4819_v34 }
 0xe4e   :  { %4607 = vmatprep.subr.mxu1 %v4819_v34  ;;  %v3004_v4 = vmul.f32 %v4798_v1, %v4784_v37  ;;  %v4800_v5 = vpop.eup %4799 }
 0xe4f   :  { %v3176_v6 = vmul.f32 %v4800_v5, %v5406_v35 }
 0xe50   :  { %4600 = vmatmul.mubr.msk.f32.vlgmr.msra.gmra.mxu1 %vm209_vm2, %v3004_v4 }
 0xe51   :  { %4608 = vmatpush3.msra.mxu1 %v3178_v15  ;;  %4609 = vmatprep.mubr.msk.f32.mxu1 %vm4820_vm1, %v4819_v34  ;;  %v4229_v15 = vld [vmem:[%s5630_s8 + $0x1] ss:$0 sm:$0xff] }
 0xe52   :  { %4617 = vmatprep.subr.mxu1 %v4819_v34 }
 0xe54   :  { %4610 = vmatmul.mubr.msk.f32.vlgmr.msra.gmra.mxu1 %vm209_vm2, %v3176_v6 }
 0xe55   :  { %v4802_v7 = vpop.eup %4801  ;;  %4618 = vmatpush3.msra.mxu1 %v3350_v38  ;;  %4619 = vmatprep.mubr.msk.f32.mxu1 %vm4820_vm1, %v4819_v34  ;;  %v4230_v38 = vld [vmem:[%s5631_s9 + $0x1] ss:$0 sm:$0xff] }
 0xe56   :  { %v3348_v8 = vmul.f32 %v4802_v7, %v5411_v41  ;;  %v4224_v41 = vld [vmem:[%s5628_s7 + $0x1] ss:$0 sm:$0xff] }
 0xe58   :  { %4620 = vmatmul.mubr.msk.f32.vlgmr.msra.gmra.mxu1 %vm209_vm2, %v3348_v8 }
 0xecf   :  { %v2226_v9 = vpop.f32.mrf.mxu1 }
 0xed0   :  { %2230 = vst.msk [vmem:[#allocation2] sm:$0xff] %vm209_vm2, %v2226_v9 }
 0xed1   :  { %v4551_v10 = vpop.f32.mrf.mxu1 }
 0xed3   :  { %v2394_v11 = vpop.f32.mrf.mxu1 }
 0xed4   :  { %2399 = vrot.lane.b32.xlu0 %v2394_v11, %s4832_s3 }
 0xed5   :  { %v4561_v12 = vpop.f32.mrf.mxu1 }
 0xf04   :  { %v2566_v13 = vpop.f32.mrf.mxu1 }
 0xf05   :  { %2571 = vrot.lane.b32.xlu1 %v2566_v13, %s4833_s22  ;;  %v4246_v13 = vld [vmem:[%s5632_s12 + $0x78] sm:$0xff] }
 0xf06   :  { %v4571_v14 = vpop.f32.mrf.mxu1  ;;  %4644 = vmatprep.subr.mxu0 %v4246_v13 }
 0xf07   :  { %v4245_v14 = vld [vmem:[%s5632_s12 + $0x70] sm:$0xff] }
 0xf08   :  { %v2738_v16 = vpop.f32.mrf.mxu1 }
 0xf09   :  { %2743 = vrot.lane.b32.xlu1 %v2738_v16, %s4834_s23  ;;  %v4244_v16 = vld [vmem:[%s5632_s12 + $0x68] sm:$0xff] }
 0xf0a   :  { %v4581_v17 = vpop.f32.mrf.mxu1 }
 0xf0b   :  { %v4243_v17 = vld [vmem:[%s5632_s12 + $0x60] sm:$0xff] }
 0xf0c   :  { %v2909_v18 = vpop.f32.mrf.mxu1 }
 0xf0d   :  { %2913 = vst.msk [vmem:[#allocation2 + $0x8] sm:$0xff] %vm209_vm2, %v2909_v18  ;;  %v4242_v18 = vld [vmem:[%s5632_s12 + $0x58] sm:$0xff] }
 0xf0e   :  { %v4591_v21 = vpop.f32.mrf.mxu1 }
 0xf0f   :  { %v4239_v21 = vld [vmem:[%s5632_s12 + $0x40] sm:$0xff] }
 0xf10   :  { %v3077_v23 = vpop.f32.mrf.mxu1 }
 0xf11   :  { %3082 = vrot.lane.b32.xlu0 %v3077_v23, %s4832_s3 }
 0xf12   :  { %v4601_v25 = vpop.f32.mrf.mxu1 }
 0xf14   :  { %v3249_v26 = vpop.f32.mrf.mxu1 }
 0xf15   :  { %3254 = vrot.lane.b32.xlu0 %v3249_v26, %s4833_s22 }
 0xf16   :  { %v4611_v27 = vpop.f32.mrf.mxu1 }
 0xf18   :  { %v3421_v2 = vpop.f32.mrf.mxu1 }
 0xf19   :  { %3426 = vrot.lane.b32.xlu1 %v3421_v2, %s4834_s23 }
 0xf1a   :  { %v4621_v28 = vpop.f32.mrf.mxu1 }
 0xf46   :  { %v2400_v39 = vpop.permute.xlu0 %2399 }
 0xf47   :  { %2402 = vst.msk [vmem:[#allocation2] sm:$0xff] %vm549_vm3, %v2400_v39 }
 0xf77   :  { %v2572_v29 = vpop.permute.xlu1 %2571 }
 0xf78   :  { %2574 = vst.msk [vmem:[#allocation2] sm:$0xff] %vm722_vm4, %v2572_v29 }
 0xf7b   :  { %v2744_v30 = vpop.permute.xlu1 %2743 }
 0xf7c   :  { %2746 = vst.msk [vmem:[#allocation2] sm:$0xff] %vm895_vm5, %v2744_v30 }
 0xf83   :  { %v3083_v32 = vpop.permute.xlu0 %3082  ;;  %v3430_v35 = vld [vmem:[#allocation2] sm:$0xff] }
 0xf84   :  { %3085 = vst.msk [vmem:[#allocation2 + $0x8] sm:$0xff] %vm549_vm3, %v3083_v32  ;;  %4630 = vmatprep.mubr.msk.f32.mxu0 %vm70_vm0, %v3430_v35 }
 0xf87   :  { %v3255_v36 = vpop.permute.xlu0 %3254 }
 0xf88   :  { %3257 = vst.msk [vmem:[#allocation2 + $0x8] sm:$0xff] %vm722_vm4, %v3255_v36 }
 0xf8b   :  { %v3427_v37 = vpop.permute.xlu1 %3426 }
 0xf8c   :  { %3429 = vst.msk [vmem:[#allocation2 + $0x8] sm:$0xff] %vm895_vm5, %v3427_v37 }
 0xf93   :  { %v3431_v40 = vld [vmem:[#allocation2 + $0x8] sm:$0xff] }
 0xf94   :  { %4631 = vmatmul.mubr.msk.f32.vlgmr.msra.gmra.mxu0 %vm70_vm0, %v3431_v40  ;;  %v4248_v40 = vld [vmem:[%s5634_s13 + $0x1] ss:$0 sm:$0xff] }
 0xf95   :  { %4645 = vmatpush3.msra.mxu0 %v4246_v13  ;;  %v3905_v13 = vld [vmem:[%s5638_s18 + $0x10] sm:$0xff] }
 0xf96   :  { %4646 = vmatprep.subr.mxu0 %v4245_v14 }
 0xf97   :  { %4647 = vmatpush3.msra.mxu0 %v4245_v14  ;;  %v3904_v14 = vld [vmem:[%s5638_s18 + $0x8] sm:$0xff] }
 0xf98   :  { %4648 = vmatprep.subr.mxu0 %v4244_v16 }
 0xf99   :  { %4649 = vmatpush3.msra.mxu0 %v4244_v16  ;;  %v3903_v16 = vld [vmem:[%s5638_s18] sm:$0xff] }
 0xf9a   :  { %4650 = vmatprep.subr.mxu0 %v4243_v17 }
 0xf9b   :  { %4651 = vmatpush3.msra.mxu0 %v4243_v17 }
 0xf9c   :  { %4652 = vmatprep.subr.mxu0 %v4242_v18 }
 0xf9d   :  { %4653 = vmatpush3.msra.mxu0 %v4242_v18  ;;  %v3828_v18 = vld [vmem:[%s5639_s17] sm:$0x1] }
 0xf9e   :  { %4654 = vmatprep.subr.mxu0 %v4241_v19 }
 0xf9f   :  { %4655 = vmatpush3.msra.mxu0 %v4241_v19 }
 0xfa0   :  { %4656 = vmatprep.subr.mxu0 %v4240_v20 }
 0xfa1   :  { %4657 = vmatpush3.msra.mxu0 %v4240_v20 }
 0xfa2   :  { %4658 = vmatprep.subr.mxu0 %v4239_v21 }
 0xfa3   :  { %4659 = vmatpush3.msra.mxu0 %v4239_v21 }
 0xfa4   :  { %4685 = vmatprep.subr.mxu0 %v4819_v34 }
0x1054   :  { %v4632_v33 = vpop.f32.mrf.mxu0 }
0x1055   :  { %v3523_v31 = vadd.f32 %v4632_v33, %v4224_v41 }
0x1056   :  { %v3517_v42 = vpop.f32.mrf.mxu0 }
0x1057   :  { %v3527_v43 = vadd.f32 %v3523_v31, %v5277_v62  ;;  %v3518_v44 = vadd.f32 %v4224_v41, %v3517_v42 }
0x1059   :  { %v3526_v45 = vadd.f32 %v3518_v44, %v5275_v61  ;;  %v3535_v46 = vsel %vm70_vm0, %v3527_v43, 0.0  ;;  %v4234_v61 = vld [vmem:[%s5629_s10 + $0x38] sm:$0xff] }
0x105a   :  { %3536 = vadd.xlane.f32.xlu1 %v3535_v46  ;;  %4633 = vmatprep.subr.mxu1 %v4234_v61 }
0x105b   :  { %v3532_v47 = vsel %vm70_vm0, %v3526_v45, 0.0  ;;  %4634 = vmatpush3.msra.mxu1 %v4234_v61  ;;  %v3985_v61 = vld [vmem:[%s5637_s16 + $0x10] sm:$0xff] }
0x105c   :  { %3533 = vadd.xlane.f32.xlu0 %v3532_v47  ;;  %4635 = vmatprep.subr.mxu1 %v4233_v55 }
0x105d   :  { %4636 = vmatpush3.msra.mxu1 %v4233_v55  ;;  %v3984_v55 = vld [vmem:[%s5637_s16 + $0x8] sm:$0xff] }
0x105e   :  { %4637 = vmatprep.subr.mxu1 %v4232_v56 }
0x105f   :  { %4638 = vmatpush3.msra.mxu1 %v4232_v56  ;;  %v3983_v56 = vld [vmem:[%s5637_s16] sm:$0xff] }
0x1060   :  { %4639 = vmatprep.subr.mxu1 %v4231_v57 }
0x1061   :  { %4640 = vmatpush3.msra.mxu1 %v4231_v57 }
0x1062   :  { %4663 = vmatprep.subr.mxu1 %v4819_v34 }
0x10e3   :  { %v3537_v48 = vpop.xlane.xlu1 %3536 }
0x10e4   :  { %v3539_v49 = vmul.f32 0.03125, %v3537_v48 }
0x10e5   :  { %v3534_v3 = vpop.xlane.xlu0 %3533 }
0x10e6   :  { %v3538_v50 = vmul.f32 0.03125, %v3534_v3  ;;  %v3541_v58 = vsub.f32 %v3527_v43, %v3539_v49 }
0x10e8   :  { %v3540_v51 = vsub.f32 %v3526_v45, %v3538_v50  ;;  %v3543_v54 = vmul.f32 %v3541_v58, %v3541_v58 }
0x10ea   :  { %v3542_v52 = vmul.f32 %v3540_v51, %v3540_v51  ;;  %v3547_v62 = vsel %vm70_vm0, %v3543_v54, 0.0 }
0x10ec   :  { %v3544_v53 = vsel %vm70_vm0, %v3542_v52, 0.0 }
0x10ed   :  { %3545 = vadd.xlane.f32.xlu0 %v3544_v53 }
0x10f1   :  { %3548 = vadd.xlane.f32.xlu0 %v3547_v62  ;;  %v3986_v62 = vld [vmem:[%s5637_s16 + $0x18] sm:$0xff] }
0x1176   :  { %v3546_v59 = vpop.xlane.xlu0 %3545 }
0x1177   :  { %v3550_v60 = vmul.f32 0.03125, %v3546_v59 }
0x1179   :  { %v3552_v63 = vadd.f32 1e-12, %v3550_v60 }
0x117a   :  { %v3549_v0 = vpop.xlane.xlu0 %3548 }
0x117b   :  { %4803 = vrsqrt.f32 %v3552_v63  ;;  %v3551_v1 = vmul.f32 0.03125, %v3549_v0 }
0x117d   :  { %v3553_v4 = vadd.f32 1e-12, %v3551_v1 }
0x117f   :  { %4805 = vrsqrt.f32 %v3553_v4 }
0x1188   :  { %v4804_v5 = vpop.eup %4803 }
0x1189   :  { %v3556_v6 = vmul.f32 %v4804_v5, %v3540_v51  ;;  %v4253_v5 = vld [vmem:[%s5635_s14 + $0x1] ss:$0 sm:$0xff] }
0x118b   :  { %v3564_v7 = vmul.f32 %v4229_v15, %v3556_v6 }
0x118c   :  { %v4806_v8 = vpop.eup %4805 }
0x118d   :  { %v3557_v9 = vmul.f32 %v4806_v8, %v3541_v58  ;;  %v3572_v10 = vadd.f32 %v4230_v38, %v3564_v7 }
0x118f   :  { %v3565_v11 = vmul.f32 %v4229_v15, %v3557_v9  ;;  %4641 = vmatprep.mubr.msk.f32.mxu1 %vm70_vm0, %v3572_v10 }
0x1191   :  { %v3573_v12 = vadd.f32 %v4230_v38, %v3565_v11  ;;  %v4254_v38 = vld [vmem:[%s5636_s15 + $0x1] ss:$0 sm:$0xff] }
0x1193   :  { %4642 = vmatmul.mubr.msk.f32.vlgmr.msra.gmra.mxu1 %vm70_vm0, %v3573_v12 }
0x1194   :  { %4671 = vmatprep.mubr.msk.f32.mxu1 %vm4820_vm1, %v4819_v34  ;;  %4664 = vmatpush3.msra.mxu1 %v3986_v62 }
0x1195   :  { %4665 = vmatprep.subr.mxu1 %v4819_v34 }
0x1196   :  { %4666 = vmatpush3.msra.mxu1 %v3985_v61 }
0x1197   :  { %4667 = vmatprep.subr.mxu1 %v4819_v34 }
0x1198   :  { %4668 = vmatpush3.msra.mxu1 %v3984_v55 }
0x1199   :  { %4669 = vmatprep.subr.mxu1 %v4819_v34 }
0x119a   :  { %4670 = vmatpush3.msra.mxu1 %v3983_v56 }
0x119b   :  { %4674 = vmatprep.subr.mxu1 %v4819_v34 }
0x1253   :  { %v4643_v23 = vpop.f32.mrf.mxu1 }
0x1254   :  { %v3665_v24 = vadd.f32 %v4643_v23, %v4236_v22  ;;  %v3987_v23 = vld [vmem:[%s5639_s17] sm:$0x1] }
0x1255   :  { %v3659_v25 = vpop.f32.mrf.mxu1 }
0x1256   :  { %v3671_v26 = vmul.f32 0.70710677, %v3665_v24  ;;  %v3660_v27 = vadd.f32 %v4236_v22, %v3659_v25  ;;  %v3669_v35 = vmul.f32 0.5, %v3665_v24 }
0x1258   :  { %4807 = verf.f32 %v3671_v26  ;;  %v3670_v2 = vmul.f32 0.70710677, %v3660_v27  ;;  %v3668_v30 = vmul.f32 0.5, %v3660_v27  ;;  %v3907_v27 = vld [vmem:[%s5640_s19] sm:$0x1] }
0x125a   :  { %4809 = verf.f32 %v3670_v2 }
0x1265   :  { %v4808_v28 = vpop.eup %4807 }
0x1266   :  { %v3675_v29 = vadd.f32 1.0, %v4808_v28 }
0x1267   :  { %v4810_v39 = vpop.eup %4809 }
0x1268   :  { %v3674_v32 = vadd.f32 1.0, %v4810_v39  ;;  %v3677_v37 = vmul.f32 %v3675_v29, %v3669_v35 }
0x126a   :  { %v3676_v36 = vmul.f32 %v3674_v32, %v3668_v30 }
0x126c   :  { %4660 = vmatprep.mubr.msk.f32.mxu0 %vm1842_vm6, %v3676_v36 }
0x126d   :  { %4661 = vmatmul.mubr.msk.f32.vlgmr.msra.gmra.mxu0 %vm1842_vm6, %v3677_v37 }
0x126e   :  { %4693 = vmatprep.mubr.msk.f32.mxu0 %vm4820_vm1, %v4819_v34  ;;  %4686 = vmatpush3.msra.mxu0 %v3986_v62 }
0x126f   :  { %4687 = vmatprep.subr.mxu0 %v4819_v34 }
0x1270   :  { %4688 = vmatpush3.msra.mxu0 %v3985_v61 }
0x1271   :  { %4689 = vmatprep.subr.mxu0 %v4819_v34 }
0x1272   :  { %4690 = vmatpush3.msra.mxu0 %v3984_v55 }
0x1273   :  { %4691 = vmatprep.subr.mxu0 %v4819_v34 }
0x1274   :  { %4692 = vmatpush3.msra.mxu0 %v3983_v56 }
0x132d   :  { %v4662_v41 = vpop.f32.mrf.mxu0 }
0x132e   :  { %v3773_v33 = vadd.f32 %v4662_v41, %v4248_v40 }
0x132f   :  { %v3767_v31 = vpop.f32.mrf.mxu0 }
0x1330   :  { %v3777_v42 = vadd.f32 %v3773_v33, %v3573_v12  ;;  %v3768_v43 = vadd.f32 %v4248_v40, %v3767_v31  ;;  %v3906_v12 = vld [vmem:[%s5638_s18 + $0x18] sm:$0xff] }
0x1332   :  { %v3776_v44 = vadd.f32 %v3768_v43, %v3572_v10  ;;  %v3785_v45 = vsel %vm70_vm0, %v3777_v42, 0.0 }
0x1333   :  { %3786 = vadd.xlane.f32.xlu1 %v3785_v45 }
0x1334   :  { %v3782_v46 = vsel %vm70_vm0, %v3776_v44, 0.0 }
0x1335   :  { %3783 = vadd.xlane.f32.xlu0 %v3782_v46 }
0x13bc   :  { %v3787_v47 = vpop.xlane.xlu1 %3786 }
0x13bd   :  { %v3789_v48 = vmul.f32 0.03125, %v3787_v47 }
0x13be   :  { %v3784_v49 = vpop.xlane.xlu0 %3783 }
0x13bf   :  { %v3791_v3 = vsub.f32 %v3777_v42, %v3789_v48  ;;  %v3788_v50 = vmul.f32 0.03125, %v3784_v49 }
0x13c1   :  { %v3790_v58 = vsub.f32 %v3776_v44, %v3788_v50  ;;  %v3793_v51 = vmul.f32 %v3791_v3, %v3791_v3 }
0x13c3   :  { %v3797_v52 = vsel %vm70_vm0, %v3793_v51, 0.0  ;;  %v3792_v53 = vmul.f32 %v3790_v58, %v3790_v58 }
0x13c4   :  { %3798 = vadd.xlane.f32.xlu1 %v3797_v52 }
0x13c5   :  { %v3794_v54 = vsel %vm70_vm0, %v3792_v53, 0.0 }
0x13c6   :  { %3795 = vadd.xlane.f32.xlu0 %v3794_v54 }
0x144d   :  { %v3799_v57 = vpop.xlane.xlu1 %3798 }
0x144e   :  { %v3801_v59 = vmul.f32 0.03125, %v3799_v57 }
0x144f   :  { %v3796_v60 = vpop.xlane.xlu0 %3795 }
0x1450   :  { %v3803_v63 = vadd.f32 1e-12, %v3801_v59  ;;  %v3800_v0 = vmul.f32 0.03125, %v3796_v60 }
0x1452   :  { %4811 = vrsqrt.f32 %v3803_v63  ;;  %v3802_v1 = vadd.f32 1e-12, %v3800_v0 }
0x1454   :  { %4813 = vrsqrt.f32 %v3802_v1 }
0x145f   :  { %v4812_v4 = vpop.eup %4811 }
0x1460   :  { %v3807_v15 = vmul.f32 %v4812_v4, %v3791_v3 }
0x1461   :  { %v4814_v6 = vpop.eup %4813 }
0x1462   :  { %v3806_v7 = vmul.f32 %v4814_v6, %v3790_v58  ;;  %v3815_v8 = vmul.f32 %v4253_v5, %v3807_v15 }
0x1464   :  { %v3823_v9 = vadd.f32 %v4254_v38, %v3815_v8  ;;  %v3814_v10 = vmul.f32 %v4253_v5, %v3806_v7 }
0x1466   :  { %4694 = vmatmul.mubr.msk.f32.vlgmr.msra.gmra.mxu0 %vm70_vm0, %v3823_v9  ;;  %v3822_v11 = vadd.f32 %v4254_v38, %v3814_v10 }
0x1468   :  { %4672 = vmatmul.mubr.msk.f32.vlgmr.msra.gmra.mxu1 %vm70_vm0, %v3822_v11 }
0x1469   :  { %4682 = vmatprep.mubr.msk.f32.mxu1 %vm4820_vm1, %v4819_v34  ;;  %4675 = vmatpush3.msra.mxu1 %v3906_v12 }
0x146a   :  { %4676 = vmatprep.subr.mxu1 %v4819_v34 }
0x146b   :  { %4677 = vmatpush3.msra.mxu1 %v3905_v13 }
0x146c   :  { %4678 = vmatprep.subr.mxu1 %v4819_v34 }
0x146d   :  { %4679 = vmatpush3.msra.mxu1 %v3904_v14 }
0x146e   :  { %4680 = vmatprep.subr.mxu1 %v4819_v34 }
0x146f   :  { %4681 = vmatpush3.msra.mxu1 %v3903_v16 }
0x1470   :  { %4696 = vmatprep.subr.mxu1 %v4819_v34 }
0x1526   :  { %v4057_v17 = vpop.f32.mrf.mxu0 }
0x1527   :  { %v4058_v24 = vadd.f32 %v4057_v17, %v3987_v23 }
0x1528   :  { %v3898_v19 = vpop.f32.mrf.mxu1  ;;  %v4695_v20 = vpop.f32.mrf.mxu0 }
0x1529   :  { %v3899_v21 = vadd.f32 %v3898_v19, %v3828_v18 }
0x152a   :  { %v4673_v22 = vpop.f32.mrf.mxu1 }
0x152b   :  { %4815 = vtanh.f32 %v3899_v21 }
0x152c   :  { %4817 = vtanh.f32 %v4058_v24 }
0x1538   :  { %v4816_v25 = vpop.eup %4815 }
0x1539   :  { %4683 = vmatmul.mubr.msk.f32.vlgmr.msra.gmra.mxu1 %vm70_vm0, %v4816_v25  ;;  %v4818_v26 = vpop.eup %4817 }
0x153a   :  { %4697 = vmatpush3.msra.mxu1 %v3906_v12  ;;  %4704 = vmatprep.mubr.msk.f32.mxu1 %vm4820_vm1, %v4819_v34 }
0x153b   :  { %4698 = vmatprep.subr.mxu1 %v4819_v34 }
0x153c   :  { %4699 = vmatpush3.msra.mxu1 %v3905_v13 }
0x153d   :  { %4700 = vmatprep.subr.mxu1 %v4819_v34 }
0x153e   :  { %4701 = vmatpush3.msra.mxu1 %v3904_v14 }
0x153f   :  { %4702 = vmatprep.subr.mxu1 %v4819_v34  ;;  %v4066_v34 = vld [vmem:[%s5640_s19] sm:$0x1] }
0x1540   :  { %4703 = vmatpush3.msra.mxu1 %v3903_v16 }
0x1541   :  { %4705 = vmatmul.mubr.msk.f32.vlgmr.msra.gmra.mxu1 %vm70_vm0, %v4818_v26 }
0x15f9   :  { %v3977_v2 = vpop.f32.mrf.mxu1 }
0x15fa   :  { %v3978_v28 = vadd.f32 %v3977_v2, %v3907_v27 }
0x15fb   :  { %v4684_v39 = vpop.f32.mrf.mxu1 }
0x15fc   :  { %3982 = vst.msk [vmem:[%s5641_s20] sm:$0x1] %vm3981_vm7, %v3978_v28 }
0x1601   :  { %v4136_v29 = vpop.f32.mrf.mxu1 }
0x1602   :  { %v4137_v30 = vadd.f32 %v4136_v29, %v4066_v34 }
0x1603   :  { %v4706_v32 = vpop.f32.mrf.mxu1 }
0x1604   :  { %4140 = vst.msk [vmem:[%s5641_s20 + $0x1] sm:$0x1] %vm3981_vm7, %v4137_v30 }

</bundles_post_ra>
